<compile_context>
chip_gen: v7x
topology: tpu7x:2x2x1
jax: 0.10.0
libtpu: 0.0.40
codegen_flags: <defaults>
</compile_context>

<pallas_src>
import functools
import math

import jax
import jax.numpy as jnp
from jax.experimental import pallas as pl
from jax.experimental.pallas import tpu as pltpu

_LANE = 128


def _round_up(x, m):
    return ((x + m - 1) // m) * m


# ----------------------------------------------------------------------------
# Kernel 1: fc1 (Linear + ReLU) fused with LayerNorm, written channel-major.
#   x: (B, Lp, Din) f32  ->  u: (H, B, Lp) bf16
# ----------------------------------------------------------------------------
def _fc1_ln_kernel(x_ref, w_ref, b_ref, g_ref, beta_ref, o_ref):
    B, tl, Din = x_ref.shape
    x = x_ref[...].reshape(B * tl, Din)
    h = jnp.dot(x, w_ref[...], preferred_element_type=jnp.float32) + b_ref[...]
    h = jnp.maximum(h, 0.0)                                      # ReLU
    mu = jnp.mean(h, axis=-1, keepdims=True)                     # LayerNorm (eps = 1e-5)
    var = jnp.mean((h - mu) ** 2, axis=-1, keepdims=True)
    hn = (h - mu) * jax.lax.rsqrt(var + 1e-5)
    hn = (hn * g_ref[...] + beta_ref[...]).astype(o_ref.dtype)   # cast to bf16 BEFORE the transpose
    for bi in range(B):                                          # small static loop; temporaries die at store
        o_ref[:, bi, :] = hn[bi * tl:(bi + 1) * tl, :].T         # (H, tl) channel-major store


def fc1_ln(x, w1, b1, gamma, beta, *, seq_tile, vmem_limit):
    B, Lp, Din = x.shape
    H = w1.shape[1]
    return pl.pallas_call(
        _fc1_ln_kernel,
        out_shape=jax.ShapeDtypeStruct((H, B, Lp), jnp.bfloat16),
        grid=(Lp // seq_tile,),
        in_specs=[
            pl.BlockSpec((B, seq_tile, Din), lambda lt: (0, lt, 0)),
            pl.BlockSpec((Din, H), lambda lt: (0, 0)),
            pl.BlockSpec((1, H), lambda lt: (0, 0)),
            pl.BlockSpec((1, H), lambda lt: (0, 0)),
            pl.BlockSpec((1, H), lambda lt: (0, 0)),
        ],
        out_specs=pl.BlockSpec((H, B, seq_tile), lambda lt: (0, 0, lt)),
        compiler_params=pltpu.CompilerParams(
            dimension_semantics=("parallel",), vmem_limit_bytes=vmem_limit),
    )(x, w1, b1, gamma, beta)


# ----------------------------------------------------------------------------
# Kernel 2: causal S4D convolution + D skip + GELU, blocked over channels.
#   kt: (H, 1, Lc) kernel rows (roll path) or (H, Lp, Lp) bf16 Toeplitz (fallback)
#   u:  (H, B, Lp) bf16,  D: (H,) f32 in SMEM  ->  y: (H, B, Lp) bf16
# ----------------------------------------------------------------------------
def _s4_conv_kernel(kt_ref, u_ref, d_ref, o_ref, *, build_t):
    hc, B, Lp = u_ref.shape
    hb = pl.program_id(0)

    @pl.loop(0, hc)                                   # one channel's working set live at a time
    def _(h):
        if build_t:
            Lc = kt_ref.shape[2]
            krep = jnp.broadcast_to(kt_ref[h], (Lp, Lc))          # (Lp, Lc) kernel row per sublane
            # T[m, l] = k[l - m] for l >= m; the strided-roll wraparound lands in the zero
            # padding because Lc >= 2*Lp, so no iota/causal mask is needed.
            t = pltpu.roll(krep, 0, axis=1, stride=1, stride_axis=0)[:, :Lp]
            t = t.astype(jnp.bfloat16)                            # no-op when kt is already bf16
        else:
            t = kt_ref[h]                                         # (Lp, Lp) bf16 streamed from HBM
        u = u_ref[h]                                              # (B, Lp) bf16
        # TODO(synk): for B << MXU width the transposed product (L as the streamed M dim, built
        # from a reversed kernel row with the same strided roll) would cut RHS pushes; skipped
        # since the push savings is offset by the extra LHS streaming at these shapes.
        y = jnp.dot(u, t, preferred_element_type=jnp.float32)     # causal conv == rfft/irfft(n=2L)
        y = y + d_ref[hb * hc + h] * u.astype(jnp.float32)        # + u * D   (f32)
        o_ref[h] = jax.nn.gelu(y, approximate=True).astype(o_ref.dtype)


def s4_conv(u, kt, D, *, channel_block, build_t, vmem_limit):
    H, B, Lp = u.shape
    if build_t:
        kt_spec = pl.BlockSpec((channel_block, 1, kt.shape[2]), lambda hb: (hb, 0, 0))
    else:
        kt_spec = pl.BlockSpec((channel_block, Lp, Lp), lambda hb: (hb, 0, 0))
    return pl.pallas_call(
        functools.partial(_s4_conv_kernel, build_t=build_t),
        out_shape=jax.ShapeDtypeStruct((H, B, Lp), jnp.bfloat16),
        grid=(H // channel_block,),
        in_specs=[
            kt_spec,
            pl.BlockSpec((channel_block, B, Lp), lambda hb: (hb, 0, 0)),
            pl.BlockSpec(memory_space=pltpu.MemorySpace.SMEM),
        ],
        out_specs=pl.BlockSpec((channel_block, B, Lp), lambda hb: (hb, 0, 0)),
        compiler_params=pltpu.CompilerParams(
            dimension_semantics=("parallel",), vmem_limit_bytes=vmem_limit),
    )(kt, u, D)


# ----------------------------------------------------------------------------
# Kernel 3 (fused head): Conv1d(H, 2H, 1) + GLU(dim=-2) + masked max over L
#                        + fc2 + LeakyReLU + fc3
#   y: (H, B, Lp) bf16  ->  logits: (B, n_classes) f32
# ----------------------------------------------------------------------------
def _head_kernel(y_ref, wo_ref, bo_ref, w2_ref, b2_ref, w3_ref, b3_ref, o_ref,
                 feat_ref, *, valid_len):
    H, tb, Lp = y_ref.shape
    need_mask = valid_len < Lp
    if need_mask:
        mask = jax.lax.broadcasted_iota(jnp.int32, (1, Lp), 1) < valid_len
    for bi in range(tb):                                          # small static loop over batch tile
        yb = y_ref[:, bi, :].astype(jnp.float32)                  # (H, Lp)
        z = jnp.dot(wo_ref[...], yb, preferred_element_type=jnp.float32) + bo_ref[...]
        glu = z[:H] * jax.nn.sigmoid(z[H:])                       # GLU along channel dim
        if need_mask:
            glu = jnp.where(mask, glu, -jnp.inf)                  # exclude padded sequence tail
        feat_ref[:, bi:bi + 1] = jnp.max(glu, axis=-1, keepdims=True)   # (H, 1) max over sequence
    feats = feat_ref[...].T                                       # (tb, H)
    h2 = jnp.dot(feats, w2_ref[...], preferred_element_type=jnp.float32) + b2_ref[...]
    h2 = jnp.where(h2 >= 0.0, h2, 0.01 * h2)                      # LeakyReLU(0.01)
    o_ref[...] = jnp.dot(h2, w3_ref[...], preferred_element_type=jnp.float32) + b3_ref[...]


def glu_fc_head(y, w_out, b_out, w2, b2, w3, b3, *, batch_tile, valid_len, vmem_limit):
    H, B, Lp = y.shape
    F2 = w2.shape[1]
    C = w3.shape[1]
    return pl.pallas_call(
        functools.partial(_head_kernel, valid_len=valid_len),
        out_shape=jax.ShapeDtypeStruct((B, C), jnp.float32),
        grid=(B // batch_tile,),
        in_specs=[
            pl.BlockSpec((H, batch_tile, Lp), lambda bt: (0, bt, 0)),
            pl.BlockSpec((2 * H, H), lambda bt: (0, 0)),
            pl.BlockSpec((2 * H, 1), lambda bt: (0, 0)),
            pl.BlockSpec((H, F2), lambda bt: (0, 0)),
            pl.BlockSpec((1, F2), lambda bt: (0, 0)),
            pl.BlockSpec((F2, C), lambda bt: (0, 0)),
            pl.BlockSpec((1, C), lambda bt: (0, 0)),
        ],
        out_specs=pl.BlockSpec((batch_tile, C), lambda bt: (bt, 0)),
        scratch_shapes=[pltpu.VMEM((H, batch_tile), jnp.float32)],
        compiler_params=pltpu.CompilerParams(
            dimension_semantics=("parallel",), vmem_limit_bytes=vmem_limit),
    )(y, w_out, b_out, w2, b2, w3, b3)


# ----------------------------------------------------------------------------
# Weight-only glue (hoisted out of the jitted per-step forward).
# ----------------------------------------------------------------------------
def s4d_kernel_k(log_dt, C_ri, log_A_real, A_imag, L):
    # TODO(synk): complex exp has no Pallas TPU equivalent; kept in plain JAX (runs once,
    # since it depends only on frozen parameters).
    dt = jnp.exp(log_dt)                                          # (H,)
    C = C_ri[..., 0] + 1j * C_ri[..., 1]                          # (H, N/2) complex64
    A = -jnp.exp(log_A_real) + 1j * A_imag                        # (H, N/2)
    dtA = A * dt[:, None]
    K = dtA[:, :, None] * jnp.arange(L, dtype=jnp.float32)        # (H, N/2, L)
    C2 = C * (jnp.exp(dtA) - 1.0) / A
    k = 2.0 * jnp.real(jnp.sum(C2[:, :, None] * jnp.exp(K), axis=1))  # (H, L)
    return k.astype(jnp.float32)


def _causal_toeplitz_bf16(k, Lp):
    # Last-resort fallback only (strided roll unavailable): T[h, m, l] = k[h, l-m] (l >= m).
    # TODO(synk): an in-kernel lane-gather (jnp.take) build would avoid this HBM traffic.
    H, L = k.shape
    kz = jnp.pad(k, ((0, 0), (0, Lp - L)))
    idx = jnp.arange(Lp)[None, :] - jnp.arange(Lp)[:, None]       # (m, l) -> l - m
    gath = jnp.take(kz, jnp.clip(idx, 0, Lp - 1), axis=1)         # (H, Lp, Lp)
    return jnp.where((idx >= 0)[None], gath, 0.0).astype(jnp.bfloat16)


def _strided_roll_works(dtype):
    """Probe: pltpu.roll(x, 0, axis=1, stride=1, stride_axis=0) must give
    out[m, j] = x[m, (j - m) % n] for the given dtype."""
    rows, cols = 128, 256

    def probe(x_ref, o_ref):
        o_ref[...] = pltpu.roll(x_ref[...], 0, axis=1, stride=1, stride_axis=0)

    x = (jnp.arange(rows * cols, dtype=jnp.float32) % 251.0).reshape(rows, cols).astype(dtype)
    try:
        got = pl.pallas_call(
            probe, out_shape=jax.ShapeDtypeStruct((rows, cols), dtype))(x)
        idx = (jnp.arange(cols)[None, :] - jnp.arange(rows)[:, None]) % cols
        want = jnp.take_along_axis(x, idx, axis=1)
        return bool(jnp.array_equal(got, want))
    except Exception:
        return False


def _vmem_budget_bytes():
    try:
        cap = int(pltpu.get_tpu_info().vmem_capacity_bytes)
    except Exception:
        cap = 64 * 1024 * 1024
    # Clamp to per-TensorCore VMEM (64 MiB on v7x) in case per-chip capacity is reported,
    # then keep 25% headroom.  Safe on v5e/v6e too (the kernels need far less).
    cap = min(cap, 64 * 1024 * 1024)
    return (3 * cap) // 4


def _pick_channel_block(H, B, Lp, Lc, build_t, budget):
    """Channels per kernel-2 grid step.  With the (H, B, Lp) layout any divisor of H is a
    legal block, so we never return an infeasible block; even grid extents preferred (v7x)."""
    bpad = max(B, 8)                                              # sublane padding of (B, Lp) tiles
    cands = [c for c in (32, 16, 8, 4, 2, 1) if H % c == 0]

    def need(hc):
        io = 2 * 2 * 2 * hc * bpad * Lp                           # double-buffered bf16 u + y blocks
        kblk = (2 * 2 * hc * 8 * Lc) if build_t else (2 * 2 * hc * Lp * Lp)
        tmp = (4 * Lp * Lc + 2 * Lp * Lp) if build_t else 0       # one channel's krep + T (pl.loop)
        tmp += 4 * 4 * bpad * Lp                                  # f32 y / gelu temporaries
        return io + kblk + tmp

    feasible = [c for c in cands if need(c) <= budget] or [min(cands)]
    even = [c for c in feasible if (H // c) % 2 == 0]             # >= 2 (even) steps for v7x's 2 TCs
    hc = max(even) if even else max(feasible)
    limit = int(min(64 * 1024 * 1024, max(budget, int(1.25 * need(hc)))))
    return hc, limit


def _pick_seq_tile(Lp):
    # Lane-aligned tiles (Lp is always a multiple of 128); prefer >= 2 grid steps for v7x.
    for t in (512, 256, 128):
        if Lp % t == 0 and Lp // t >= 2:
            return t
    return 128


# ----------------------------------------------------------------------------
# Full model forward
# ----------------------------------------------------------------------------
def make_s4_forward(params, L):
    """Precomputes the weight-only pieces and returns a jitted forward(x) for x: (B, L, Din)."""
    H = params["w1"].shape[1]
    k = s4d_kernel_k(params["log_dt"], params["C"], params["log_A_real"],
                     params["A_imag"], L)                         # (H, L), computed once
    Lp = _round_up(L, _LANE)                                      # padded sequence length
    Lc = 2 * Lp                                                   # >= 2L-1: roll wraparound hits zeros

    roll_dtype = None
    for dt in (jnp.bfloat16, jnp.float32):                        # prefer bf16 Toeplitz build
        if _strided_roll_works(dt):
            roll_dtype = dt
            break
    build_t = roll_dtype is not None
    if build_t:
        kt = jnp.pad(k, ((0, 0), (0, Lc - L))).astype(roll_dtype).reshape(H, 1, Lc)
    else:
        kt = _causal_toeplitz_bf16(k, Lp)                         # (H, Lp, Lp) bf16 fallback

    budget = _vmem_budget_bytes()
    seq_tile = _pick_seq_tile(Lp)

    def forward(x):
        B = x.shape[0]
        if Lp != L:
            x = jnp.pad(x, ((0, 0), (0, Lp - L), (0, 0)))         # causal conv: tail never leaks back
        hc, conv_limit = _pick_channel_block(H, B, Lp, Lc, build_t, budget)
        # fc1 + ReLU + LayerNorm, output channel-major bf16 (no HBM transposes between kernels).
        u = fc1_ln(x, params["w1"], params["b1"], params["ln_g"], params["ln_b"],
                   seq_tile=seq_tile, vmem_limit=budget)
        # Causal S4D conv + D skip + GELU.  (DropoutNd inactive: dropout=0.0 -> nn.Identity.)
        y = s4_conv(u, kt, params["D"], channel_block=hc, build_t=build_t,
                    vmem_limit=conv_limit)
        # Conv1d(k=1) + GLU + masked max over L fused with fc2 + LeakyReLU + fc3.
        tb = 8 if B % 8 == 0 else B
        logits = glu_fc_head(y, params["w_out"], params["b_out"],
                             params["w2"], params["b2"], params["w3"], params["b3"],
                             batch_tile=tb, valid_len=L, vmem_limit=budget)
        y_hat = jnp.argmax(logits, axis=0)        # matches torch.argmax(logits, dim=0)
        return {"logits": logits, "Y_hat": y_hat}

    return jax.jit(forward)


# ----------------------------------------------------------------------------
# Deterministic parameter init (shapes follow the PyTorch __init__)
# ----------------------------------------------------------------------------
def init_params(key, input_dim, model_dim, state_dim, n_classes,
                dt_min=0.001, dt_max=0.1):
    H, N = model_dim, state_dim
    ks = jax.random.split(key, 8)
    p = {}
    p["w1"] = jax.random.normal(ks[0], (input_dim, H), jnp.float32) / math.sqrt(input_dim)
    p["b1"] = jnp.zeros((1, H), jnp.float32)
    p["ln_g"] = jnp.ones((1, H), jnp.float32)
    p["ln_b"] = jnp.zeros((1, H), jnp.float32)
    p["D"] = jax.random.normal(ks[1], (H,), jnp.float32)
    p["log_dt"] = (jax.random.uniform(ks[2], (H,), jnp.float32)
                   * (math.log(dt_max) - math.log(dt_min)) + math.log(dt_min))
    p["C"] = jax.random.normal(ks[3], (H, N // 2, 2), jnp.float32) * (1.0 / math.sqrt(2.0))
    p["log_A_real"] = jnp.log(0.5 * jnp.ones((H, N // 2), jnp.float32))
    p["A_imag"] = math.pi * jnp.broadcast_to(
        jnp.arange(N // 2, dtype=jnp.float32), (H, N // 2))
    p["w_out"] = jax.random.normal(ks[4], (2 * H, H), jnp.float32) / math.sqrt(H)
    p["b_out"] = jnp.zeros((2 * H, 1), jnp.float32)
    p["w2"] = jax.random.normal(ks[5], (H, 512), jnp.float32) / math.sqrt(H)
    p["b2"] = jnp.zeros((1, 512), jnp.float32)
    p["w3"] = jax.random.normal(ks[6], (512, n_classes), jnp.float32) / math.sqrt(512)
    p["b3"] = jnp.zeros((1, n_classes), jnp.float32)
    return p


if __name__ == "__main__":
    B, L = 2, 16
    input_dim, model_dim, state_dim, n_classes = 16, 32, 64, 10

    key = jax.random.PRNGKey(0)
    kx, kp = jax.random.split(key)
    x = jax.random.normal(kx, (B, L, input_dim), jnp.float32)
    params = init_params(kp, input_dim, model_dim, state_dim, n_classes)

    fwd = make_s4_forward(params, L)
    out = fwd(x)
    jax.block_until_ready(out)
    assert out["logits"].shape == (B, n_classes)
    assert out["Y_hat"].shape == (n_classes,)
    assert bool(jnp.all(jnp.isfinite(out["logits"])))
    print("KERNEL_OK")
</pallas_src>

<mosaic_0001>
module attributes {stable_mosaic.version = 11 : i64} {
  func.func @probe(%arg0: memref<128x256xbf16, #tpu.memory_space<vmem>>, %arg1: memref<128x256xbf16, #tpu.memory_space<vmem>>) attributes {dimension_semantics = [], scalar_prefetch = 0 : i64, scratch_operands = 0 : i64, tpu.core_type = #tpu.core_type<tc>} {
    %c0 = arith.constant 0 : index
    %c0_0 = arith.constant 0 : index
    %0 = vector.load %arg0[%c0, %c0_0] : memref<128x256xbf16, #tpu.memory_space<vmem>>, vector<128x256xbf16>
    %c0_i32 = arith.constant 0 : i32
    %1 = tpu.dynamic_rotate %0 by %c0_i32 dim 1 {stride = 1 : si32, stride_dimension = 0 : si32} : vector<128x256xbf16>, i32 -> vector<128x256xbf16>
    %c0_1 = arith.constant 0 : index
    %c0_2 = arith.constant 0 : index
    %2 = vector.load %arg1[%c0_1, %c0_2] : memref<128x256xbf16, #tpu.memory_space<vmem>>, vector<128x256xbf16>
    tpu.vector_store %arg1[%c0_1, %c0_2], %1 {strides = array<i32>} : memref<128x256xbf16, #tpu.memory_space<vmem>>, vector<128x256xbf16>,
    return
  }
}

module attributes {stable_mosaic.version = 11 : i64} {
  func.func @probe(%arg0: memref<128x256xf32, #tpu.memory_space<vmem>>, %arg1: memref<128x256xf32, #tpu.memory_space<vmem>>) attributes {dimension_semantics = [], scalar_prefetch = 0 : i64, scratch_operands = 0 : i64, tpu.core_type = #tpu.core_type<tc>} {
    %c0 = arith.constant 0 : index
    %c0_0 = arith.constant 0 : index
    %0 = vector.load %arg0[%c0, %c0_0] : memref<128x256xf32, #tpu.memory_space<vmem>>, vector<128x256xf32>
    %c0_i32 = arith.constant 0 : i32
    %1 = tpu.dynamic_rotate %0 by %c0_i32 dim 1 {stride = 1 : si32, stride_dimension = 0 : si32} : vector<128x256xf32>, i32 -> vector<128x256xf32>
    %c0_1 = arith.constant 0 : index
    %c0_2 = arith.constant 0 : index
    %2 = vector.load %arg1[%c0_1, %c0_2] : memref<128x256xf32, #tpu.memory_space<vmem>>, vector<128x256xf32>
    tpu.vector_store %arg1[%c0_1, %c0_2], %1 {strides = array<i32>} : memref<128x256xf32, #tpu.memory_space<vmem>>, vector<128x256xf32>,
    return
  }
}

module attributes {stable_mosaic.version = 11 : i64} {
  func.func @_fc1_ln_kernel(%arg0: i32, %arg1: memref<2x128x16xf32, #tpu.memory_space<vmem>>, %arg2: memref<16x32xf32, #tpu.memory_space<vmem>>, %arg3: memref<1x32xf32, #tpu.memory_space<vmem>>, %arg4: memref<1x32xf32, #tpu.memory_space<vmem>>, %arg5: memref<1x32xf32, #tpu.memory_space<vmem>>, %arg6: memref<32x2x128xbf16, #tpu.memory_space<vmem>>) attributes {dimension_semantics = [#tpu.dimension_semantics<parallel>], iteration_bounds = array<i64: 1>, scalar_prefetch = 0 : i64, scratch_operands = 0 : i64, tpu.core_type = #tpu.core_type<tc>, window_params = [{transform_indices = @transform_0, window_bounds = array<i64: 2, 128, 16>}, {pipeline_mode = #tpu.pipeline_mode<synchronous>, transform_indices = @transform_1, window_bounds = array<i64: 16, 32>}, {pipeline_mode = #tpu.pipeline_mode<synchronous>, transform_indices = @transform_2, window_bounds = array<i64: 1, 32>}, {pipeline_mode = #tpu.pipeline_mode<synchronous>, transform_indices = @transform_3, window_bounds = array<i64: 1, 32>}, {pipeline_mode = #tpu.pipeline_mode<synchronous>, transform_indices = @transform_4, window_bounds = array<i64: 1, 32>}, {transform_indices = @transform_5, window_bounds = array<i64: 32, 2, 128>}]} {
    %c0 = arith.constant 0 : index
    %c0_0 = arith.constant 0 : index
    %c0_1 = arith.constant 0 : index
    %0 = vector.load %arg1[%c0, %c0_0, %c0_1] : memref<2x128x16xf32, #tpu.memory_space<vmem>>, vector<2x128x16xf32>
    %1 = vector.shape_cast %0 : vector<2x128x16xf32> to vector<256x16xf32>
    %c0_2 = arith.constant 0 : index
    %c0_3 = arith.constant 0 : index
    %2 = vector.load %arg2[%c0_2, %c0_3] : memref<16x32xf32, #tpu.memory_space<vmem>>, vector<16x32xf32>
    %cst = arith.constant dense<0.000000e+00> : vector<256x32xf32>
    %3 = tpu.matmul %1, %2, %cst {dimension_numbers = #tpu.dot_dimension_numbers<[1], [0], [0], [1], [0, 0, 1, 1], [], []>} : vector<256x16xf32>, vector<16x32xf32>, vector<256x32xf32> -> vector<256x32xf32>
    %c0_4 = arith.constant 0 : index
    %c0_5 = arith.constant 0 : index
    %4 = vector.load %arg3[%c0_4, %c0_5] : memref<1x32xf32, #tpu.memory_space<vmem>>, vector<1x32xf32>
    %5 = vector.broadcast %4 : vector<1x32xf32> to vector<256x32xf32>
    %6 = arith.addf %3, %5 : vector<256x32xf32>
    %cst_6 = arith.constant 0.000000e+00 : f32
    %7 = vector.broadcast %cst_6 : f32 to vector<256x32xf32>
    %8 = arith.maximumf %6, %7 : vector<256x32xf32>
    %cst_7 = arith.constant dense<0.000000e+00> : vector<256xf32>
    %9 = vector.multi_reduction <add>, %8, %cst_7 [1] : vector<256x32xf32> to vector<256xf32>
    %10 = vector.shape_cast %9 : vector<256xf32> to vector<256x1xf32>
    %cst_8 = arith.constant 3.200000e+01 : f32
    %11 = vector.broadcast %cst_8 : f32 to vector<256x1xf32>
    %12 = arith.divf %10, %11 : vector<256x1xf32>
    %13 = vector.broadcast %12 : vector<256x1xf32> to vector<256x32xf32>
    %14 = arith.subf %8, %13 : vector<256x32xf32>
    %15 = arith.mulf %14, %14 : vector<256x32xf32>
    %cst_9 = arith.constant dense<0.000000e+00> : vector<256xf32>
    %16 = vector.multi_reduction <add>, %15, %cst_9 [1] : vector<256x32xf32> to vector<256xf32>
    %17 = vector.shape_cast %16 : vector<256xf32> to vector<256x1xf32>
    %cst_10 = arith.constant 3.200000e+01 : f32
    %18 = vector.broadcast %cst_10 : f32 to vector<256x1xf32>
    %19 = arith.divf %17, %18 : vector<256x1xf32>
    %20 = vector.broadcast %12 : vector<256x1xf32> to vector<256x32xf32>
    %21 = arith.subf %8, %20 : vector<256x32xf32>
    %cst_11 = arith.constant 9.99999974E-6 : f32
    %22 = vector.broadcast %cst_11 : f32 to vector<256x1xf32>
    %23 = arith.addf %19, %22 : vector<256x1xf32>
    %24 = math.rsqrt %23 : vector<256x1xf32>
    %25 = vector.broadcast %24 : vector<256x1xf32> to vector<256x32xf32>
    %26 = arith.mulf %21, %25 : vector<256x32xf32>
    %c0_12 = arith.constant 0 : index
    %c0_13 = arith.constant 0 : index
    %27 = vector.load %arg4[%c0_12, %c0_13] : memref<1x32xf32, #tpu.memory_space<vmem>>, vector<1x32xf32>
    %28 = vector.broadcast %27 : vector<1x32xf32> to vector<256x32xf32>
    %29 = arith.mulf %26, %28 : vector<256x32xf32>
    %c0_14 = arith.constant 0 : index
    %c0_15 = arith.constant 0 : index
    %30 = vector.load %arg5[%c0_14, %c0_15] : memref<1x32xf32, #tpu.memory_space<vmem>>, vector<1x32xf32>
    %31 = vector.broadcast %30 : vector<1x32xf32> to vector<256x32xf32>
    %32 = arith.addf %29, %31 : vector<256x32xf32>
    %33 = arith.truncf %32 : vector<256x32xf32> to vector<256x32xbf16>
    %34 = vector.extract_strided_slice %33 {offsets = [0, 0], sizes = [128, 32], strides = [1, 1]} : vector<256x32xbf16> to vector<128x32xbf16>
    %35 = tpu.transpose %34, [1, 0] : vector<128x32xbf16> -> vector<32x128xbf16>
    %c0_16 = arith.constant 0 : index
    %c0_17 = arith.constant 0 : index
    %c0_18 = arith.constant 0 : index
    %36 = vector.load %arg6[%c0_16, %c0_17, %c0_18] : memref<32x2x128xbf16, #tpu.memory_space<vmem>>, vector<32x1x128xbf16>
    %37 = vector.shape_cast %36 : vector<32x1x128xbf16> to vector<32x128xbf16>
    %38 = vector.shape_cast %35 : vector<32x128xbf16> to vector<32x1x128xbf16>
    tpu.vector_store %arg6[%c0_16, %c0_17, %c0_18], %38 {strides = array<i32>} : memref<32x2x128xbf16, #tpu.memory_space<vmem>>, vector<32x1x128xbf16>,
    %39 = vector.extract_strided_slice %33 {offsets = [128, 0], sizes = [128, 32], strides = [1, 1]} : vector<256x32xbf16> to vector<128x32xbf16>
    %40 = tpu.transpose %39, [1, 0] : vector<128x32xbf16> -> vector<32x128xbf16>
    %c0_19 = arith.constant 0 : index
    %c1 = arith.constant 1 : index
    %c0_20 = arith.constant 0 : index
    %41 = vector.load %arg6[%c0_19, %c1, %c0_20] : memref<32x2x128xbf16, #tpu.memory_space<vmem>>, vector<32x1x128xbf16>
    %42 = vector.shape_cast %41 : vector<32x1x128xbf16> to vector<32x128xbf16>
    %43 = vector.shape_cast %40 : vector<32x128xbf16> to vector<32x1x128xbf16>
    tpu.vector_store %arg6[%c0_19, %c1, %c0_20], %43 {strides = array<i32>} : memref<32x2x128xbf16, #tpu.memory_space<vmem>>, vector<32x1x128xbf16>,
    return
  }
  func.func @transform_0(%arg0: i32) -> (i32, i32, i32) {
    %c0_i32 = arith.constant 0 : i32
    %c0_i32_0 = arith.constant 0 : i32
    %c0_i32_1 = arith.constant 0 : i32
    return %c0_i32, %arg0, %c0_i32_0 : i32, i32, i32
  }
  func.func @transform_1(%arg0: i32) -> (i32, i32) {
    %c0_i32 = arith.constant 0 : i32
    %c0_i32_0 = arith.constant 0 : i32
    %c0_i32_1 = arith.constant 0 : i32
    return %c0_i32, %c0_i32_0 : i32, i32
  }
  func.func @transform_2(%arg0: i32) -> (i32, i32) {
    %c0_i32 = arith.constant 0 : i32
    %c0_i32_0 = arith.constant 0 : i32
    %c0_i32_1 = arith.constant 0 : i32
    return %c0_i32, %c0_i32_0 : i32, i32
  }
  func.func @transform_3(%arg0: i32) -> (i32, i32) {
    %c0_i32 = arith.constant 0 : i32
    %c0_i32_0 = arith.constant 0 : i32
    %c0_i32_1 = arith.constant 0 : i32
    return %c0_i32, %c0_i32_0 : i32, i32
  }
  func.func @transform_4(%arg0: i32) -> (i32, i32) {
    %c0_i32 = arith.constant 0 : i32
    %c0_i32_0 = arith.constant 0 : i32
    %c0_i32_1 = arith.constant 0 : i32
    return %c0_i32, %c0_i32_0 : i32, i32
  }
  func.func @transform_5(%arg0: i32) -> (i32, i32, i32) {
    %c0_i32 = arith.constant 0 : i32
    %c0_i32_0 = arith.constant 0 : i32
    %c0_i32_1 = arith.constant 0 : i32
    return %c0_i32, %c0_i32_0, %arg0 : i32, i32, i32
  }
}

module attributes {stable_mosaic.version = 11 : i64} {
  func.func @_s4_conv_kernel(%arg0: i32, %arg1: memref<16x128x128xbf16, #tpu.memory_space<vmem>>, %arg2: memref<16x2x128xbf16, #tpu.memory_space<vmem>>, %arg3: memref<32xf32, #tpu.memory_space<smem>>, %arg4: memref<16x2x128xbf16, #tpu.memory_space<vmem>>) attributes {dimension_semantics = [#tpu.dimension_semantics<parallel>], iteration_bounds = array<i64: 2>, scalar_prefetch = 0 : i64, scratch_operands = 0 : i64, tpu.core_type = #tpu.core_type<tc>, window_params = [{transform_indices = @transform_0, window_bounds = array<i64: 16, 128, 128>}, {transform_indices = @transform_1, window_bounds = array<i64: 16, 2, 128>}, {transform_indices = @transform_2, window_bounds = array<i64: 32>}, {transform_indices = @transform_3, window_bounds = array<i64: 16, 2, 128>}]} {
    %c0_i32 = arith.constant 0 : i32
    %c16_i32 = arith.constant 16 : i32
    %0 = arith.addi %c0_i32, %c16_i32 : i32
    %c1_i32 = arith.constant 1 : i32
    scf.for %arg5 = %c0_i32 to %0 step %c1_i32  : i32 {
      %c1_i32_1 = arith.constant 1 : i32
      %1 = arith.muli %arg5, %c1_i32_1 : i32
      %c0_i32_2 = arith.constant 0 : i32
      %2 = arith.addi %c0_i32_2, %1 : i32
      %3 = arith.index_cast %2 : i32 to index
      %c0 = arith.constant 0 : index
      %c0_3 = arith.constant 0 : index
      %4 = vector.load %arg1[%3, %c0, %c0_3] : memref<16x128x128xbf16, #tpu.memory_space<vmem>>, vector<1x128x128xbf16>
      %5 = vector.shape_cast %4 : vector<1x128x128xbf16> to vector<128x128xbf16>
      %6 = arith.index_cast %2 : i32 to index
      %c0_4 = arith.constant 0 : index
      %c0_5 = arith.constant 0 : index
      %7 = vector.load %arg2[%6, %c0_4, %c0_5] : memref<16x2x128xbf16, #tpu.memory_space<vmem>>, vector<1x2x128xbf16>
      %8 = vector.shape_cast %7 : vector<1x2x128xbf16> to vector<2x128xbf16>
      %cst = arith.constant dense<0.000000e+00> : vector<2x128xf32>
      %9 = tpu.matmul %8, %5, %cst {dimension_numbers = #tpu.dot_dimension_numbers<[1], [0], [0], [1], [0, 0, 1, 1], [], []>} : vector<2x128xbf16>, vector<128x128xbf16>, vector<2x128xf32> -> vector<2x128xf32>
      %c16_i32_6 = arith.constant 16 : i32
      %10 = arith.muli %arg0, %c16_i32_6 : i32
      %11 = arith.addi %10, %2 : i32
      %12 = arith.index_cast %11 : i32 to index
      %13 = memref.load %arg3[%12] : memref<32xf32, #tpu.memory_space<smem>>
      %14 = arith.extf %8 : vector<2x128xbf16> to vector<2x128xf32>
      %15 = vector.broadcast %13 : f32 to vector<2x128xf32>
      %16 = arith.mulf %15, %14 : vector<2x128xf32>
      %17 = arith.addf %9, %16 : vector<2x128xf32>
      %18 = arith.mulf %17, %17 : vector<2x128xf32>
      %19 = arith.mulf %17, %18 : vector<2x128xf32>
      %cst_7 = arith.constant 4.471500e-02 : f32
      %20 = vector.broadcast %cst_7 : f32 to vector<2x128xf32>
      %21 = arith.mulf %20, %19 : vector<2x128xf32>
      %22 = arith.addf %17, %21 : vector<2x128xf32>
      %cst_8 = arith.constant 0.797884583 : f32
      %23 = vector.broadcast %cst_8 : f32 to vector<2x128xf32>
      %24 = arith.mulf %23, %22 : vector<2x128xf32>
      %25 = math.tanh %24 : vector<2x128xf32>
      %cst_9 = arith.constant 1.000000e+00 : f32
      %26 = vector.broadcast %cst_9 : f32 to vector<2x128xf32>
      %27 = arith.addf %26, %25 : vector<2x128xf32>
      %cst_10 = arith.constant 5.000000e-01 : f32
      %28 = vector.broadcast %cst_10 : f32 to vector<2x128xf32>
      %29 = arith.mulf %28, %27 : vector<2x128xf32>
      %30 = arith.mulf %17, %29 : vector<2x128xf32>
      %31 = arith.truncf %30 : vector<2x128xf32> to vector<2x128xbf16>
      %32 = arith.index_cast %2 : i32 to index
      %c0_11 = arith.constant 0 : index
      %c0_12 = arith.constant 0 : index
      %33 = vector.load %arg4[%32, %c0_11, %c0_12] : memref<16x2x128xbf16, #tpu.memory_space<vmem>>, vector<1x2x128xbf16>
      %34 = vector.shape_cast %33 : vector<1x2x128xbf16> to vector<2x128xbf16>
      %35 = vector.shape_cast %31 : vector<2x128xbf16> to vector<1x2x128xbf16>
      tpu.vector_store %arg4[%32, %c0_11, %c0_12], %35 {strides = array<i32>} : memref<16x2x128xbf16, #tpu.memory_space<vmem>>, vector<1x2x128xbf16>,
    }
    %c16_i32_0 = arith.constant 16 : i32
    return
  }
  func.func @transform_0(%arg0: i32) -> (i32, i32, i32) {
    %c0_i32 = arith.constant 0 : i32
    %c0_i32_0 = arith.constant 0 : i32
    %c0_i32_1 = arith.constant 0 : i32
    return %arg0, %c0_i32, %c0_i32_0 : i32, i32, i32
  }
  func.func @transform_1(%arg0: i32) -> (i32, i32, i32) {
    %c0_i32 = arith.constant 0 : i32
    %c0_i32_0 = arith.constant 0 : i32
    %c0_i32_1 = arith.constant 0 : i32
    return %arg0, %c0_i32, %c0_i32_0 : i32, i32, i32
  }
  func.func @transform_2(%arg0: i32) -> i32 {
    %c0_i32 = arith.constant 0 : i32
    %c0_i32_0 = arith.constant 0 : i32
    return %c0_i32 : i32
  }
  func.func @transform_3(%arg0: i32) -> (i32, i32, i32) {
    %c0_i32 = arith.constant 0 : i32
    %c0_i32_0 = arith.constant 0 : i32
    %c0_i32_1 = arith.constant 0 : i32
    return %arg0, %c0_i32, %c0_i32_0 : i32, i32, i32
  }
}

module attributes {stable_mosaic.version = 11 : i64} {
  func.func @_head_kernel(%arg0: i32, %arg1: memref<32x2x128xbf16, #tpu.memory_space<vmem>>, %arg2: memref<64x32xf32, #tpu.memory_space<vmem>>, %arg3: memref<64x1xf32, #tpu.memory_space<vmem>>, %arg4: memref<32x512xf32, #tpu.memory_space<vmem>>, %arg5: memref<1x512xf32, #tpu.memory_space<vmem>>, %arg6: memref<512x10xf32, #tpu.memory_space<vmem>>, %arg7: memref<1x10xf32, #tpu.memory_space<vmem>>, %arg8: memref<2x10xf32, #tpu.memory_space<vmem>>, %arg9: memref<32x2xf32, #tpu.memory_space<vmem>>) attributes {dimension_semantics = [#tpu.dimension_semantics<parallel>], iteration_bounds = array<i64: 1>, scalar_prefetch = 0 : i64, scratch_operands = 1 : i64, tpu.core_type = #tpu.core_type<tc>, window_params = [{transform_indices = @transform_0, window_bounds = array<i64: 32, 2, 128>}, {pipeline_mode = #tpu.pipeline_mode<synchronous>, transform_indices = @transform_1, window_bounds = array<i64: 64, 32>}, {pipeline_mode = #tpu.pipeline_mode<synchronous>, transform_indices = @transform_2, window_bounds = array<i64: 64, 1>}, {pipeline_mode = #tpu.pipeline_mode<synchronous>, transform_indices = @transform_3, window_bounds = array<i64: 32, 512>}, {pipeline_mode = #tpu.pipeline_mode<synchronous>, transform_indices = @transform_4, window_bounds = array<i64: 1, 512>}, {pipeline_mode = #tpu.pipeline_mode<synchronous>, transform_indices = @transform_5, window_bounds = array<i64: 512, 10>}, {pipeline_mode = #tpu.pipeline_mode<synchronous>, transform_indices = @transform_6, window_bounds = array<i64: 1, 10>}, {transform_indices = @transform_7, window_bounds = array<i64: 2, 10>}]} {
    %0 = tpu.iota {dimensions = array<i32: 1>} : vector<1x128xi32>
    %c16_i32 = arith.constant 16 : i32
    %1 = vector.broadcast %c16_i32 : i32 to vector<1x128xi32>
    %2 = arith.cmpi slt, %0, %1 : vector<1x128xi32>
    %c0 = arith.constant 0 : index
    %c0_0 = arith.constant 0 : index
    %c0_1 = arith.constant 0 : index
    %3 = vector.load %arg1[%c0, %c0_0, %c0_1] : memref<32x2x128xbf16, #tpu.memory_space<vmem>>, vector<32x1x128xbf16>
    %4 = vector.shape_cast %3 : vector<32x1x128xbf16> to vector<32x128xbf16>
    %5 = arith.extf %4 : vector<32x128xbf16> to vector<32x128xf32>
    %c0_2 = arith.constant 0 : index
    %c0_3 = arith.constant 0 : index
    %6 = vector.load %arg2[%c0_2, %c0_3] : memref<64x32xf32, #tpu.memory_space<vmem>>, vector<64x32xf32>
    %cst = arith.constant dense<0.000000e+00> : vector<64x128xf32>
    %7 = tpu.matmul %6, %5, %cst {dimension_numbers = #tpu.dot_dimension_numbers<[1], [0], [0], [1], [0, 0, 1, 1], [], []>} : vector<64x32xf32>, vector<32x128xf32>, vector<64x128xf32> -> vector<64x128xf32>
    %c0_4 = arith.constant 0 : index
    %c0_5 = arith.constant 0 : index
    %8 = vector.load %arg3[%c0_4, %c0_5] : memref<64x1xf32, #tpu.memory_space<vmem>>, vector<64x1xf32>
    %9 = vector.broadcast %8 : vector<64x1xf32> to vector<64x128xf32>
    %10 = arith.addf %7, %9 : vector<64x128xf32>
    %11 = vector.extract_strided_slice %10 {offsets = [0, 0], sizes = [32, 128], strides = [1, 1]} : vector<64x128xf32> to vector<32x128xf32>
    %12 = vector.extract_strided_slice %10 {offsets = [32, 0], sizes = [32, 128], strides = [1, 1]} : vector<64x128xf32> to vector<32x128xf32>
    %13 = arith.negf %12 : vector<32x128xf32>
    %14 = math.exp %13 : vector<32x128xf32>
    %cst_6 = arith.constant 1.000000e+00 : f32
    %15 = vector.broadcast %cst_6 : f32 to vector<32x128xf32>
    %16 = arith.addf %15, %14 : vector<32x128xf32>
    %17 = arith.divf %15, %16 : vector<32x128xf32>
    %18 = arith.mulf %11, %17 : vector<32x128xf32>
    %cst_7 = arith.constant 0xFF800000 : f32
    %19 = vector.shape_cast %2 : vector<1x128xi1> to vector<1x128xi1>
    %20 = vector.broadcast %19 : vector<1x128xi1> to vector<32x128xi1>
    %21 = vector.broadcast %cst_7 : f32 to vector<32x128xf32>
    %22 = arith.select %20, %18, %21 : vector<32x128xi1>, vector<32x128xf32>
    %cst_8 = arith.constant dense<0xFF800000> : vector<32xf32>
    %23 = vector.multi_reduction <maximumf>, %22, %cst_8 [1] : vector<32x128xf32> to vector<32xf32>
    %24 = vector.shape_cast %23 : vector<32xf32> to vector<32x1xf32>
    %c0_9 = arith.constant 0 : index
    %c0_10 = arith.constant 0 : index
    %25 = vector.load %arg9[%c0_9, %c0_10] : memref<32x2xf32, #tpu.memory_space<vmem>>, vector<32x1xf32>
    tpu.vector_store %arg9[%c0_9, %c0_10], %24 {strides = array<i32>} : memref<32x2xf32, #tpu.memory_space<vmem>>, vector<32x1xf32>,
    %c0_11 = arith.constant 0 : index
    %c1 = arith.constant 1 : index
    %c0_12 = arith.constant 0 : index
    %26 = vector.load %arg1[%c0_11, %c1, %c0_12] : memref<32x2x128xbf16, #tpu.memory_space<vmem>>, vector<32x1x128xbf16>
    %27 = vector.shape_cast %26 : vector<32x1x128xbf16> to vector<32x128xbf16>
    %28 = arith.extf %27 : vector<32x128xbf16> to vector<32x128xf32>
    %c0_13 = arith.constant 0 : index
    %c0_14 = arith.constant 0 : index
    %29 = vector.load %arg2[%c0_13, %c0_14] : memref<64x32xf32, #tpu.memory_space<vmem>>, vector<64x32xf32>
    %cst_15 = arith.constant dense<0.000000e+00> : vector<64x128xf32>
    %30 = tpu.matmul %29, %28, %cst_15 {dimension_numbers = #tpu.dot_dimension_numbers<[1], [0], [0], [1], [0, 0, 1, 1], [], []>} : vector<64x32xf32>, vector<32x128xf32>, vector<64x128xf32> -> vector<64x128xf32>
    %c0_16 = arith.constant 0 : index
    %c0_17 = arith.constant 0 : index
    %31 = vector.load %arg3[%c0_16, %c0_17] : memref<64x1xf32, #tpu.memory_space<vmem>>, vector<64x1xf32>
    %32 = vector.broadcast %31 : vector<64x1xf32> to vector<64x128xf32>
    %33 = arith.addf %30, %32 : vector<64x128xf32>
    %34 = vector.extract_strided_slice %33 {offsets = [0, 0], sizes = [32, 128], strides = [1, 1]} : vector<64x128xf32> to vector<32x128xf32>
    %35 = vector.extract_strided_slice %33 {offsets = [32, 0], sizes = [32, 128], strides = [1, 1]} : vector<64x128xf32> to vector<32x128xf32>
    %36 = arith.negf %35 : vector<32x128xf32>
    %37 = math.exp %36 : vector<32x128xf32>
    %cst_18 = arith.constant 1.000000e+00 : f32
    %38 = vector.broadcast %cst_18 : f32 to vector<32x128xf32>
    %39 = arith.addf %38, %37 : vector<32x128xf32>
    %40 = arith.divf %38, %39 : vector<32x128xf32>
    %41 = arith.mulf %34, %40 : vector<32x128xf32>
    %cst_19 = arith.constant 0xFF800000 : f32
    %42 = vector.shape_cast %2 : vector<1x128xi1> to vector<1x128xi1>
    %43 = vector.broadcast %42 : vector<1x128xi1> to vector<32x128xi1>
    %44 = vector.broadcast %cst_19 : f32 to vector<32x128xf32>
    %45 = arith.select %43, %41, %44 : vector<32x128xi1>, vector<32x128xf32>
    %cst_20 = arith.constant dense<0xFF800000> : vector<32xf32>
    %46 = vector.multi_reduction <maximumf>, %45, %cst_20 [1] : vector<32x128xf32> to vector<32xf32>
    %47 = vector.shape_cast %46 : vector<32xf32> to vector<32x1xf32>
    %c0_21 = arith.constant 0 : index
    %c1_22 = arith.constant 1 : index
    %48 = vector.load %arg9[%c0_21, %c1_22] : memref<32x2xf32, #tpu.memory_space<vmem>>, vector<32x1xf32>
    tpu.vector_store %arg9[%c0_21, %c1_22], %47 {strides = array<i32>} : memref<32x2xf32, #tpu.memory_space<vmem>>, vector<32x1xf32>,
    %c0_23 = arith.constant 0 : index
    %c0_24 = arith.constant 0 : index
    %49 = vector.load %arg9[%c0_23, %c0_24] : memref<32x2xf32, #tpu.memory_space<vmem>>, vector<32x2xf32>
    %50 = tpu.transpose %49, [1, 0] : vector<32x2xf32> -> vector<2x32xf32>
    %c0_25 = arith.constant 0 : index
    %c0_26 = arith.constant 0 : index
    %51 = vector.load %arg4[%c0_25, %c0_26] : memref<32x512xf32, #tpu.memory_space<vmem>>, vector<32x512xf32>
    %cst_27 = arith.constant dense<0.000000e+00> : vector<2x512xf32>
    %52 = tpu.matmul %50, %51, %cst_27 {dimension_numbers = #tpu.dot_dimension_numbers<[1], [0], [0], [1], [0, 0, 1, 1], [], []>} : vector<2x32xf32>, vector<32x512xf32>, vector<2x512xf32> -> vector<2x512xf32>
    %c0_28 = arith.constant 0 : index
    %c0_29 = arith.constant 0 : index
    %53 = vector.load %arg5[%c0_28, %c0_29] : memref<1x512xf32, #tpu.memory_space<vmem>>, vector<1x512xf32>
    %54 = vector.broadcast %53 : vector<1x512xf32> to vector<2x512xf32>
    %55 = arith.addf %52, %54 : vector<2x512xf32>
    %cst_30 = arith.constant 0.000000e+00 : f32
    %56 = vector.broadcast %cst_30 : f32 to vector<2x512xf32>
    %57 = arith.cmpf oge, %55, %56 : vector<2x512xf32>
    %cst_31 = arith.constant 0.00999999977 : f32
    %58 = vector.broadcast %cst_31 : f32 to vector<2x512xf32>
    %59 = arith.mulf %58, %55 : vector<2x512xf32>
    %60 = arith.select %57, %55, %59 : vector<2x512xi1>, vector<2x512xf32>
    %c0_32 = arith.constant 0 : index
    %c0_33 = arith.constant 0 : index
    %61 = vector.load %arg6[%c0_32, %c0_33] : memref<512x10xf32, #tpu.memory_space<vmem>>, vector<512x10xf32>
    %cst_34 = arith.constant dense<0.000000e+00> : vector<2x10xf32>
    %62 = tpu.matmul %60, %61, %cst_34 {dimension_numbers = #tpu.dot_dimension_numbers<[1], [0], [0], [1], [0, 0, 1, 1], [], []>} : vector<2x512xf32>, vector<512x10xf32>, vector<2x10xf32> -> vector<2x10xf32>
    %c0_35 = arith.constant 0 : index
    %c0_36 = arith.constant 0 : index
    %63 = vector.load %arg7[%c0_35, %c0_36] : memref<1x10xf32, #tpu.memory_space<vmem>>, vector<1x10xf32>
    %64 = vector.broadcast %63 : vector<1x10xf32> to vector<2x10xf32>
    %65 = arith.addf %62, %64 : vector<2x10xf32>
    %c0_37 = arith.constant 0 : index
    %c0_38 = arith.constant 0 : index
    %66 = vector.load %arg8[%c0_37, %c0_38] : memref<2x10xf32, #tpu.memory_space<vmem>>, vector<2x10xf32>
    tpu.vector_store %arg8[%c0_37, %c0_38], %65 {strides = array<i32>} : memref<2x10xf32, #tpu.memory_space<vmem>>, vector<2x10xf32>,
    return
  }
  func.func @transform_0(%arg0: i32) -> (i32, i32, i32) {
    %c0_i32 = arith.constant 0 : i32
    %c0_i32_0 = arith.constant 0 : i32
    %c0_i32_1 = arith.constant 0 : i32
    return %c0_i32, %arg0, %c0_i32_0 : i32, i32, i32
  }
  func.func @transform_1(%arg0: i32) -> (i32, i32) {
    %c0_i32 = arith.constant 0 : i32
    %c0_i32_0 = arith.constant 0 : i32
    %c0_i32_1 = arith.constant 0 : i32
    return %c0_i32, %c0_i32_0 : i32, i32
  }
  func.func @transform_2(%arg0: i32) -> (i32, i32) {
    %c0_i32 = arith.constant 0 : i32
    %c0_i32_0 = arith.constant 0 : i32
    %c0_i32_1 = arith.constant 0 : i32
    return %c0_i32, %c0_i32_0 : i32, i32
  }
  func.func @transform_3(%arg0: i32) -> (i32, i32) {
    %c0_i32 = arith.constant 0 : i32
    %c0_i32_0 = arith.constant 0 : i32
    %c0_i32_1 = arith.constant 0 : i32
    return %c0_i32, %c0_i32_0 : i32, i32
  }
  func.func @transform_4(%arg0: i32) -> (i32, i32) {
    %c0_i32 = arith.constant 0 : i32
    %c0_i32_0 = arith.constant 0 : i32
    %c0_i32_1 = arith.constant 0 : i32
    return %c0_i32, %c0_i32_0 : i32, i32
  }
  func.func @transform_5(%arg0: i32) -> (i32, i32) {
    %c0_i32 = arith.constant 0 : i32
    %c0_i32_0 = arith.constant 0 : i32
    %c0_i32_1 = arith.constant 0 : i32
    return %c0_i32, %c0_i32_0 : i32, i32
  }
  func.func @transform_6(%arg0: i32) -> (i32, i32) {
    %c0_i32 = arith.constant 0 : i32
    %c0_i32_0 = arith.constant 0 : i32
    %c0_i32_1 = arith.constant 0 : i32
    return %c0_i32, %c0_i32_0 : i32, i32
  }
  func.func @transform_7(%arg0: i32) -> (i32, i32) {
    %c0_i32 = arith.constant 0 : i32
    %c0_i32_0 = arith.constant 0 : i32
    return %arg0, %c0_i32 : i32, i32
  }
}

</mosaic_0001>

<bundles_post_ra>
// kernel: tpu_custom_call.1
= control target key start
LH: loop header
LB: loop body
LE: loop exit
PB: predicated region body
PF: predicated region fallthrough
CT: control target
= control target key end

     0   :  { %6 = vsyncpa [#allocation3], 0  ;;  %s461_s0 = inlined_call_operand.hbm [shape: f32[128,256], index: 0, kind: input, shape index: {}]   ;;  %s462_s1 = inlined_call_operand.hbm [shape: f32[128,256], index: 1, kind: output, shape index: {}]  }
   0x1   :  { %7 = vsyncpa [#allocation4], 0  ;;  %s364_s6 = smov [#allocation2]   ;;  %s316_s10 = scalar_lea.hbm %s461_s0, 4096 }
   0x2   :  { %s13_s7 = sshll.u32 %s364_s6, 4  ;;  %p317_p0 = scmp.ne.s32.totalorder %s461_s0, %s316_s10  ;;  %s14_s7 = int_to_ptr.vmem [resolvable:$true] %s13_s7 }
   0x3   :  { %p320_p1 = scmp.lt.u32.totalorder %s316_s10, %s461_s0 }
   0x5   :  { %p322_p2 = pnand %p320_p1, %p317_p0 }
   0x7   :  { %325 = shalt.err (!%p322_p2)
}
   0x8   :  { %s326_s15 = scalar_lea.vmem %s14_s7, 4096  ;;  %p331_p4 = scmp.lt.s32.totalorder %s14_s7, %s14_s7 }
   0x9   :  { %p327_p3 = scmp.ne.s32.totalorder %s14_s7, %s326_s15  ;;  %p332_p5 = scmp.lt.s32.totalorder %s326_s15, %s326_s15 }
   0xb   :  { %p333_p6 = por %p332_p5, %p331_p4 }
   0xd   :  { %p334_p7 = pnand %p333_p6, %p327_p3 }
   0xf   :  { %337 = shalt.err (!%p334_p7)
}
  0x10   :  { %s365_s16 = smov 256   ;;  %s366_s17 = smov 16  }
  0x11   :  { %19 = dma.hbm_to_vmem [thread:$0]  %s461_s0, 4096, %s14_s7, [#allocation3], %s365_s16, %s365_s16, %s366_s17  }
  0x12   :  { %360 = dma.done.wait [#allocation3], 4096  }
  0x13   :  { %361 = vsyncadd [#allocation3], 4294963200  ;;  %v25_v0 = vld [vmem:[#allocation2 + $0x10] sm:$0xff]  ;;  %v23_v1 = vld [vmem:[#allocation2] sm:$0xff]  ;;  %s367_s20 = smov 264   ;;  %s368_s21 = smov 272   ;;  %v61_v32 = vlaneseq }
  0x14   :  { %70 = vrot.lane.b32.xlu1 %v25_v0, %s367_s20  ;;  %56 = vrot.lane.b32.xlu0 %v23_v1, %s365_s16  ;;  %v26_v2 = vld [vmem:[#allocation2 + $0x18] sm:$0xff]  ;;  %v24_v3 = vld [vmem:[#allocation2 + $0x8] sm:$0xff]  ;;  %v27_v5 = vld [vmem:[#allocation2 + $0x20] sm:$0xff]  ;;  %s369_s0 = smov 280   ;;  %s370_s22 = smov 288  }
  0x15   :  { %v28_v4 = vld [vmem:[#allocation2 + $0x28] sm:$0xff]  ;;  %v30_v6 = vld [vmem:[#allocation2 + $0x38] sm:$0xff]  ;;  %v29_v7 = vld [vmem:[#allocation2 + $0x30] sm:$0xff]  ;;  %s371_s23 = smov 296   ;;  %s372_s24 = smov 304   ;;  %v410_v33 = vshrl.u32 %v61_v32, 7 }
  0x16   :  { %v32_v8 = vld [vmem:[#allocation2 + $0x48] sm:$0xff]  ;;  %v31_v9 = vld [vmem:[#allocation2 + $0x40] sm:$0xff]  ;;  %v34_v10 = vld [vmem:[#allocation2 + $0x58] sm:$0xff]  ;;  %s373_s25 = smov 312   ;;  %s374_s26 = smov 320   ;;  %v412_v34 = vand.u32 127, %v61_v32 }
  0x17   :  { %v33_v11 = vld [vmem:[#allocation2 + $0x50] sm:$0xff]  ;;  %v36_v12 = vld [vmem:[#allocation2 + $0x68] sm:$0xff]  ;;  %v35_v13 = vld [vmem:[#allocation2 + $0x60] sm:$0xff]  ;;  %s375_s27 = smov 328   ;;  %s376_s28 = smov 336   ;;  %v76_v35 = vadd.s32 8, %v410_v33 }
  0x18   :  { %74 = vrot.lane.b32.xlu1 %v26_v2, %s367_s20  ;;  %59 = vrot.lane.b32.xlu0 %v24_v3, %s365_s16  ;;  %v38_v14 = vld [vmem:[#allocation2 + $0x78] sm:$0xff]  ;;  %v37_v15 = vld [vmem:[#allocation2 + $0x70] sm:$0xff]  ;;  %v40_v16 = vld [vmem:[#allocation2 + $0x88] sm:$0xff]  ;;  %s377_s29 = smov 344   ;;  %s378_s30 = smov 352   ;;  %vm65_vm1 = vcmp.lt.s32.totalorder %v412_v34, %v410_v33  ;;  %v88_v38 = vadd.s32 16, %v410_v33 }
  0x19   :  { %v39_v17 = vld [vmem:[#allocation2 + $0x80] sm:$0xff]  ;;  %v42_v18 = vld [vmem:[#allocation2 + $0x98] sm:$0xff]  ;;  %v41_v19 = vld [vmem:[#allocation2 + $0x90] sm:$0xff]  ;;  %s379_s2 = smov 360   ;;  %s380_s3 = smov 368   ;;  %vm77_vm0 = vcmp.lt.s32.totalorder %v412_v34, %v76_v35  ;;  %v100_v45 = vadd.s32 24, %v410_v33 }
  0x1a   :  { %v44_v20 = vld [vmem:[#allocation2 + $0xa8] sm:$0xff]  ;;  %v43_v21 = vld [vmem:[#allocation2 + $0xa0] sm:$0xff]  ;;  %v46_v22 = vld [vmem:[#allocation2 + $0xb8] sm:$0xff]  ;;  %s381_s4 = smov 376   ;;  %vm89_vm2 = vcmp.lt.s32.totalorder %v412_v34, %v88_v38  ;;  %v112_v50 = vadd.s32 32, %v410_v33  ;;  %v124_v55 = vadd.s32 40, %v410_v33 }
  0x1b   :  { %v45_v23 = vld [vmem:[#allocation2 + $0xb0] sm:$0xff]  ;;  %v48_v24 = vld [vmem:[#allocation2 + $0xc8] sm:$0xff]  ;;  %v47_v25 = vld [vmem:[#allocation2 + $0xc0] sm:$0xff]  ;;  %vm101_vm3 = vcmp.lt.s32.totalorder %v412_v34, %v100_v45  ;;  %v136_v60 = vadd.s32 48, %v410_v33  ;;  %v148_v1 = vadd.s32 56, %v410_v33  ;;  %v232_v38 = vadd.s32 112, %v410_v33 }
  0x1c   :  { %86 = vrot.lane.b32.xlu1 %v28_v4, %s368_s21  ;;  %82 = vrot.lane.b32.xlu0 %v27_v5, %s368_s21  ;;  %v50_v26 = vld [vmem:[#allocation2 + $0xd8] sm:$0xff]  ;;  %v49_v27 = vld [vmem:[#allocation2 + $0xd0] sm:$0xff]  ;;  %v52_v28 = vld [vmem:[#allocation2 + $0xe8] sm:$0xff]  ;;  %vm113_vm4 = vcmp.lt.s32.totalorder %v412_v34, %v112_v50  ;;  %vm125_vm5 = vcmp.lt.s32.totalorder %v412_v34, %v124_v55  ;;  %s382_s5 = smov [#allocation5]  }
  0x1d   :  { %v51_v29 = vld [vmem:[#allocation2 + $0xe0] sm:$0xff]  ;;  %v54_v30 = vld [vmem:[#allocation2 + $0xf8] sm:$0xff]  ;;  %v53_v31 = vld [vmem:[#allocation2 + $0xf0] sm:$0xff]  ;;  %vm137_vm6 = vcmp.lt.s32.totalorder %v412_v34, %v136_v60  ;;  %vm149_vm7 = vcmp.lt.s32.totalorder %v412_v34, %v148_v1  ;;  %vm233_vm14 = vcmp.lt.s32.totalorder %v412_v34, %v232_v38  ;;  %s285_s6 = sshll.u32 %s382_s5, 4  ;;  %s286_s6 = int_to_ptr.vmem [resolvable:$true] %s285_s6 }
  0x1e   :  { %s338_s7 = scalar_lea.vmem %s286_s6, 4096  ;;  %p343_p9 = scmp.lt.s32.totalorder %s286_s6, %s286_s6 }
  0x1f   :  { %p339_p8 = scmp.ne.s32.totalorder %s286_s6, %s338_s7  ;;  %p344_p10 = scmp.lt.s32.totalorder %s338_s7, %s338_s7 }
  0x20   :  { %98 = vrot.lane.b32.xlu1 %v30_v6, %s369_s0  ;;  %94 = vrot.lane.b32.xlu0 %v29_v7, %s369_s0  ;;  %v160_v6 = vadd.s32 64, %v410_v33 }
  0x21   :  { %p345_p11 = por %p344_p10, %p343_p9 }
  0x22   :  { %vm161_vm8 = vcmp.lt.s32.totalorder %v412_v34, %v160_v6 }
  0x23   :  { %p346_p12 = pnand %p345_p11, %p339_p8 }
  0x24   :  { %110 = vrot.lane.b32.xlu1 %v32_v8, %s370_s22  ;;  %106 = vrot.lane.b32.xlu0 %v31_v9, %s370_s22 }
  0x28   :  { %122 = vrot.lane.b32.xlu1 %v34_v10, %s371_s23  ;;  %118 = vrot.lane.b32.xlu0 %v33_v11, %s371_s23  ;;  %v172_v11 = vadd.s32 72, %v410_v33 }
  0x2a   :  { %vm173_vm9 = vcmp.lt.s32.totalorder %v412_v34, %v172_v11 }
  0x2c   :  { %134 = vrot.lane.b32.xlu1 %v36_v12, %s372_s24  ;;  %130 = vrot.lane.b32.xlu0 %v35_v13, %s372_s24 }
  0x30   :  { %146 = vrot.lane.b32.xlu1 %v38_v14, %s373_s25  ;;  %142 = vrot.lane.b32.xlu0 %v37_v15, %s373_s25 }
  0x34   :  { %158 = vrot.lane.b32.xlu1 %v40_v16, %s374_s26  ;;  %154 = vrot.lane.b32.xlu0 %v39_v17, %s374_s26  ;;  %v184_v16 = vadd.s32 80, %v410_v33 }
  0x36   :  { %vm185_vm10 = vcmp.lt.s32.totalorder %v412_v34, %v184_v16 }
  0x38   :  { %170 = vrot.lane.b32.xlu1 %v42_v18, %s375_s27  ;;  %166 = vrot.lane.b32.xlu0 %v41_v19, %s375_s27 }
  0x3c   :  { %182 = vrot.lane.b32.xlu1 %v44_v20, %s376_s28  ;;  %178 = vrot.lane.b32.xlu0 %v43_v21, %s376_s28  ;;  %v196_v21 = vadd.s32 88, %v410_v33 }
  0x3e   :  { %vm197_vm11 = vcmp.lt.s32.totalorder %v412_v34, %v196_v21 }
  0x40   :  { %194 = vrot.lane.b32.xlu1 %v46_v22, %s377_s29  ;;  %190 = vrot.lane.b32.xlu0 %v45_v23, %s377_s29 }
  0x44   :  { %206 = vrot.lane.b32.xlu1 %v48_v24, %s378_s30  ;;  %202 = vrot.lane.b32.xlu0 %v47_v25, %s378_s30 }
  0x48   :  { %218 = vrot.lane.b32.xlu1 %v50_v26, %s379_s2  ;;  %214 = vrot.lane.b32.xlu0 %v49_v27, %s379_s2  ;;  %v208_v26 = vadd.s32 96, %v410_v33 }
  0x4a   :  { %vm209_vm12 = vcmp.lt.s32.totalorder %v412_v34, %v208_v26 }
  0x4c   :  { %230 = vrot.lane.b32.xlu1 %v52_v28, %s380_s3  ;;  %226 = vrot.lane.b32.xlu0 %v51_v29, %s380_s3 }
  0x50   :  { %242 = vrot.lane.b32.xlu1 %v54_v30, %s381_s4  ;;  %238 = vrot.lane.b32.xlu0 %v53_v31, %s381_s4  ;;  %v220_v31 = vadd.s32 104, %v410_v33 }
  0x52   :  { %vm221_vm13 = vcmp.lt.s32.totalorder %v412_v34, %v220_v31 }
  0x86   :  { %v71_v36 = vpop.permute.xlu1 %70  ;;  %v57_v37 = vpop.permute.xlu0 %56 }
  0x8a   :  { %v75_v39 = vpop.permute.xlu1 %74  ;;  %v60_v40 = vpop.permute.xlu0 %59 }
  0x8b   :  { %v78_v41 = vsel %vm77_vm0, %v71_v36, %v75_v39  ;;  %v79_v42 = vsel %vm77_vm0, %v75_v39, %v71_v36  ;;  %v66_v43 = vsel %vm65_vm1, %v57_v37, %v60_v40  ;;  %v67_v44 = vsel %vm65_vm1, %v60_v40, %v57_v37 }
  0x8c   :  { %250 = vst [vmem:[#allocation5 + $0x10] sm:$0xff] %v79_v42  ;;  %251 = vst [vmem:[#allocation5 + $0x18] sm:$0xff] %v78_v41 }
  0x8d   :  { %248 = vst [vmem:[#allocation5] sm:$0xff] %v67_v44  ;;  %249 = vst [vmem:[#allocation5 + $0x8] sm:$0xff] %v66_v43  ;;  %v244_v43 = vadd.s32 120, %v410_v33 }
  0x8e   :  { %v87_v46 = vpop.permute.xlu1 %86  ;;  %v83_v47 = vpop.permute.xlu0 %82 }
  0x8f   :  { %v90_v48 = vsel %vm89_vm2, %v83_v47, %v87_v46  ;;  %v91_v49 = vsel %vm89_vm2, %v87_v46, %v83_v47  ;;  %vm245_vm15 = vcmp.lt.s32.totalorder %v412_v34, %v244_v43 }
  0x90   :  { %252 = vst [vmem:[#allocation5 + $0x20] sm:$0xff] %v91_v49  ;;  %253 = vst [vmem:[#allocation5 + $0x28] sm:$0xff] %v90_v48 }
  0x92   :  { %v99_v51 = vpop.permute.xlu1 %98  ;;  %v95_v52 = vpop.permute.xlu0 %94 }
  0x93   :  { %v102_v53 = vsel %vm101_vm3, %v95_v52, %v99_v51  ;;  %v103_v54 = vsel %vm101_vm3, %v99_v51, %v95_v52 }
  0x94   :  { %254 = vst [vmem:[#allocation5 + $0x30] sm:$0xff] %v103_v54  ;;  %255 = vst [vmem:[#allocation5 + $0x38] sm:$0xff] %v102_v53 }
  0x96   :  { %v111_v56 = vpop.permute.xlu1 %110  ;;  %v107_v57 = vpop.permute.xlu0 %106 }
  0x97   :  { %v114_v58 = vsel %vm113_vm4, %v107_v57, %v111_v56  ;;  %v115_v59 = vsel %vm113_vm4, %v111_v56, %v107_v57 }
  0x98   :  { %256 = vst [vmem:[#allocation5 + $0x40] sm:$0xff] %v115_v59  ;;  %257 = vst [vmem:[#allocation5 + $0x48] sm:$0xff] %v114_v58 }
  0x9a   :  { %v123_v61 = vpop.permute.xlu1 %122  ;;  %v119_v62 = vpop.permute.xlu0 %118 }
  0x9b   :  { %v126_v63 = vsel %vm125_vm5, %v119_v62, %v123_v61  ;;  %v127_v0 = vsel %vm125_vm5, %v123_v61, %v119_v62 }
  0x9c   :  { %258 = vst [vmem:[#allocation5 + $0x50] sm:$0xff] %v127_v0  ;;  %259 = vst [vmem:[#allocation5 + $0x58] sm:$0xff] %v126_v63 }
  0x9e   :  { %v135_v2 = vpop.permute.xlu1 %134  ;;  %v131_v3 = vpop.permute.xlu0 %130 }
  0x9f   :  { %v138_v4 = vsel %vm137_vm6, %v131_v3, %v135_v2  ;;  %v139_v5 = vsel %vm137_vm6, %v135_v2, %v131_v3 }
  0xa0   :  { %260 = vst [vmem:[#allocation5 + $0x60] sm:$0xff] %v139_v5  ;;  %261 = vst [vmem:[#allocation5 + $0x68] sm:$0xff] %v138_v4 }
  0xa2   :  { %v147_v7 = vpop.permute.xlu1 %146  ;;  %v143_v8 = vpop.permute.xlu0 %142 }
  0xa3   :  { %v150_v9 = vsel %vm149_vm7, %v143_v8, %v147_v7  ;;  %v151_v10 = vsel %vm149_vm7, %v147_v7, %v143_v8 }
  0xa4   :  { %262 = vst [vmem:[#allocation5 + $0x70] sm:$0xff] %v151_v10  ;;  %263 = vst [vmem:[#allocation5 + $0x78] sm:$0xff] %v150_v9 }
  0xa6   :  { %v159_v12 = vpop.permute.xlu1 %158  ;;  %v155_v13 = vpop.permute.xlu0 %154 }
  0xa7   :  { %v162_v14 = vsel %vm161_vm8, %v155_v13, %v159_v12  ;;  %v163_v15 = vsel %vm161_vm8, %v159_v12, %v155_v13 }
  0xa8   :  { %264 = vst [vmem:[#allocation5 + $0x80] sm:$0xff] %v163_v15  ;;  %265 = vst [vmem:[#allocation5 + $0x88] sm:$0xff] %v162_v14 }
  0xaa   :  { %v171_v17 = vpop.permute.xlu1 %170  ;;  %v167_v18 = vpop.permute.xlu0 %166 }
  0xab   :  { %v174_v19 = vsel %vm173_vm9, %v167_v18, %v171_v17  ;;  %v175_v20 = vsel %vm173_vm9, %v171_v17, %v167_v18 }
  0xac   :  { %266 = vst [vmem:[#allocation5 + $0x90] sm:$0xff] %v175_v20  ;;  %267 = vst [vmem:[#allocation5 + $0x98] sm:$0xff] %v174_v19 }
  0xae   :  { %v183_v22 = vpop.permute.xlu1 %182  ;;  %v179_v23 = vpop.permute.xlu0 %178 }
  0xaf   :  { %v186_v24 = vsel %vm185_vm10, %v179_v23, %v183_v22  ;;  %v187_v25 = vsel %vm185_vm10, %v183_v22, %v179_v23 }
  0xb0   :  { %268 = vst [vmem:[#allocation5 + $0xa0] sm:$0xff] %v187_v25  ;;  %269 = vst [vmem:[#allocation5 + $0xa8] sm:$0xff] %v186_v24 }
  0xb2   :  { %v195_v27 = vpop.permute.xlu1 %194  ;;  %v191_v28 = vpop.permute.xlu0 %190 }
  0xb3   :  { %v198_v29 = vsel %vm197_vm11, %v191_v28, %v195_v27  ;;  %v199_v30 = vsel %vm197_vm11, %v195_v27, %v191_v28 }
  0xb4   :  { %270 = vst [vmem:[#allocation5 + $0xb0] sm:$0xff] %v199_v30  ;;  %271 = vst [vmem:[#allocation5 + $0xb8] sm:$0xff] %v198_v29 }
  0xb6   :  { %v207_v32 = vpop.permute.xlu1 %206  ;;  %v203_v35 = vpop.permute.xlu0 %202 }
  0xb7   :  { %v210_v36 = vsel %vm209_vm12, %v203_v35, %v207_v32  ;;  %v211_v37 = vsel %vm209_vm12, %v207_v32, %v203_v35 }
  0xb8   :  { %272 = vst [vmem:[#allocation5 + $0xc0] sm:$0xff] %v211_v37  ;;  %273 = vst [vmem:[#allocation5 + $0xc8] sm:$0xff] %v210_v36 }
  0xba   :  { %v219_v39 = vpop.permute.xlu1 %218  ;;  %v215_v40 = vpop.permute.xlu0 %214 }
  0xbb   :  { %v222_v41 = vsel %vm221_vm13, %v215_v40, %v219_v39  ;;  %v223_v42 = vsel %vm221_vm13, %v219_v39, %v215_v40 }
  0xbc   :  { %274 = vst [vmem:[#allocation5 + $0xd0] sm:$0xff] %v223_v42  ;;  %275 = vst [vmem:[#allocation5 + $0xd8] sm:$0xff] %v222_v41 }
  0xbe   :  { %v231_v44 = vpop.permute.xlu1 %230  ;;  %v227_v45 = vpop.permute.xlu0 %226 }
  0xbf   :  { %v234_v46 = vsel %vm233_vm14, %v227_v45, %v231_v44  ;;  %v235_v47 = vsel %vm233_vm14, %v231_v44, %v227_v45 }
  0xc0   :  { %276 = vst [vmem:[#allocation5 + $0xe0] sm:$0xff] %v235_v47  ;;  %277 = vst [vmem:[#allocation5 + $0xe8] sm:$0xff] %v234_v46 }
  0xc2   :  { %v243_v48 = vpop.permute.xlu1 %242  ;;  %v239_v49 = vpop.permute.xlu0 %238 }
  0xc3   :  { %v246_v50 = vsel %vm245_vm15, %v239_v49, %v243_v48  ;;  %v247_v51 = vsel %vm245_vm15, %v243_v48, %v239_v49 }
  0xc4   :  { %278 = vst [vmem:[#allocation5 + $0xf0] sm:$0xff] %v247_v51  ;;  %279 = vst [vmem:[#allocation5 + $0xf8] sm:$0xff] %v246_v50 }
  0xc5   :  { %349 = shalt.err (!%p346_p12)
}
  0xc6   :  { %s350_s10 = scalar_lea.hbm %s462_s1, 4096 }
  0xc7   :  { %p351_p13 = scmp.ne.s32.totalorder %s462_s1, %s350_s10  ;;  %p354_p0 = scmp.lt.u32.totalorder %s350_s10, %s462_s1 }
  0xc9   :  { %p356_p1 = pnand %p354_p0, %p351_p13 }
  0xcb   :  { %359 = shalt.err (!%p356_p1)
}
  0xcc   :  { %291 = dma.vmem_to_hbm [thread:$0]  %s286_s6, 4096, %s462_s1, [#allocation4], %s365_s16, %s365_s16, %s366_s17  }
  0xcd   :  { %362 = dma.done.wait [#allocation4], 4096  }
  0xce   :  { %363 = vsyncadd [#allocation4], 4294963200 }
  0xcf   :  { %295 = vsyncpa [#allocation3], 1 }
  0xd0   :  { %296 = vsyncpa [#allocation4], 1 }

// kernel: forward.4
= control target key start
LH: loop header
LB: loop body
LE: loop exit
PB: predicated region body
PF: predicated region fallthrough
CT: control target
= control target key end

     0   :  { %8 = vsyncpa [#allocation3], 0  ;;  %s875_s0 = inlined_call_operand.hbm [shape: bf16[32,128,128], index: 0, kind: input, shape index: {}]   ;;  %s876_s1 = inlined_call_operand.vmem [shape: bf16[32,2,128], index: 1, kind: input, shape index: {}]   ;;  %s877_s2 = inlined_call_operand.vmem [shape: f32[32], index: 2, kind: input, shape index: {}]   ;;  %s878_s3 = inlined_call_operand.vmem [shape: bf16[32,2,128], index: 3, kind: output, shape index: {}]  }
   0x1   :  { %10 = vsyncpa [#allocation3 + $0x1], 0 }
   0x2   :  { %11 = vsyncpa [#allocation4], 0  ;;  %s700_s12 = smov 0   ;;  %s702_s13 = smov 0  }
   0x3   :  { %s704_s14 = smov 0   ;;  %s706_s15 = smov 0  }
   0x4 LB: > { %s450_s16 = sadd.s32 4294967295, %s668_s15   ;;  %s720_s17 = sadd.s32 1, %s668_s15   ;;  %s668_s15 = sphi %s706_s15, %s891_s15   ;;  %s664_s14 = sphi %s704_s14, %s890_s14   ;;  %s660_s13 = sphi %s702_s13, %s889_s13   ;;  %s656_s12 = sphi %s700_s12, %s888_s12  }
   0x5   : > { %s21_s18 = ssub.s32 %s668_s15, %s720_s17  ;;  %s24_s19 = sadd.s32 1, %s664_s14 }
   0x6   : > { %p22_p0 = scmp.eq.s32.totalorder %s21_s18, 0  ;;  %p31_p1 = scmp.ne.s32.totalorder %s664_s14, %s660_s13 }
   0x7   : > { %p32_p2 = scmp.eq.s32.totalorder %s668_s15, 0  ;;  %p37_p3 = scmp.ne.s32.totalorder %s660_s13, %s656_s12 }
   0x8   : > { %s730_s20 = scalar_select %p22_p0, %s664_s14, %s24_s19  }
   0x9   : > { %p33_p4 = por %p32_p2, %p31_p1  ;;  %p734_p5 = scmp.eq.s32.totalorder %s450_s16, 0 }
   0xa   : > { %p452_p6 = scmp.ge.s32.totalorder %s668_s15, 1  ;;  %p121_p7 = scmp.lt.s32.totalorder %s668_s15, 3 }
   0xb   : > { %p742_p8 = por %p734_p5, %p37_p3  ;;  %s134_s26 = sshll.u32 %s877_s2, 4  ;;  %s135_s26 = int_to_ptr.vmem [resolvable:$true] %s134_s26 }
   0xc   : > { %p746_p9 = pnand %p452_p6, %p121_p7  ;;  %p524_p11 = scmp.lt.s32.totalorder %s668_s15, 2 }
   0xd   : > { %s882_s22 = scalar_select %p742_p8, 1, 0 }
   0xe   : > { %s883_s23 = scalar_select %p746_p9, 1, 0 }
   0xf   : > { %p515_p10 = pneg %p746_p9  ;;  %s145_s27 = sand.u32 1, %s664_s14  }
  0x10   : > { %p763_p13 = pnand %p524_p11, %p33_p4  ;;  %s455_s30 = sshll.u32 %s145_s27, 10 }
  0x11   : > { %p759_p12 = pnand %p515_p10, %p734_p5  ;;  %s581_s4 = scalar_lea.vmem %s135_s26, 16 }
  0x12   : > { %p582_p0 = scmp.ne.s32.totalorder %s135_s26, %s581_s4  ;;  %p589_p6 = scmp.lt.s32.totalorder %s135_s26, %s135_s26 }
  0x13   : > { %p583_p1 = pneg %p759_p12  ;;  %p590_p7 = scmp.lt.s32.totalorder %s581_s4, %s581_s4 }
  0x15   : > { %p584_p2 = pnand %p583_p1, %p582_p0  ;;  %p591_p8 = por %p590_p7, %p589_p6 }
  0x17   : > { %p585_p3 = pneg %p584_p2 }
  0x19   : > { %p592_p9 = pnand %p591_p8, %p585_p3 }
  0x1b   : > { %595 = shalt.err (!%p592_p9)
}
  0x1c   : > { %s674_s5 = smov [#allocation5]   ;;  %s478_s6 = sshll.u32 %s668_s15, 14 }
  0x1d   : > { %518 = dma.vmem_to_smem (!%p759_p12), %s135_s26, 16, %s674_s5, [#allocation4]  }
  0x1e   : > { %s775_s9 = scalar_lea.hbm %s875_s0, %s478_s6  ;;  %s149_s10 = scalar_lea.vmem [#allocation2], %s455_s30 }
  0x1f   : > { %s157_s11 = sshll.u32 %s149_s10, 4  ;;  %s779_s12 = scalar_lea.sflag [#allocation3], %s145_s27  ;;  %s777_s11 = int_to_ptr.vmem [resolvable:$true] %s157_s11 }
  0x20   : > { %s596_s18 = scalar_lea.hbm %s775_s9, 16384  ;;  %p598_p8 = pneg %p763_p13 }
  0x21   : > { %p597_p4 = scmp.ne.s32.totalorder %s775_s9, %s596_s18  ;;  %s601_s25 = scalar_lea.hbm %s875_s0, 32768 }
  0x22   : > { %p602_p11 = scmp.lt.u32.totalorder %s775_s9, %s875_s0  ;;  %p603_p12 = scmp.lt.u32.totalorder %s601_s25, %s596_s18 }
  0x23   : > { %p599_p9 = pnand %p598_p8, %p597_p4  ;;  %p605_p1 = scmp.lt.u32.totalorder %s596_s18, %s775_s9 }
  0x24   : > { %p604_p0 = por %p603_p12, %p602_p11 }
  0x25   : > { %p600_p10 = pneg %p599_p9 }
  0x26   : > { %p606_p2 = por %p605_p1, %p604_p0 }
  0x28   : > { %p607_p3 = pnand %p606_p2, %p600_p10 }
  0x2a   : > { %610 = shalt.err (!%p607_p3)
}
  0x2b   : > { %s611_s27 = scalar_lea.vmem %s777_s11, 16384  ;;  %s675_s30 = smov [#allocation2]  }
  0x2c   : > { %p612_p6 = scmp.ne.s32.totalorder %s777_s11, %s611_s27  ;;  %s616_s4 = sshll.u32 %s675_s30, 4  ;;  %s617_s4 = int_to_ptr.vmem [resolvable:$false] %s616_s4 }
  0x2d   : > { %s618_s5 = scalar_lea.vmem %s617_s4, 32768  ;;  %p619_p9 = scmp.lt.s32.totalorder %s777_s11, %s617_s4 }
  0x2e   : > { %p614_p7 = pnand %p612_p6, %p598_p8  ;;  %p620_p11 = scmp.lt.s32.totalorder %s618_s5, %s611_s27 }
  0x30   : > { %p615_p4 = pneg %p614_p7  ;;  %p621_p12 = por %p620_p11, %p619_p9 }
  0x32   : > { %p622_p0 = pnand %p621_p12, %p615_p4 }
  0x34   : > { %625 = shalt.err (!%p622_p0)
}
  0x35   : > { %s676_s6 = smov 64   ;;  %s677_s7 = smov 4  }
  0x36   : > { %522 = dma.hbm_to_vmem [thread:$0]  (!%p763_p13), %s775_s9, 16384, %s777_s11, %s779_s12, %s676_s6, %s676_s6, %s677_s7  }
  0x37   : > { %p886_p8 = scmp.ne.s32.totalorder %s883_s23, 0 }
  0x38   : > { %s179_s8 = sand.u32 (!%p886_p8), 1, %s660_s13   ;;  %p887_p10 = scmp.ne.s32.totalorder (!%p886_p8), %s882_s22, 0 }
  0x39   : > { %177 = sbr.rel (%p886_p8) target bundleno = 353 (0x161), region = 32  ;;  %s810_s10 = sshll.u32 (!%p886_p8), %s179_s8, 10 }
  0x3a   : > { %s180_s18 = scalar_lea.sflag (!%p886_p8), [#allocation3], %s179_s8  ;;  %s183_s19 = scalar_lea.vmem (!%p886_p8), [#allocation2], %s810_s10 }
  0x40   : > { %647 = dma.done.wait (%p887_p10), %s180_s18, 16384  }
  0x41   : > { %649 = vsyncadd (%p887_p10), %s180_s18, 4294950912 }
  0x42   : > { %651 = dma.done.wait (%p734_p5), [#allocation4], 16  }
  0x43   : > { %653 = vsyncadd (%p734_p5), [#allocation4], 4294967280 }
  0x44   : > { %192 = sfence }
  0x45   : > { %s823_s23 = sshll.u32 %s450_s16, 4  ;;  %s837_s25 = smov 0  }
  0x46   : > { %p216_p13 = scmp.lt.s32.totalorder %s823_s23, 31 }
  0x48   : > { %s827_s29 = scalar_select %p216_p13, %s823_s23, 31 }
  0x4a   : > { %s218_s11 = scalar_lea.vmem %s876_s1, %s827_s29  ;;  %s223_s21 = scalar_lea.vmem %s878_s3, %s827_s29 }
  0x4b LB: >> { %v678_v0 = vmov 0.0   ;;  %vm679_vm0 = vmmov 0   ;;  %s479_s15 = sshll.u32 %s672_s25, 6  ;;  %s251_s27 = scalar_lea.vmem %s218_s11, %s672_s25  ;;  %s672_s25 = sphi %s837_s25, %s231_s25  }
  0x4c   : >> { %489 = vmatprep.subr.bf16.mxu0 %v678_v0  ;;  %505 = vmatprep.mubr.msk.bf16.mxu0 %vm679_vm0, %v678_v0  ;;  %s234_s16 = scalar_lea.vmem %s183_s19, %s479_s15 [#allocation2]  ;;  %v252_v9 = vld [vmem:[%s251_s27] sm:$0x1]  ;;  %s254_s30 = sadd.s32 %s672_s25, %s823_s23 }
  0x4d   : >> { %v571_v1 = vld [vmem:[%s234_s16] sm:$0xff]   ;;  %v572_v2 = vld [vmem:[%s234_s16 + $0x8] sm:$0xff]   ;;  %v573_v3 = vld [vmem:[%s234_s16 + $0x10] sm:$0xff]   ;;  %s255_s4 = sld [smem:[#allocation5 + %s254_s30]]  ;;  %v256_v10 = vunpack.c.l.bf16 %v252_v9  ;;  %s357_s7 = scalar_lea.vmem %s223_s21, %s672_s25 }
  0x4e   : >> { %490 = vmatpush3.bf16.msra.mxu0 %v571_v1  ;;  %v574_v4 = vld [vmem:[%s234_s16 + $0x18] sm:$0xff]   ;;  %v575_v5 = vld [vmem:[%s234_s16 + $0x20] sm:$0xff]   ;;  %v576_v6 = vld [vmem:[%s234_s16 + $0x28] sm:$0xff]   ;;  %s231_s25 = sadd.s32 1, %s672_s25  }
  0x4f   : >> { %491 = vmatprep.subr.bf16.mxu0 %v678_v0  ;;  %v577_v7 = vld [vmem:[%s234_s16 + $0x30] sm:$0xff]   ;;  %v578_v8 = vld [vmem:[%s234_s16 + $0x38] sm:$0xff]   ;;  %p228_p5 = scmp.ge.s32.totalorder %s231_s25, 16  }
  0x52   : >> { %492 = vmatpush3.bf16.msra.mxu0 %v572_v2 }
  0x53   : >> { %493 = vmatprep.subr.bf16.mxu0 %v678_v0  ;;  %v257_v11 = vstv %s255_s4 }
  0x54   : >> { %v258_v12 = vmul.f32 %v257_v11, %v256_v10 }
  0x56   : >> { %494 = vmatpush3.bf16.msra.mxu0 %v573_v3 }
  0x57   : >> { %495 = vmatprep.subr.bf16.mxu0 %v678_v0 }
  0x5a   : >> { %496 = vmatpush3.bf16.msra.mxu0 %v574_v4 }
  0x5b   : >> { %497 = vmatprep.subr.bf16.mxu0 %v678_v0 }
  0x5e   : >> { %498 = vmatpush3.bf16.msra.mxu0 %v575_v5 }
  0x5f   : >> { %499 = vmatprep.subr.bf16.mxu0 %v678_v0 }
  0x62   : >> { %500 = vmatpush3.bf16.msra.mxu0 %v576_v6 }
  0x63   : >> { %501 = vmatprep.subr.bf16.mxu0 %v678_v0 }
  0x66   : >> { %502 = vmatpush3.bf16.msra.mxu0 %v577_v7 }
  0x67   : >> { %503 = vmatprep.subr.bf16.mxu0 %v678_v0 }
  0x6a   : >> { %504 = vmatpush3.bf16.msra.mxu0 %v578_v8 }
  0x6d   : >> { %506 = vmatmul.mubr.bf16.vlgmr.msra.gmra.mrb[0].mxu0 %v252_v9 }
 0x140   : >> { %v341_v13 = vpop.f32.mrb[0].mxu0 }
 0x141   : >> { %v342_v14 = vadd.f32 %v341_v13, %v258_v12  ;;  %v507_v15 = vpop.f32.mrb[1].mxu0 }
 0x142   : >> { %v344_v16 = vpop.f32.mrb[2].mxu0 }
 0x143   : >> { %v347_v17 = vmul.f32 %v342_v14, %v342_v14  ;;  %v508_v18 = vpop.f32.mrb[3].mxu0 }
 0x145   : >> { %v348_v19 = vmul.f32 %v347_v17, %v342_v14 }
 0x147   : >> { %v349_v20 = vmul.f32 0.044715, %v348_v19 }
 0x149   : >> { %v350_v21 = vadd.f32 %v349_v20, %v342_v14 }
 0x14b   : >> { %v351_v22 = vmul.f32 0.7978846, %v350_v21 }
 0x14d   : >> { %579 = vtanh.f32 %v351_v22 }
 0x157   : >> { %v580_v23 = vpop.eup %579 }
 0x158   : >> { %v353_v24 = vadd.f32 1.0, %v580_v23 }
 0x15a   : >> { %v354_v25 = vmul.f32 0.5, %v353_v24  ;;  %230 = sbr.rel (!%p228_p5) target bundleno = 75 (0x4b), region = 90 }
 0x15c   : >> { %v355_v26 = vmul.f32 %v354_v25, %v342_v14 }
 0x15e   : >> { %v356_v27 = vpack.c.bf16 %v355_v26, %v355_v26 }
 0x160   : >> { %358 = vst [vmem:[%s357_s7] sm:$0x1] %v356_v27 }
 0x161 PF: > { %p14_p1 = scmp.ge.s32.totalorder %s720_s17, 4   ;;  %s888_s12 = smov %s660_s13 }
 0x162   : > { %s889_s13 = smov %s664_s14  ;;  %s890_s14 = smov %s730_s20 }
 0x163   : > { %s891_s15 = smov %s720_s17  ;;  %16 = sbr.rel (!%p14_p1) target bundleno = 4 (0x4), region = 101 }
 0x16a   :  { %379 = vsyncpa [#allocation3], 1 }
 0x16b   :  { %381 = vsyncpa [#allocation3 + $0x1], 1 }
 0x16c   :  { %382 = vsyncpa [#allocation4], 1 }
 0x16d   :  { %384 = vsyncpa [#allocation4 + $0x1], 1 }

// kernel: forward.3
= control target key start
LH: loop header
LB: loop body
LE: loop exit
PB: predicated region body
PF: predicated region fallthrough
CT: control target
= control target key end

     0   :  { %vm61_vm0 = vcmask 130048   ;;  %vm415_vm1 = vcmask 261120   ;;  %vm1139_vm2 = vcmask 1040384   ;;  %vm1140_vm3 = vsmask.f32 256  ;;  %s3192_s1 = inlined_call_operand.vmem [shape: f32[16,32], index: 1, kind: input, shape index: {}]   ;;  %s3193_s0 = inlined_call_operand.vmem [shape: f32[2,128,16], index: 0, kind: input, shape index: {}]   ;;  %s3194_s2 = inlined_call_operand.vmem [shape: f32[1,32], index: 2, kind: input, shape index: {}, may-alias: {2,4}]   ;;  %s3195_s3 = inlined_call_operand.vmem [shape: f32[1,32], index: 3, kind: input, shape index: {}]   ;;  %s3196_s4 = inlined_call_operand.vmem [shape: f32[1,32], index: 4, kind: input, shape index: {}, may-alias: {2,4}]   ;;  %s3197_s5 = inlined_call_operand.vmem [shape: bf16[32,2,128], index: 5, kind: output, shape index: {}]  }
   0x1   :  { %v52_v0 = vld [vmem:[%s3192_s1] sm:$0xff]  ;;  %v53_v1 = vld [vmem:[%s3192_s1 + $0x8] sm:$0xff]  ;;  %v22_v7 = vld [vmem:[%s3193_s0 + $0x10] sm:$0xff]  ;;  %vm1450_vm5 = vsmask.f32 7938 }
   0x2   :  { %v20_v2 = vld [vmem:[%s3193_s0] sm:$0xff]  ;;  %v1705_v3 = vpack.c.bf16 %v53_v1, %v52_v0  ;;  %v21_v5 = vld [vmem:[%s3193_s0 + $0x8] sm:$0xff]  ;;  %v38_v8 = vld [vmem:[%s3193_s0 + $0x90] sm:$0xff] }
   0x3   :  { %1657 = vmatprep.mubr.msk.f32.mxu0 %vm61_vm0, %v20_v2  ;;  %v36_v4 = vld [vmem:[%s3193_s0 + $0x80] sm:$0xff]  ;;  %v37_v6 = vld [vmem:[%s3193_s0 + $0x88] sm:$0xff]  ;;  %v23_v9 = vld [vmem:[%s3193_s0 + $0x18] sm:$0xff] }
   0x4   :  { %1681 = vmatprep.mubr.msk.f32.mxu1 %vm61_vm0, %v36_v4  ;;  %1706 = vmatprep.subr.bf16.mxu0 %v1705_v3  ;;  %v39_v10 = vld [vmem:[%s3193_s0 + $0x98] sm:$0xff]  ;;  %v24_v11 = vld [vmem:[%s3193_s0 + $0x20] sm:$0xff]  ;;  %v25_v13 = vld [vmem:[%s3193_s0 + $0x28] sm:$0xff] }
   0x5   :  { %1709 = vmatprep.subr.bf16.mxu1 %v1705_v3  ;;  %1708 = vmatpush3.bf16.msra.mxu0 %v1705_v3  ;;  %v40_v12 = vld [vmem:[%s3193_s0 + $0xa0] sm:$0xff]  ;;  %v41_v14 = vld [vmem:[%s3193_s0 + $0xa8] sm:$0xff]  ;;  %v26_v15 = vld [vmem:[%s3193_s0 + $0x30] sm:$0xff] }
   0x6   :  { %1710 = vmatpush3.bf16.msra.mxu1 %v1705_v3  ;;  %v42_v16 = vld [vmem:[%s3193_s0 + $0xb0] sm:$0xff]  ;;  %v27_v17 = vld [vmem:[%s3193_s0 + $0x38] sm:$0xff]  ;;  %v28_v19 = vld [vmem:[%s3193_s0 + $0x40] sm:$0xff] }
   0x7   :  { %v43_v18 = vld [vmem:[%s3193_s0 + $0xb8] sm:$0xff]  ;;  %v44_v20 = vld [vmem:[%s3193_s0 + $0xc0] sm:$0xff]  ;;  %v29_v21 = vld [vmem:[%s3193_s0 + $0x48] sm:$0xff] }
   0x8   :  { %1658 = vmatmul.mubr.msk.f32.vlgmr.msra.gmra.mrb[0].mxu0 %vm61_vm0, %v21_v5  ;;  %v45_v22 = vld [vmem:[%s3193_s0 + $0xc8] sm:$0xff]  ;;  %v30_v23 = vld [vmem:[%s3193_s0 + $0x50] sm:$0xff]  ;;  %v31_v25 = vld [vmem:[%s3193_s0 + $0x58] sm:$0xff] }
   0x9   :  { %1682 = vmatmul.mubr.msk.f32.vlgmr.msra.gmra.mrb[0].mxu1 %vm61_vm0, %v37_v6  ;;  %1660 = vmatprep.mubr.msk.f32.mxu0 %vm61_vm0, %v22_v7  ;;  %v46_v24 = vld [vmem:[%s3193_s0 + $0xd0] sm:$0xff]  ;;  %v47_v26 = vld [vmem:[%s3193_s0 + $0xd8] sm:$0xff]  ;;  %v32_v27 = vld [vmem:[%s3193_s0 + $0x60] sm:$0xff] }
   0xa   :  { %1684 = vmatprep.mubr.msk.f32.mxu1 %vm61_vm0, %v38_v8  ;;  %v48_v28 = vld [vmem:[%s3193_s0 + $0xe0] sm:$0xff]  ;;  %v33_v29 = vld [vmem:[%s3193_s0 + $0x68] sm:$0xff]  ;;  %v34_v31 = vld [vmem:[%s3193_s0 + $0x70] sm:$0xff] }
   0xb   :  { %v49_v30 = vld [vmem:[%s3193_s0 + $0xe8] sm:$0xff]  ;;  %v50_v32 = vld [vmem:[%s3193_s0 + $0xf0] sm:$0xff]  ;;  %v35_v33 = vld [vmem:[%s3193_s0 + $0x78] sm:$0xff] }
   0xc   :  { %1661 = vmatmul.mubr.msk.f32.gmra.mrb[2].mxu0 %vm61_vm0, %v23_v9  ;;  %v51_v34 = vld [vmem:[%s3193_s0 + $0xf8] sm:$0xff]  ;;  %v1944_v35 = vld [vmem:[%s3194_s2] ss:$0 sm:$0xff]  ;;  %vm2527_vm4 = vmand %vm1139_vm2, %vm1140_vm3 }
   0xd   :  { %1685 = vmatmul.mubr.msk.f32.gmra.mrb[2].mxu1 %vm61_vm0, %v39_v10  ;;  %1663 = vmatprep.mubr.msk.f32.mxu0 %vm61_vm0, %v24_v11  ;;  %vm2884_vm6 = vmand %vm1139_vm2, %vm1450_vm5 }
   0xe   :  { %1687 = vmatprep.mubr.msk.f32.mxu1 %vm61_vm0, %v40_v12 }
  0x10   :  { %1664 = vmatmul.mubr.msk.f32.gmra.mrb[4].mxu0 %vm61_vm0, %v25_v13 }
  0x11   :  { %1688 = vmatmul.mubr.msk.f32.gmra.mrb[4].mxu1 %vm61_vm0, %v41_v14  ;;  %1666 = vmatprep.mubr.msk.f32.mxu0 %vm61_vm0, %v26_v15 }
  0x12   :  { %1690 = vmatprep.mubr.msk.f32.mxu1 %vm61_vm0, %v42_v16 }
  0x14   :  { %1667 = vmatmul.mubr.msk.f32.gmra.mrb[6].mxu0 %vm61_vm0, %v27_v17 }
  0x15   :  { %1691 = vmatmul.mubr.msk.f32.gmra.mrb[6].mxu1 %vm61_vm0, %v43_v18  ;;  %1669 = vmatprep.mubr.msk.f32.mxu0 %vm61_vm0, %v28_v19 }
  0x16   :  { %1693 = vmatprep.mubr.msk.f32.mxu1 %vm61_vm0, %v44_v20 }
  0x18   :  { %1670 = vmatmul.mubr.msk.f32.gmra.mrb[8].mxu0 %vm61_vm0, %v29_v21 }
  0x19   :  { %1694 = vmatmul.mubr.msk.f32.gmra.mrb[8].mxu1 %vm61_vm0, %v45_v22  ;;  %1672 = vmatprep.mubr.msk.f32.mxu0 %vm61_vm0, %v30_v23 }
  0x1a   :  { %1696 = vmatprep.mubr.msk.f32.mxu1 %vm61_vm0, %v46_v24 }
  0x1c   :  { %1673 = vmatmul.mubr.msk.f32.gmra.mrb[10].mxu0 %vm61_vm0, %v31_v25 }
  0x1d   :  { %1697 = vmatmul.mubr.msk.f32.gmra.mrb[10].mxu1 %vm61_vm0, %v47_v26  ;;  %1675 = vmatprep.mubr.msk.f32.mxu0 %vm61_vm0, %v32_v27 }
  0x1e   :  { %1699 = vmatprep.mubr.msk.f32.mxu1 %vm61_vm0, %v48_v28 }
  0x20   :  { %1676 = vmatmul.mubr.msk.f32.gmra.mrb[12].mxu0 %vm61_vm0, %v33_v29 }
  0x21   :  { %1700 = vmatmul.mubr.msk.f32.gmra.mrb[12].mxu1 %vm61_vm0, %v49_v30  ;;  %1678 = vmatprep.mubr.msk.f32.mxu0 %vm61_vm0, %v34_v31 }
  0x22   :  { %1702 = vmatprep.mubr.msk.f32.mxu1 %vm61_vm0, %v50_v32 }
  0x24   :  { %1679 = vmatmul.mubr.msk.f32.gmra.mrb[14].mxu0 %vm61_vm0, %v35_v33 }
  0x25   :  { %1703 = vmatmul.mubr.msk.f32.gmra.mrb[14].mxu1 %vm61_vm0, %v51_v34 }
  0xdb   :  { %v1659_v36 = vpop.f32.mrb[0].mxu0 }
  0xdc   :  { %v1683_v37 = vpop.f32.mrb[0].mxu1  ;;  %v1947_v38 = vadd.f32 %v1659_v36, %v1944_v35  ;;  %v224_v40 = vpop.f32.mrb[1].mxu0 }
  0xdd   :  { %v1950_v39 = vadd.f32 %v1683_v37, %v1944_v35  ;;  %v304_v41 = vpop.f32.mrb[1].mxu1  ;;  %v1953_v42 = vadd.f32 %v1944_v35, %v224_v40 }
  0xde   :  { %v384_v43 = vmax.f32 %v1947_v38, 0.0  ;;  %v1959_v46 = vadd.f32 %v1944_v35, %v304_v41 }
  0xdf   :  { %v400_v44 = vmax.f32 %v1950_v39, 0.0  ;;  %v383_v45 = vmax.f32 %v1953_v42, 0.0  ;;  %v1662_v47 = vpop.f32.mrb[2].mxu0 }
  0xe0   :  { %v1686_v48 = vpop.f32.mrb[2].mxu1  ;;  %v1962_v49 = vadd.f32 %v1662_v47, %v1944_v35  ;;  %v234_v50 = vpop.f32.mrb[3].mxu0  ;;  %v419_v52 = vsel %vm415_vm1, %v384_v43, 0.0  ;;  %v399_v57 = vmax.f32 %v1959_v46, 0.0 }
  0xe1   :  { %v467_v51 = vsel %vm415_vm1, %v400_v44, 0.0  ;;  %v1971_v53 = vadd.f32 %v1686_v48, %v1944_v35  ;;  %v314_v54 = vpop.f32.mrb[3].mxu1  ;;  %420 = vadd.xlane.f32.xlu0 %v419_v52  ;;  %v1977_v60 = vadd.f32 %v1944_v35, %v234_v50  ;;  %v416_v63 = vsel %vm415_vm1, %v383_v45, 0.0 }
  0xe2   :  { %468 = vadd.xlane.f32.xlu1 %v467_v51  ;;  %v386_v55 = vmax.f32 %v1962_v49, 0.0  ;;  %v1980_v61 = vadd.f32 %v1944_v35, %v314_v54  ;;  %v464_v9 = vsel %vm415_vm1, %v399_v57, 0.0 }
  0xe3   :  { %v402_v56 = vmax.f32 %v1971_v53, 0.0  ;;  %v1665_v58 = vpop.f32.mrb[4].mxu0  ;;  %v385_v7 = vmax.f32 %v1977_v60, 0.0 }
  0xe4   :  { %v1689_v59 = vpop.f32.mrb[4].mxu1  ;;  %v425_v62 = vsel %vm415_vm1, %v386_v55, 0.0  ;;  %v244_v0 = vpop.f32.mrb[5].mxu0  ;;  %v1992_v3 = vadd.f32 %v1665_v58, %v1944_v35  ;;  %v401_v8 = vmax.f32 %v1980_v61, 0.0 }
  0xe5   :  { %v324_v1 = vpop.f32.mrb[5].mxu1  ;;  %417 = vadd.xlane.f32.xlu0 %v416_v63  ;;  %v473_v2 = vsel %vm415_vm1, %v402_v56, 0.0  ;;  %v1995_v4 = vadd.f32 %v1944_v35, %v244_v0  ;;  %v2003_v12 = vadd.f32 %v1689_v59, %v1944_v35  ;;  %v422_v18 = vsel %vm415_vm1, %v385_v7, 0.0 }
  0xe6   :  { %426 = vadd.xlane.f32.xlu1 %v425_v62  ;;  %v2006_v13 = vadd.f32 %v1944_v35, %v324_v1  ;;  %v388_v14 = vmax.f32 %v1992_v3, 0.0  ;;  %v470_v19 = vsel %vm415_vm1, %v401_v8, 0.0 }
  0xe7   :  { %v1668_v5 = vpop.f32.mrb[6].mxu0  ;;  %v387_v15 = vmax.f32 %v1995_v4, 0.0  ;;  %v404_v22 = vmax.f32 %v2003_v12, 0.0 }
  0xe8   :  { %v1692_v6 = vpop.f32.mrb[6].mxu1  ;;  %v254_v10 = vpop.f32.mrb[7].mxu0  ;;  %v403_v23 = vmax.f32 %v2006_v13, 0.0  ;;  %v431_v24 = vsel %vm415_vm1, %v388_v14, 0.0  ;;  %v2025_v26 = vadd.f32 %v1668_v5, %v1944_v35 }
  0xe9   :  { %v334_v11 = vpop.f32.mrb[7].mxu1  ;;  %465 = vadd.xlane.f32.xlu0 %v464_v9  ;;  %v428_v25 = vsel %vm415_vm1, %v387_v15, 0.0  ;;  %v2028_v27 = vadd.f32 %v1944_v35, %v254_v10  ;;  %v2031_v32 = vadd.f32 %v1692_v6, %v1944_v35  ;;  %v479_v37 = vsel %vm415_vm1, %v404_v22, 0.0 }
  0xea   :  { %474 = vadd.xlane.f32.xlu1 %v473_v2  ;;  %v2034_v33 = vadd.f32 %v1944_v35, %v334_v11  ;;  %v390_v34 = vmax.f32 %v2025_v26, 0.0  ;;  %v476_v40 = vsel %vm415_vm1, %v403_v23, 0.0 }
  0xeb   :  { %v1671_v16 = vpop.f32.mrb[8].mxu0  ;;  %v389_v36 = vmax.f32 %v2028_v27, 0.0  ;;  %v406_v51 = vmax.f32 %v2031_v32, 0.0 }
  0xec   :  { %v1695_v17 = vpop.f32.mrb[8].mxu1  ;;  %v264_v20 = vpop.f32.mrb[9].mxu0  ;;  %v405_v52 = vmax.f32 %v2034_v33, 0.0  ;;  %v437_v54 = vsel %vm415_vm1, %v390_v34, 0.0  ;;  %v2053_v59 = vadd.f32 %v1671_v16, %v1944_v35 }
  0xed   :  { %v344_v21 = vpop.f32.mrb[9].mxu1  ;;  %471 = vadd.xlane.f32.xlu0 %v470_v19  ;;  %v434_v58 = vsel %vm415_vm1, %v389_v36, 0.0  ;;  %v2056_v62 = vadd.f32 %v1944_v35, %v264_v20  ;;  %v485_v5 = vsel %vm415_vm1, %v406_v51, 0.0  ;;  %v2062_v6 = vadd.f32 %v1695_v17, %v1944_v35 }
  0xee   :  { %423 = vadd.xlane.f32.xlu1 %v422_v18  ;;  %v392_v9 = vmax.f32 %v2053_v59, 0.0  ;;  %v482_v11 = vsel %vm415_vm1, %v405_v52, 0.0  ;;  %v2070_v16 = vadd.f32 %v1944_v35, %v344_v21 }
  0xef   :  { %v1674_v28 = vpop.f32.mrb[10].mxu0  ;;  %v391_v10 = vmax.f32 %v2056_v62, 0.0  ;;  %v408_v17 = vmax.f32 %v2062_v6, 0.0 }
  0xf0   :  { %v1698_v29 = vpop.f32.mrb[10].mxu1  ;;  %v274_v30 = vpop.f32.mrb[11].mxu0  ;;  %v2073_v18 = vadd.f32 %v1674_v28, %v1944_v35  ;;  %v3209_v20 = vmax.f32 %v2070_v16, 0.0 }
  0xf1   :  { %v354_v31 = vpop.f32.mrb[11].mxu1  ;;  %429 = vadd.xlane.f32.xlu0 %v428_v25  ;;  %v2076_v19 = vadd.f32 %v1944_v35, %v274_v30  ;;  %v440_v21 = vsel %vm415_vm1, %v391_v10, 0.0  ;;  %v491_v30 = vsel %vm415_vm1, %v408_v17, 0.0 }
  0xf2   :  { %432 = vadd.xlane.f32.xlu1 %v431_v24  ;;  %v443_v24 = vsel %vm415_vm1, %v392_v9, 0.0  ;;  %v3200_v25 = vmax.f32 %v2073_v18, 0.0 }
  0xf3   :  { %v1677_v41 = vpop.f32.mrb[12].mxu0  ;;  %v3198_v28 = vmax.f32 %v2076_v19, 0.0 }
  0xf4   :  { %v1701_v47 = vpop.f32.mrb[12].mxu1  ;;  %v284_v48 = vpop.f32.mrb[13].mxu0 }
  0xf5   :  { %v364_v50 = vpop.f32.mrb[13].mxu1  ;;  %477 = vadd.xlane.f32.xlu0 %v476_v40  ;;  %v2095_v40 = vadd.f32 %v1677_v41, %v1944_v35 }
  0xf6   :  { %480 = vadd.xlane.f32.xlu1 %v479_v37  ;;  %v488_v37 = vsel %vm415_vm1, %v3209_v20, 0.0 }
  0xf7   :  { %v1680_v63 = vpop.f32.mrb[14].mxu0 }
  0xf8   :  { %v1704_v0 = vpop.f32.mrb[14].mxu1  ;;  %v294_v1 = vpop.f32.mrb[15].mxu0  ;;  %v2109_v41 = vadd.f32 %v1680_v63, %v1944_v35 }
  0xf9   :  { %v374_v2 = vpop.f32.mrb[15].mxu1  ;;  %435 = vadd.xlane.f32.xlu0 %v434_v58  ;;  %v449_v58 = vsel %vm415_vm1, %v3200_v25, 0.0  ;;  %v2140_v25 = vadd.f32 %v1944_v35, %v364_v50 }
  0xfa   :  { %438 = vadd.xlane.f32.xlu1 %v437_v54  ;;  %v2098_v54 = vadd.f32 %v1944_v35, %v284_v48  ;;  %v2112_v48 = vadd.f32 %v1944_v35, %v294_v1  ;;  %v2154_v50 = vadd.f32 %v1944_v35, %v374_v2 }
  0xfd   :  { %483 = vadd.xlane.f32.xlu0 %v482_v11  ;;  %v3199_v11 = vmax.f32 %v2095_v40, 0.0 }
  0xfe   :  { %486 = vadd.xlane.f32.xlu1 %v485_v5  ;;  %v446_v5 = vsel %vm415_vm1, %v3198_v28, 0.0  ;;  %v3202_v28 = vmax.f32 %v2112_v48, 0.0 }
  0xff   :  { %v455_v63 = vsel %vm415_vm1, %v3199_v11, 0.0  ;;  %v2137_v11 = vadd.f32 %v1701_v47, %v1944_v35  ;;  %v2151_v47 = vadd.f32 %v1704_v0, %v1944_v35 }
 0x101   :  { %441 = vadd.xlane.f32.xlu0 %v440_v21  ;;  %v2115_v21 = vadd.f32 %v1698_v29, %v1944_v35 }
 0x102   :  { %444 = vadd.xlane.f32.xlu1 %v443_v24  ;;  %v3206_v24 = vmax.f32 %v2098_v54, 0.0 }
 0x103   :  { %v3204_v29 = vmax.f32 %v2115_v21, 0.0 }
 0x104   :  { %v452_v1 = vsel %vm415_vm1, %v3206_v24, 0.0 }
 0x105   :  { %489 = vadd.xlane.f32.xlu0 %v488_v37  ;;  %v3201_v37 = vmax.f32 %v2109_v41, 0.0 }
 0x106   :  { %492 = vadd.xlane.f32.xlu1 %v491_v30  ;;  %v2118_v30 = vadd.f32 %v1944_v35, %v354_v31 }
 0x107   :  { %v461_v31 = vsel %vm415_vm1, %v3201_v37, 0.0  ;;  %v3205_v37 = vmax.f32 %v2137_v11, 0.0 }
 0x109   :  { %447 = vadd.xlane.f32.xlu0 %v446_v5  ;;  %v458_v5 = vsel %vm415_vm1, %v3202_v28, 0.0  ;;  %v3208_v28 = vmax.f32 %v2140_v25, 0.0 }
 0x10a   :  { %450 = vadd.xlane.f32.xlu1 %v449_v58  ;;  %v3203_v58 = vmax.f32 %v2118_v30, 0.0 }
 0x10d   :  { %453 = vadd.xlane.f32.xlu0 %v452_v1  ;;  %v494_v1 = vsel %vm415_vm1, %v3203_v58, 0.0  ;;  %v503_v58 = vsel %vm415_vm1, %v3205_v37, 0.0 }
 0x10e   :  { %456 = vadd.xlane.f32.xlu1 %v455_v63  ;;  %v497_v63 = vsel %vm415_vm1, %v3204_v29, 0.0  ;;  %v500_v29 = vsel %vm415_vm1, %v3208_v28, 0.0 }
 0x111   :  { %459 = vadd.xlane.f32.xlu0 %v458_v5  ;;  %v413_v5 = vmax.f32 %v2154_v50, 0.0 }
 0x112   :  { %462 = vadd.xlane.f32.xlu1 %v461_v31  ;;  %v3207_v31 = vmax.f32 %v2151_v47, 0.0 }
 0x113   :  { %v506_v0 = vsel %vm415_vm1, %v413_v5, 0.0 }
 0x114   :  { %v509_v35 = vsel %vm415_vm1, %v3207_v31, 0.0 }
 0x115   :  { %495 = vadd.xlane.f32.xlu0 %v494_v1 }
 0x116   :  { %498 = vadd.xlane.f32.xlu1 %v497_v63 }
 0x119   :  { %501 = vadd.xlane.f32.xlu0 %v500_v29 }
 0x11a   :  { %504 = vadd.xlane.f32.xlu1 %v503_v58 }
 0x11d   :  { %507 = vadd.xlane.f32.xlu0 %v506_v0 }
 0x11e   :  { %510 = vadd.xlane.f32.xlu1 %v509_v35 }
 0x16e   :  { %v421_v63 = vpop.xlane.xlu0 %420 }
 0x16f   :  { %v469_v2 = vpop.xlane.xlu1 %468  ;;  %v514_v37 = vmul.f32 0.03125, %v421_v63 }
 0x170   :  { %v530_v1 = vmul.f32 0.03125, %v469_v2 }
 0x171   :  { %v2176_v29 = vsub.f32 %v384_v43, %v514_v37 }
 0x172   :  { %v2172_v24 = vsub.f32 %v400_v44, %v530_v1  ;;  %v418_v31 = vpop.xlane.xlu0 %417 }
 0x173   :  { %v427_v58 = vpop.xlane.xlu1 %426  ;;  %v513_v20 = vmul.f32 0.03125, %v418_v31  ;;  %v578_v35 = vmul.f32 %v2176_v29, %v2176_v29 }
 0x174   :  { %v516_v28 = vmul.f32 0.03125, %v427_v58  ;;  %v594_v38 = vmul.f32 %v2172_v24, %v2172_v24 }
 0x175   :  { %v2186_v39 = vsub.f32 %v383_v45, %v513_v20  ;;  %v612_v44 = vsel %vm415_vm1, %v578_v35, 0.0 }
 0x176   :  { %v2182_v0 = vsub.f32 %v386_v55, %v516_v28  ;;  %613 = vadd.xlane.f32.xlu1 %v612_v44  ;;  %v466_v37 = vpop.xlane.xlu0 %465  ;;  %v660_v55 = vsel %vm415_vm1, %v594_v38, 0.0 }
 0x177   :  { %v475_v43 = vpop.xlane.xlu1 %474  ;;  %v529_v2 = vmul.f32 0.03125, %v466_v37  ;;  %v577_v63 = vmul.f32 %v2186_v39, %v2186_v39 }
 0x178   :  { %v532_v31 = vmul.f32 0.03125, %v475_v43  ;;  %v580_v49 = vmul.f32 %v2182_v0, %v2182_v0 }
 0x179   :  { %v2201_v45 = vsub.f32 %v399_v57, %v529_v2  ;;  %v609_v20 = vsel %vm415_vm1, %v577_v63, 0.0 }
 0x17a   :  { %v2197_v42 = vsub.f32 %v402_v56, %v532_v31  ;;  %661 = vadd.xlane.f32.xlu1 %v660_v55  ;;  %610 = vadd.xlane.f32.xlu0 %v609_v20  ;;  %v472_v1 = vpop.xlane.xlu0 %471  ;;  %v618_v53 = vsel %vm415_vm1, %v580_v49, 0.0 }
 0x17b   :  { %v424_v28 = vpop.xlane.xlu1 %423  ;;  %v531_v35 = vmul.f32 0.03125, %v472_v1  ;;  %v593_v44 = vmul.f32 %v2201_v45, %v2201_v45 }
 0x17c   :  { %v515_v58 = vmul.f32 0.03125, %v424_v28  ;;  %v596_v38 = vmul.f32 %v2197_v42, %v2197_v42 }
 0x17d   :  { %v2214_v56 = vsub.f32 %v401_v8, %v531_v35  ;;  %v657_v57 = vsel %vm415_vm1, %v593_v44, 0.0 }
 0x17e   :  { %v2210_v46 = vsub.f32 %v385_v7, %v515_v58  ;;  %619 = vadd.xlane.f32.xlu1 %v618_v53  ;;  %658 = vadd.xlane.f32.xlu0 %v657_v57  ;;  %v430_v37 = vpop.xlane.xlu0 %429  ;;  %v666_v63 = vsel %vm415_vm1, %v596_v38, 0.0 }
 0x17f   :  { %v433_v43 = vpop.xlane.xlu1 %432  ;;  %v517_v2 = vmul.f32 0.03125, %v430_v37  ;;  %v595_v7 = vmul.f32 %v2214_v56, %v2214_v56 }
 0x180   :  { %v518_v31 = vmul.f32 0.03125, %v433_v43  ;;  %v579_v60 = vmul.f32 %v2210_v46, %v2210_v46 }
 0x181   :  { %v2229_v8 = vsub.f32 %v387_v15, %v517_v2  ;;  %v663_v3 = vsel %vm415_vm1, %v595_v7, 0.0 }
 0x182   :  { %v2225_v61 = vsub.f32 %v388_v14, %v518_v31  ;;  %v615_v49 = vsel %vm415_vm1, %v579_v60, 0.0  ;;  %667 = vadd.xlane.f32.xlu1 %v666_v63  ;;  %v478_v20 = vpop.xlane.xlu0 %477 }
 0x183   :  { %v481_v55 = vpop.xlane.xlu1 %480  ;;  %616 = vadd.xlane.f32.xlu0 %v615_v49  ;;  %v533_v1 = vmul.f32 0.03125, %v478_v20  ;;  %v581_v35 = vmul.f32 %v2229_v8, %v2229_v8 }
 0x184   :  { %v534_v28 = vmul.f32 0.03125, %v481_v55  ;;  %v582_v58 = vmul.f32 %v2225_v61, %v2225_v61 }
 0x185   :  { %v2242_v14 = vsub.f32 %v403_v23, %v533_v1  ;;  %v621_v37 = vsel %vm415_vm1, %v581_v35, 0.0 }
 0x186   :  { %v2238_v4 = vsub.f32 %v404_v22, %v534_v28  ;;  %v624_v15 = vsel %vm415_vm1, %v582_v58, 0.0  ;;  %v436_v53 = vpop.xlane.xlu0 %435 }
 0x187   :  { %625 = vadd.xlane.f32.xlu1 %v624_v15  ;;  %v439_v44 = vpop.xlane.xlu1 %438  ;;  %664 = vadd.xlane.f32.xlu0 %v663_v3  ;;  %v519_v38 = vmul.f32 0.03125, %v436_v53  ;;  %v597_v22 = vmul.f32 %v2242_v14, %v2242_v14 }
 0x188   :  { %v520_v57 = vmul.f32 0.03125, %v439_v44  ;;  %v598_v12 = vmul.f32 %v2238_v4, %v2238_v4 }
 0x189   :  { %v2257_v23 = vsub.f32 %v389_v36, %v519_v38  ;;  %v669_v26 = vsel %vm415_vm1, %v597_v22, 0.0 }
 0x18a   :  { %v2253_v13 = vsub.f32 %v390_v34, %v520_v57  ;;  %v672_v43 = vsel %vm415_vm1, %v598_v12, 0.0  ;;  %v484_v2 = vpop.xlane.xlu0 %483 }
 0x18b   :  { %673 = vadd.xlane.f32.xlu1 %v672_v43  ;;  %v487_v31 = vpop.xlane.xlu1 %486  ;;  %622 = vadd.xlane.f32.xlu0 %v621_v37  ;;  %v535_v7 = vmul.f32 0.03125, %v484_v2  ;;  %v583_v49 = vmul.f32 %v2257_v23, %v2257_v23 }
 0x18c   :  { %v536_v60 = vmul.f32 0.03125, %v487_v31  ;;  %v584_v63 = vmul.f32 %v2253_v13, %v2253_v13 }
 0x18d   :  { %v2270_v34 = vsub.f32 %v405_v52, %v535_v7  ;;  %v627_v3 = vsel %vm415_vm1, %v583_v49, 0.0 }
 0x18e   :  { %v2266_v27 = vsub.f32 %v406_v51, %v536_v60  ;;  %v630_v36 = vsel %vm415_vm1, %v584_v63, 0.0  ;;  %v442_v20 = vpop.xlane.xlu0 %441  ;;  %v3212_v60 = vmax.f32 %v2076_v19, 0.0 }
 0x18f   :  { %631 = vadd.xlane.f32.xlu1 %v630_v36  ;;  %v445_v55 = vpop.xlane.xlu1 %444  ;;  %670 = vadd.xlane.f32.xlu0 %v669_v26  ;;  %v521_v1 = vmul.f32 0.03125, %v442_v20  ;;  %v599_v51 = vmul.f32 %v2270_v34, %v2270_v34 }
 0x190   :  { %v522_v28 = vmul.f32 0.03125, %v445_v55  ;;  %v600_v32 = vmul.f32 %v2266_v27, %v2266_v27 }
 0x191   :  { %v2285_v52 = vsub.f32 %v391_v10, %v521_v1  ;;  %v675_v59 = vsel %vm415_vm1, %v599_v51, 0.0  ;;  %v3213_v1 = vmax.f32 %v2095_v40, 0.0 }
 0x192   :  { %v2281_v33 = vsub.f32 %v392_v9, %v522_v28  ;;  %v678_v58 = vsel %vm415_vm1, %v600_v32, 0.0  ;;  %v490_v35 = vpop.xlane.xlu0 %489  ;;  %v3210_v9 = vmax.f32 %v2070_v16, 0.0  ;;  %v3211_v16 = vmax.f32 %v2073_v18, 0.0 }
 0x193   :  { %679 = vadd.xlane.f32.xlu1 %v678_v58  ;;  %v493_v15 = vpop.xlane.xlu1 %492  ;;  %628 = vadd.xlane.f32.xlu0 %v627_v3  ;;  %v537_v53 = vmul.f32 0.03125, %v490_v35  ;;  %v585_v12 = vmul.f32 %v2285_v52, %v2285_v52  ;;  %v3214_v32 = vmax.f32 %v2098_v54, 0.0  ;;  %v3215_v54 = vmax.f32 %v2109_v41, 0.0 }
 0x194   :  { %v538_v44 = vmul.f32 0.03125, %v493_v15  ;;  %v586_v57 = vmul.f32 %v2281_v33, %v2281_v33 }
 0x195   :  { %v2298_v10 = vsub.f32 %v3210_v9, %v537_v53  ;;  %v633_v26 = vsel %vm415_vm1, %v585_v12, 0.0  ;;  %v3216_v9 = vmax.f32 %v2112_v48, 0.0 }
 0x196   :  { %v2294_v62 = vsub.f32 %v408_v17, %v538_v44  ;;  %v636_v38 = vsel %vm415_vm1, %v586_v57, 0.0  ;;  %v448_v43 = vpop.xlane.xlu0 %447 }
 0x197   :  { %637 = vadd.xlane.f32.xlu1 %v636_v38  ;;  %v451_v22 = vpop.xlane.xlu1 %450  ;;  %676 = vadd.xlane.f32.xlu0 %v675_v59  ;;  %v523_v31 = vmul.f32 0.03125, %v448_v43  ;;  %v601_v17 = vmul.f32 %v2298_v10, %v2298_v10 }
 0x198   :  { %v524_v37 = vmul.f32 0.03125, %v451_v22  ;;  %v602_v6 = vmul.f32 %v2294_v62, %v2294_v62 }
 0x199   :  { %v2313_v7 = vsub.f32 %v3212_v60, %v523_v31  ;;  %v681_v18 = vsel %vm415_vm1, %v601_v17, 0.0  ;;  %v3218_v60 = vmax.f32 %v2118_v30, 0.0  ;;  %v3219_v30 = vmax.f32 %v2137_v11, 0.0 }
 0x19a   :  { %v2309_v2 = vsub.f32 %v3211_v16, %v524_v37  ;;  %v684_v63 = vsel %vm415_vm1, %v602_v6, 0.0  ;;  %v454_v49 = vpop.xlane.xlu0 %453  ;;  %v3217_v16 = vmax.f32 %v2115_v21, 0.0 }
 0x19b   :  { %685 = vadd.xlane.f32.xlu1 %v684_v63  ;;  %v457_v36 = vpop.xlane.xlu1 %456  ;;  %634 = vadd.xlane.f32.xlu0 %v633_v26  ;;  %v525_v20 = vmul.f32 0.03125, %v454_v49  ;;  %v587_v3 = vmul.f32 %v2313_v7, %v2313_v7 }
 0x19c   :  { %v526_v55 = vmul.f32 0.03125, %v457_v36  ;;  %v588_v28 = vmul.f32 %v2309_v2, %v2309_v2 }
 0x19d   :  { %v2326_v51 = vsub.f32 %v3214_v32, %v525_v20  ;;  %v639_v22 = vsel %vm415_vm1, %v587_v3, 0.0  ;;  %v3220_v32 = vmax.f32 %v2140_v25, 0.0 }
 0x19e   :  { %v2322_v19 = vsub.f32 %v3213_v1, %v526_v55  ;;  %v642_v58 = vsel %vm415_vm1, %v588_v28, 0.0  ;;  %v460_v35 = vpop.xlane.xlu0 %459 }
 0x19f   :  { %643 = vadd.xlane.f32.xlu1 %v642_v58  ;;  %v463_v15 = vpop.xlane.xlu1 %462  ;;  %682 = vadd.xlane.f32.xlu0 %v681_v18  ;;  %v527_v53 = vmul.f32 0.03125, %v460_v35  ;;  %v589_v57 = vmul.f32 %v2326_v51, %v2326_v51 }
 0x1a0   :  { %v528_v44 = vmul.f32 0.03125, %v463_v15  ;;  %v590_v40 = vmul.f32 %v2322_v19, %v2322_v19 }
 0x1a1   :  { %v2341_v38 = vsub.f32 %v3216_v9, %v527_v53  ;;  %v645_v41 = vsel %vm415_vm1, %v589_v57, 0.0 }
 0x1a2   :  { %v2337_v59 = vsub.f32 %v3215_v54, %v528_v44  ;;  %v648_v12 = vsel %vm415_vm1, %v590_v40, 0.0  ;;  %v496_v37 = vpop.xlane.xlu0 %495  ;;  %v3221_v54 = vmax.f32 %v2151_v47, 0.0 }
 0x1a3   :  { %649 = vadd.xlane.f32.xlu1 %v648_v12  ;;  %v499_v43 = vpop.xlane.xlu1 %498  ;;  %640 = vadd.xlane.f32.xlu0 %v639_v22  ;;  %v539_v6 = vmul.f32 0.03125, %v496_v37  ;;  %v591_v36 = vmul.f32 %v2341_v38, %v2341_v38 }
 0x1a4   :  { %v540_v31 = vmul.f32 0.03125, %v499_v43  ;;  %v592_v17 = vmul.f32 %v2337_v59, %v2337_v59 }
 0x1a5   :  { %v2354_v63 = vsub.f32 %v3218_v60, %v539_v6  ;;  %v651_v15 = vsel %vm415_vm1, %v591_v36, 0.0 }
 0x1a6   :  { %v2350_v48 = vsub.f32 %v3217_v16, %v540_v31  ;;  %v654_v26 = vsel %vm415_vm1, %v592_v17, 0.0  ;;  %v502_v55 = vpop.xlane.xlu0 %501 }
 0x1a7   :  { %655 = vadd.xlane.f32.xlu1 %v654_v26  ;;  %v505_v49 = vpop.xlane.xlu1 %504  ;;  %646 = vadd.xlane.f32.xlu0 %v645_v41  ;;  %v541_v28 = vmul.f32 0.03125, %v502_v55  ;;  %v603_v18 = vmul.f32 %v2354_v63, %v2354_v63 }
 0x1a8   :  { %v542_v20 = vmul.f32 0.03125, %v505_v49  ;;  %v604_v21 = vmul.f32 %v2350_v48, %v2350_v48 }
 0x1a9   :  { %v2369_v58 = vsub.f32 %v3220_v32, %v541_v28  ;;  %v687_v11 = vsel %vm415_vm1, %v603_v18, 0.0 }
 0x1aa   :  { %v2365_v1 = vsub.f32 %v3219_v30, %v542_v20  ;;  %v690_v3 = vsel %vm415_vm1, %v604_v21, 0.0  ;;  %v508_v44 = vpop.xlane.xlu0 %507 }
 0x1ab   :  { %691 = vadd.xlane.f32.xlu1 %v690_v3  ;;  %v511_v35 = vpop.xlane.xlu1 %510  ;;  %652 = vadd.xlane.f32.xlu0 %v651_v15  ;;  %v543_v40 = vmul.f32 0.03125, %v508_v44  ;;  %v605_v22 = vmul.f32 %v2369_v58, %v2369_v58 }
 0x1ac   :  { %v544_v53 = vmul.f32 0.03125, %v511_v35  ;;  %v606_v57 = vmul.f32 %v2365_v1, %v2365_v1 }
 0x1ad   :  { %v2382_v9 = vsub.f32 %v413_v5, %v543_v40  ;;  %v693_v47 = vsel %vm415_vm1, %v605_v22, 0.0 }
 0x1ae   :  { %v2378_v25 = vsub.f32 %v3221_v54, %v544_v53  ;;  %v696_v12 = vsel %vm415_vm1, %v606_v57, 0.0 }
 0x1af   :  { %697 = vadd.xlane.f32.xlu1 %v696_v12  ;;  %688 = vadd.xlane.f32.xlu0 %v687_v11  ;;  %v607_v31 = vmul.f32 %v2382_v9, %v2382_v9 }
 0x1b0   :  { %v608_v43 = vmul.f32 %v2378_v25, %v2378_v25 }
 0x1b1   :  { %v699_v50 = vsel %vm415_vm1, %v607_v31, 0.0 }
 0x1b2   :  { %v702_v37 = vsel %vm415_vm1, %v608_v43, 0.0  ;;  %v2398_v43 = vld [vmem:[%s3195_s3] ss:$0 sm:$0xff] }
 0x1b3   :  { %703 = vadd.xlane.f32.xlu1 %v702_v37  ;;  %694 = vadd.xlane.f32.xlu0 %v693_v47 }
 0x1b7   :  { %700 = vadd.xlane.f32.xlu0 %v699_v50 }
 0x203   :  { %v614_v5 = vpop.xlane.xlu1 %613 }
 0x204   :  { %v706_v6 = vmul.f32 0.03125, %v614_v5 }
 0x206   :  { %v738_v17 = vadd.f32 1e-05, %v706_v6 }
 0x207   :  { %v662_v41 = vpop.xlane.xlu1 %661  ;;  %v611_v16 = vpop.xlane.xlu0 %610 }
 0x208   :  { %1712 = vrsqrt.f32 %v738_v17  ;;  %v722_v60 = vmul.f32 0.03125, %v662_v41  ;;  %v705_v26 = vmul.f32 0.03125, %v611_v16 }
 0x20a   :  { %v754_v36 = vadd.f32 1e-05, %v722_v60  ;;  %v737_v49 = vadd.f32 1e-05, %v705_v26  ;;  %v2405_v60 = vld [vmem:[%s3196_s4] ss:$0 sm:$0xff] }
 0x20b   :  { %v620_v55 = vpop.xlane.xlu1 %619  ;;  %v659_v20 = vpop.xlane.xlu0 %658 }
 0x20c   :  { %1714 = vrsqrt.f32 %v754_v36  ;;  %v708_v28 = vmul.f32 0.03125, %v620_v55  ;;  %v721_v21 = vmul.f32 0.03125, %v659_v20 }
 0x20d   :  { %1716 = vrsqrt.f32 %v737_v49 }
 0x20e   :  { %v740_v18 = vadd.f32 1e-05, %v708_v28  ;;  %v753_v30 = vadd.f32 1e-05, %v721_v21 }
 0x20f   :  { %v668_v32 = vpop.xlane.xlu1 %667 }
 0x210   :  { %v617_v3 = vpop.xlane.xlu0 %616  ;;  %1718 = vrsqrt.f32 %v740_v18  ;;  %v724_v15 = vmul.f32 0.03125, %v668_v32 }
 0x211   :  { %v707_v35 = vmul.f32 0.03125, %v617_v3  ;;  %1720 = vrsqrt.f32 %v753_v30 }
 0x212   :  { %v1713_v44 = vpop.eup %1712  ;;  %v756_v53 = vadd.f32 1e-05, %v724_v15 }
 0x213   :  { %v739_v40 = vadd.f32 1e-05, %v707_v35  ;;  %v802_v54 = vmul.f32 %v1713_v44, %v2176_v29 }
 0x214   :  { %v626_v57 = vpop.xlane.xlu1 %625  ;;  %v665_v11 = vpop.xlane.xlu0 %664  ;;  %1722 = vrsqrt.f32 %v756_v53 }
 0x215   :  { %v710_v12 = vmul.f32 0.03125, %v626_v57  ;;  %v723_v22 = vmul.f32 0.03125, %v665_v11  ;;  %1724 = vrsqrt.f32 %v739_v40  ;;  %v841_v17 = vmul.f32 %v2398_v43, %v802_v54 }
 0x216   :  { %v1715_v37 = vpop.eup %1714 }
 0x217   :  { %v742_v47 = vadd.f32 1e-05, %v710_v12  ;;  %v755_v31 = vadd.f32 1e-05, %v723_v22  ;;  %v1717_v50 = vpop.eup %1716  ;;  %v818_v26 = vmul.f32 %v1715_v37, %v2172_v24  ;;  %v880_v30 = vadd.f32 %v2405_v60, %v841_v17 }
 0x218   :  { %v674_v5 = vpop.xlane.xlu1 %673  ;;  %v623_v6 = vpop.xlane.xlu0 %622  ;;  %v801_v16 = vmul.f32 %v1717_v50, %v2186_v39 }
 0x219   :  { %1726 = vrsqrt.f32 %v742_v47  ;;  %v726_v41 = vmul.f32 0.03125, %v674_v5  ;;  %v709_v29 = vmul.f32 0.03125, %v623_v6  ;;  %v857_v35 = vmul.f32 %v2398_v43, %v818_v26 }
 0x21a   :  { %1728 = vrsqrt.f32 %v755_v31  ;;  %v1719_v36 = vpop.eup %1718  ;;  %v840_v20 = vmul.f32 %v2398_v43, %v801_v16 }
 0x21b   :  { %v758_v49 = vadd.f32 1e-05, %v726_v41  ;;  %v741_v55 = vadd.f32 1e-05, %v709_v29  ;;  %v1721_v28 = vpop.eup %1720  ;;  %v804_v39 = vmul.f32 %v1719_v36, %v2182_v0  ;;  %v896_v50 = vadd.f32 %v2405_v60, %v857_v35 }
 0x21c   :  { %v632_v21 = vpop.xlane.xlu1 %631  ;;  %v671_v18 = vpop.xlane.xlu0 %670  ;;  %v879_v15 = vadd.f32 %v2405_v60, %v840_v20  ;;  %v817_v24 = vmul.f32 %v1721_v28, %v2201_v45 }
 0x21d   :  { %1730 = vrsqrt.f32 %v758_v49  ;;  %v712_v32 = vmul.f32 0.03125, %v632_v21  ;;  %v725_v3 = vmul.f32 0.03125, %v671_v18  ;;  %v843_v0 = vmul.f32 %v2398_v43, %v804_v39 }
 0x21e   :  { %1732 = vrsqrt.f32 %v741_v55  ;;  %v1723_v44 = vpop.eup %1722  ;;  %v911_v57 = vpack.c.bf16 %v880_v30, %v879_v15  ;;  %v856_v22 = vmul.f32 %v2398_v43, %v817_v24 }
 0x21f   :  { %v744_v53 = vadd.f32 1e-05, %v712_v32  ;;  %v757_v40 = vadd.f32 1e-05, %v725_v3  ;;  %v1725_v11 = vpop.eup %1724  ;;  %v820_v5 = vmul.f32 %v1723_v44, %v2197_v42  ;;  %v882_v55 = vadd.f32 %v2405_v60, %v843_v0 }
 0x220   :  { %v680_v54 = vpop.xlane.xlu1 %679  ;;  %v629_v12 = vpop.xlane.xlu0 %628  ;;  %927 = vxpose.xlu0.c.b16.start [1/8] (narrow) %v911_v57, 32  ;;  %v803_v31 = vmul.f32 %v1725_v11, %v2210_v46  ;;  %v895_v45 = vadd.f32 %v2405_v60, %v856_v22 }
 0x221   :  { %1734 = vrsqrt.f32 %v744_v53  ;;  %v728_v37 = vmul.f32 0.03125, %v680_v54  ;;  %v711_v47 = vmul.f32 0.03125, %v629_v12  ;;  %v859_v18 = vmul.f32 %v2398_v43, %v820_v5 }
 0x222   :  { %1736 = vrsqrt.f32 %v757_v40  ;;  %v842_v29 = vmul.f32 %v2398_v43, %v803_v31  ;;  %v919_v36 = vpack.c.bf16 %v896_v50, %v895_v45 }
 0x223   :  { %v1727_v6 = vpop.eup %1726  ;;  %v760_v17 = vadd.f32 1e-05, %v728_v37  ;;  %v743_v41 = vadd.f32 1e-05, %v711_v47  ;;  %v898_v11 = vadd.f32 %v2405_v60, %v859_v18 }
 0x224   :  { %v1729_v16 = vpop.eup %1728  ;;  %v638_v26 = vpop.xlane.xlu1 %637  ;;  %v806_v46 = vmul.f32 %v1727_v6, %v2225_v61  ;;  %v881_v21 = vadd.f32 %v2405_v60, %v842_v29  ;;  %1238 = vxpose.xlu1.c.b16.start [1/8] (narrow) %v919_v36, 32 }
 0x225   :  { %v677_v49 = vpop.xlane.xlu0 %676  ;;  %1738 = vrsqrt.f32 %v760_v17  ;;  %v714_v20 = vmul.f32 0.03125, %v638_v26  ;;  %v819_v42 = vmul.f32 %v1729_v16, %v2214_v56 }
 0x226   :  { %v727_v28 = vmul.f32 0.03125, %v677_v49  ;;  %1740 = vrsqrt.f32 %v743_v41  ;;  %v912_v3 = vpack.c.bf16 %v882_v55, %v881_v21  ;;  %v845_v44 = vmul.f32 %v2398_v43, %v806_v46 }
 0x227   :  { %v1731_v30 = vpop.eup %1730  ;;  %v746_v39 = vadd.f32 1e-05, %v714_v20  ;;  %v858_v61 = vmul.f32 %v2398_v43, %v819_v42 }
 0x228   :  { %v759_v32 = vadd.f32 1e-05, %v727_v28  ;;  %v1733_v15 = vpop.eup %1732  ;;  %v686_v24 = vpop.xlane.xlu1 %685  ;;  %928 = vxpose.xlu0.c.b16.cont [2/8] (narrow) %v912_v3, 32  ;;  %v822_v54 = vmul.f32 %v1731_v30, %v2238_v4  ;;  %v884_v5 = vadd.f32 %v2405_v60, %v845_v44 }
 0x229   :  { %v635_v35 = vpop.xlane.xlu0 %634  ;;  %1742 = vrsqrt.f32 %v746_v39  ;;  %v730_v53 = vmul.f32 0.03125, %v686_v24  ;;  %v805_v57 = vmul.f32 %v1733_v15, %v2229_v8  ;;  %v897_v56 = vadd.f32 %v2405_v60, %v858_v61 }
 0x22a   :  { %v713_v40 = vmul.f32 0.03125, %v635_v35  ;;  %1744 = vrsqrt.f32 %v759_v32  ;;  %v861_v29 = vmul.f32 %v2398_v43, %v822_v54 }
 0x22b   :  { %v1735_v12 = vpop.eup %1734  ;;  %v762_v22 = vadd.f32 1e-05, %v730_v53  ;;  %v844_v37 = vmul.f32 %v2398_v43, %v805_v57  ;;  %v920_v45 = vpack.c.bf16 %v898_v11, %v897_v56 }
 0x22c   :  { %v745_v0 = vadd.f32 1e-05, %v713_v40  ;;  %v1737_v47 = vpop.eup %1736  ;;  %v644_v31 = vpop.xlane.xlu1 %643  ;;  %v808_v8 = vmul.f32 %v1735_v12, %v2253_v13  ;;  %v900_v30 = vadd.f32 %v2405_v60, %v861_v29 }
 0x22d   :  { %v683_v50 = vpop.xlane.xlu0 %682  ;;  %1746 = vrsqrt.f32 %v762_v22  ;;  %v716_v6 = vmul.f32 0.03125, %v644_v31  ;;  %v883_v41 = vadd.f32 %v2405_v60, %v844_v37  ;;  %1239 = vxpose.xlu1.c.b16.cont [2/8] (narrow) %v920_v45, 32  ;;  %v821_v4 = vmul.f32 %v1737_v47, %v2242_v14 }
 0x22e   :  { %v729_v17 = vmul.f32 0.03125, %v683_v50  ;;  %1748 = vrsqrt.f32 %v745_v0  ;;  %v847_v28 = vmul.f32 %v2398_v43, %v808_v8 }
 0x22f   :  { %v1739_v16 = vpop.eup %1738  ;;  %v748_v26 = vadd.f32 1e-05, %v716_v6  ;;  %v913_v49 = vpack.c.bf16 %v884_v5, %v883_v41  ;;  %v860_v13 = vmul.f32 %v2398_v43, %v821_v4 }
 0x230   :  { %v761_v36 = vadd.f32 1e-05, %v729_v17  ;;  %v1741_v55 = vpop.eup %1740  ;;  %v650_v46 = vpop.xlane.xlu1 %649  ;;  %v824_v39 = vmul.f32 %v1739_v16, %v2266_v27  ;;  %v886_v40 = vadd.f32 %v2405_v60, %v847_v28 }
 0x231   :  { %v641_v20 = vpop.xlane.xlu0 %640  ;;  %1750 = vrsqrt.f32 %v748_v26  ;;  %v718_v21 = vmul.f32 0.03125, %v650_v46  ;;  %929 = vxpose.xlu0.c.b16.cont [3/8] (narrow) %v913_v49, 32  ;;  %v807_v18 = vmul.f32 %v1741_v55, %v2257_v23  ;;  %v899_v14 = vadd.f32 %v2405_v60, %v860_v13 }
 0x232   :  { %v715_v42 = vmul.f32 0.03125, %v641_v20  ;;  %1752 = vrsqrt.f32 %v761_v36  ;;  %v863_v54 = vmul.f32 %v2398_v43, %v824_v39 }
 0x233   :  { %v1743_v32 = vpop.eup %1742  ;;  %v750_v3 = vadd.f32 1e-05, %v718_v21  ;;  %v846_v24 = vmul.f32 %v2398_v43, %v807_v18  ;;  %v921_v44 = vpack.c.bf16 %v900_v30, %v899_v14 }
 0x234   :  { %v747_v15 = vadd.f32 1e-05, %v715_v42  ;;  %v1745_v35 = vpop.eup %1744  ;;  %v656_v61 = vpop.xlane.xlu1 %655  ;;  %v810_v23 = vmul.f32 %v1743_v32, %v2281_v33  ;;  %v902_v17 = vadd.f32 %v2405_v60, %v863_v54 }
 0x235   :  { %v647_v53 = vpop.xlane.xlu0 %646  ;;  %1754 = vrsqrt.f32 %v750_v3  ;;  %v720_v57 = vmul.f32 0.03125, %v656_v61  ;;  %v885_v11 = vadd.f32 %v2405_v60, %v846_v24  ;;  %1240 = vxpose.xlu1.c.b16.cont [3/8] (narrow) %v921_v44, 32  ;;  %v823_v27 = vmul.f32 %v1745_v35, %v2270_v34 }
 0x236   :  { %v717_v56 = vmul.f32 0.03125, %v647_v53  ;;  %1756 = vrsqrt.f32 %v747_v15  ;;  %v849_v50 = vmul.f32 %v2398_v43, %v810_v23 }
 0x237   :  { %v1747_v12 = vpop.eup %1746  ;;  %v752_v22 = vadd.f32 1e-05, %v720_v57  ;;  %v914_v37 = vpack.c.bf16 %v886_v40, %v885_v11  ;;  %v862_v33 = vmul.f32 %v2398_v43, %v823_v27 }
 0x238   :  { %v749_v0 = vadd.f32 1e-05, %v717_v56  ;;  %v1749_v47 = vpop.eup %1748  ;;  %v692_v31 = vpop.xlane.xlu1 %691  ;;  %v826_v41 = vmul.f32 %v1747_v12, %v2294_v62  ;;  %v888_v20 = vadd.f32 %v2405_v60, %v849_v50 }
 0x239   :  { %v653_v45 = vpop.xlane.xlu0 %652  ;;  %1758 = vrsqrt.f32 %v752_v22  ;;  %v732_v5 = vmul.f32 0.03125, %v692_v31  ;;  %930 = vxpose.xlu0.c.b16.cont [4/8] (narrow) %v914_v37, 32  ;;  %v809_v6 = vmul.f32 %v1749_v47, %v2285_v52  ;;  %v901_v34 = vadd.f32 %v2405_v60, %v862_v33 }
 0x23a   :  { %v719_v8 = vmul.f32 0.03125, %v653_v45  ;;  %1760 = vrsqrt.f32 %v749_v0  ;;  %v865_v42 = vmul.f32 %v2398_v43, %v826_v41 }
 0x23b   :  { %v1751_v4 = vpop.eup %1750  ;;  %v764_v29 = vadd.f32 1e-05, %v732_v5  ;;  %v848_v26 = vmul.f32 %v2398_v43, %v809_v6  ;;  %v922_v55 = vpack.c.bf16 %v902_v17, %v901_v34 }
 0x23c   :  { %v751_v16 = vadd.f32 1e-05, %v719_v8  ;;  %v1753_v36 = vpop.eup %1752  ;;  %v698_v49 = vpop.xlane.xlu1 %697  ;;  %v812_v52 = vmul.f32 %v1751_v4, %v2309_v2  ;;  %v904_v40 = vadd.f32 %v2405_v60, %v865_v42 }
 0x23d   :  { %v689_v46 = vpop.xlane.xlu0 %688  ;;  %1762 = vrsqrt.f32 %v764_v29  ;;  %v734_v13 = vmul.f32 0.03125, %v698_v49  ;;  %v887_v21 = vadd.f32 %v2405_v60, %v848_v26  ;;  %1241 = vxpose.xlu1.c.b16.cont [4/8] (narrow) %v922_v55, 32  ;;  %v825_v62 = vmul.f32 %v1753_v36, %v2298_v10 }
 0x23e   :  { %v731_v28 = vmul.f32 0.03125, %v689_v46  ;;  %1764 = vrsqrt.f32 %v751_v16  ;;  %v851_v24 = vmul.f32 %v2398_v43, %v812_v52 }
 0x23f   :  { %v1755_v18 = vpop.eup %1754  ;;  %v766_v14 = vadd.f32 1e-05, %v734_v13  ;;  %v915_v39 = vpack.c.bf16 %v888_v20, %v887_v21  ;;  %v864_v2 = vmul.f32 %v2398_v43, %v825_v62 }
 0x240   :  { %v763_v30 = vadd.f32 1e-05, %v731_v28  ;;  %v1757_v32 = vpop.eup %1756  ;;  %v704_v3 = vpop.xlane.xlu1 %703  ;;  %v814_v35 = vmul.f32 %v1755_v18, %v2322_v19  ;;  %v890_v19 = vadd.f32 %v2405_v60, %v851_v24 }
 0x241   :  { %v695_v15 = vpop.xlane.xlu0 %694  ;;  %1766 = vrsqrt.f32 %v766_v14  ;;  %v736_v61 = vmul.f32 0.03125, %v704_v3  ;;  %931 = vxpose.xlu0.c.b16.cont [5/8] (narrow) %v915_v39, 32  ;;  %v811_v10 = vmul.f32 %v1757_v32, %v2313_v7  ;;  %v903_v53 = vadd.f32 %v2405_v60, %v864_v2 }
 0x242   :  { %v733_v44 = vmul.f32 0.03125, %v695_v15  ;;  %1768 = vrsqrt.f32 %v763_v30  ;;  %v853_v22 = vmul.f32 %v2398_v43, %v814_v35  ;;  %v1776_v2 = vmov 1966171168  }
 0x243   :  { %v1759_v23 = vpop.eup %1758  ;;  %v768_v57 = vadd.f32 1e-05, %v736_v61  ;;  %v850_v11 = vmul.f32 %v2398_v43, %v811_v10  ;;  %v923_v54 = vpack.c.bf16 %v904_v40, %v903_v53  ;;  %v947_v24 = vunpack.c.l.s4 %v1776_v2 }
 0x244   :  { %v765_v56 = vadd.f32 1e-05, %v733_v44  ;;  %v1761_v27 = vpop.eup %1760  ;;  %v816_v0 = vmul.f32 %v1759_v23, %v2337_v59  ;;  %v892_v8 = vadd.f32 %v2405_v60, %v853_v22 }
 0x245   :  { %v701_v12 = vpop.xlane.xlu0 %700  ;;  %1770 = vrsqrt.f32 %v768_v57  ;;  %v889_v37 = vadd.f32 %v2405_v60, %v850_v11  ;;  %v813_v47 = vmul.f32 %v1761_v27, %v2326_v51  ;;  %1242 = vxpose.xlu1.c.b16.cont [5/8] (narrow) %v923_v54, 32  ;;  %v948_v35 = vunpack.c.0.s8 %v947_v24  ;;  %v1184_v24 = vld [vmem:[%s3197_s5 + $0xe] sm:$0x1] }
 0x246   :  { %v735_v7 = vmul.f32 0.03125, %v701_v12  ;;  %1772 = vrsqrt.f32 %v765_v56  ;;  %v855_v6 = vmul.f32 %v2398_v43, %v816_v0 }
 0x247   :  { %v1763_v31 = vpop.eup %1762  ;;  %v916_v33 = vpack.c.bf16 %v890_v19, %v889_v37  ;;  %v852_v50 = vmul.f32 %v2398_v43, %v813_v47 }
 0x248   :  { %v767_v45 = vadd.f32 1e-05, %v735_v7  ;;  %v1765_v5 = vpop.eup %1764  ;;  %v828_v51 = vmul.f32 %v1763_v31, %v2350_v48  ;;  %v894_v16 = vadd.f32 %v2405_v60, %v855_v6  ;;  %v1142_v6 = vld [vmem:[%s3197_s5] sm:$0x1] }
 0x249   :  { %932 = vxpose.xlu0.c.b16.cont [6/8] (narrow) %v916_v33, 32  ;;  %v891_v59 = vadd.f32 %v2405_v60, %v852_v50  ;;  %v815_v34 = vmul.f32 %v1765_v5, %v2341_v38 }
 0x24a   :  { %1774 = vrsqrt.f32 %v767_v45  ;;  %v867_v49 = vmul.f32 %v2398_v43, %v828_v51 }
 0x24b   :  { %v1767_v17 = vpop.eup %1766  ;;  %v917_v41 = vpack.c.bf16 %v892_v8, %v891_v59  ;;  %v854_v4 = vmul.f32 %v2398_v43, %v815_v34  ;;  %v1145_v59 = vld [vmem:[%s3197_s5 + $0x1] sm:$0x1] }
 0x24c   :  { %v1769_v29 = vpop.eup %1768  ;;  %v830_v55 = vmul.f32 %v1767_v17, %v2365_v1  ;;  %v906_v28 = vadd.f32 %v2405_v60, %v867_v49 }
 0x24d   :  { %933 = vxpose.xlu0.c.b16.cont [7/8] (narrow) %v917_v41, 32  ;;  %v893_v26 = vadd.f32 %v2405_v60, %v854_v4  ;;  %v827_v36 = vmul.f32 %v1769_v29, %v2354_v63  ;;  %v1148_v4 = vld [vmem:[%s3197_s5 + $0x2] sm:$0x1]  ;;  %v1151_v29 = vld [vmem:[%s3197_s5 + $0x3] sm:$0x1] }
 0x24e   :  { %v869_v63 = vmul.f32 %v2398_v43, %v830_v55 }
 0x24f   :  { %v1771_v46 = vpop.eup %1770  ;;  %v918_v38 = vpack.c.bf16 %v894_v16, %v893_v26  ;;  %v866_v48 = vmul.f32 %v2398_v43, %v827_v36  ;;  %v1154_v16 = vld [vmem:[%s3197_s5 + $0x4] sm:$0x1] }
 0x250   :  { %v1773_v20 = vpop.eup %1772  ;;  %v832_v52 = vmul.f32 %v1771_v46, %v2378_v25  ;;  %v908_v30 = vadd.f32 %v2405_v60, %v869_v63  ;;  %v1157_v46 = vld [vmem:[%s3197_s5 + $0x5] sm:$0x1]  ;;  %v1169_v63 = vld [vmem:[%s3197_s5 + $0x9] sm:$0x1] }
 0x251   :  { %934 = vxpose.xlu0.c.b16.end [8/8] (narrow) %v918_v38, 32  ;;  %v905_v13 = vadd.f32 %v2405_v60, %v866_v48  ;;  %v829_v21 = vmul.f32 %v1773_v20, %v2369_v58  ;;  %v1160_v38 = vld [vmem:[%s3197_s5 + $0x6] sm:$0x1]  ;;  %v1163_v48 = vld [vmem:[%s3197_s5 + $0x7] sm:$0x1] }
 0x252   :  { %v871_v14 = vmul.f32 %v2398_v43, %v832_v52 }
 0x253   :  { %v924_v42 = vpack.c.bf16 %v906_v28, %v905_v13  ;;  %v868_v1 = vmul.f32 %v2398_v43, %v829_v21  ;;  %v1166_v21 = vld [vmem:[%s3197_s5 + $0x8] sm:$0x1] }
 0x254   :  { %v1775_v62 = vpop.eup %1774  ;;  %v910_v3 = vadd.f32 %v2405_v60, %v871_v14 }
 0x255   :  { %v831_v18 = vmul.f32 %v1775_v62, %v2382_v9  ;;  %1243 = vxpose.xlu1.c.b16.cont [6/8] (narrow) %v924_v42, 32  ;;  %v907_v25 = vadd.f32 %v2405_v60, %v868_v1  ;;  %v949_v9 = vlaneseq  ;;  %v1172_v62 = vld [vmem:[%s3197_s5 + $0xa] sm:$0x1] }
 0x257   :  { %v870_v39 = vmul.f32 %v2398_v43, %v831_v18  ;;  %v925_v32 = vpack.c.bf16 %v908_v30, %v907_v25  ;;  %v950_v61 = vshrl.u32 %v949_v9, 7  ;;  %v1175_v30 = vld [vmem:[%s3197_s5 + $0xb] sm:$0x1]  ;;  %v1187_v9 = vld [vmem:[%s3197_s5 + $0xf] sm:$0x1] }
 0x259   :  { %v909_v58 = vadd.f32 %v2405_v60, %v870_v39  ;;  %1244 = vxpose.xlu1.c.b16.cont [7/8] (narrow) %v925_v32, 32  ;;  %v2500_v44 = vsub.s32 %v948_v35, %v950_v61  ;;  %v1178_v39 = vld [vmem:[%s3197_s5 + $0xc] sm:$0x1]  ;;  %v1181_v32 = vld [vmem:[%s3197_s5 + $0xd] sm:$0x1] }
 0x25b   :  { %v926_v15 = vpack.c.bf16 %v910_v3, %v909_v58 }
 0x25d   :  { %1245 = vxpose.xlu1.c.b16.end [8/8] (narrow) %v926_v15, 32 }
 0x29b   :  { %v935_v10 = vpop.trf.xlu0 }
 0x29c   :  { %v945_v53 = vcombine.high %v935_v10, %v935_v10  ;;  %v952_v40 = vrot.slane %v935_v10, %v2500_v44 }
 0x29e   :  { %v959_v43 = vrot.slane %v945_v53, %v2500_v44  ;;  %v960_v23 = vcombine.high %v952_v40, %v952_v40  ;;  %v968_v57 = vrot.slane %v952_v40, %v2500_v44 }
 0x29f   :  { %v2505_v60 = vpop.trf.xlu0 }
 0x2a0   :  { %v961_v56 = vcombine.high %v959_v43, %v959_v43  ;;  %v2508_v11 = vrot.slane %v959_v43, %v2500_v44  ;;  %v982_v27 = vrot.slane %v960_v23, %v2500_v44  ;;  %v990_v54 = vcombine.high %v968_v57, %v968_v57 }
 0x2a1   :  { %v1044_v12 = vunpack.i.h.s16 %v968_v57  ;;  %v1587_v19 = vpack.i.b16 %v968_v57, %v968_v57  ;;  %v994_v22 = vcombine.high %v2505_v60, %v2505_v60  ;;  %v2515_v0 = vrot.slane %v2505_v60, %v2500_v44 }
 0x2a2   :  { %v2518_v7 = vrot.slane %v961_v56, %v2500_v44  ;;  %v2522_v37 = vcombine.high %v2508_v11, %v2508_v11  ;;  %v992_v47 = vcombine.high %v982_v27, %v982_v27  ;;  %v1046_v31 = vunpack.i.h.s16 %v982_v27 }
 0x2a3   :  { %v1048_v45 = vunpack.i.h.s16 %v990_v54  ;;  %v1052_v33 = vunpack.i.h.s16 %v2508_v11  ;;  %v1076_v50 = vpack.i.b16 %v1044_v12, %v1044_v12  ;;  %v1588_v5 = vpack.i.b16 %v982_v27, %v982_v27 }
 0x2a4   :  { %v2539_v34 = vcombine.high %v2518_v7, %v2518_v7  ;;  %v1050_v51 = vunpack.i.h.s16 %v992_v47  ;;  %v1054_v17 = vunpack.i.h.s16 %v2518_v7  ;;  %v1056_v41 = vunpack.i.h.s16 %v2522_v37 }
 0x2a5   :  { %v1078_v26 = vpack.i.b16 %v1046_v31, %v1046_v31  ;;  %v1589_v36 = vpack.i.b16 %v990_v54, %v990_v54  ;;  %v1080_v49 = vpack.i.b16 %v1048_v45, %v1048_v45  ;;  %v1590_v55 = vpack.i.b16 %v992_v47, %v992_v47 }
 0x2a6   :  { %v1058_v20 = vunpack.i.h.s16 %v2539_v34  ;;  %v1082_v52 = vpack.i.b16 %v1050_v51, %v1050_v51  ;;  %v1591_v13 = vpack.i.b16 %v2508_v11, %v2508_v11  ;;  %v1084_v28 = vpack.i.b16 %v1052_v33, %v1052_v33 }
 0x2a7   :  { %v1592_v42 = vpack.i.b16 %v2518_v7, %v2518_v7  ;;  %v1086_v1 = vpack.i.b16 %v1054_v17, %v1054_v17  ;;  %v1593_v18 = vpack.i.b16 %v2522_v37, %v2522_v37  ;;  %v1088_v14 = vpack.i.b16 %v1056_v41, %v1056_v41  ;;  %v1246_v25 = vpop.trf.xlu1 }
 0x2a8   :  { %v1594_v58 = vpack.i.b16 %v2539_v34, %v2539_v34  ;;  %v1090_v3 = vpack.i.b16 %v1058_v20, %v1058_v20  ;;  %v1143_v15 = vsel %vm2527_vm4, %v1587_v19, %v1142_v6  ;;  %v1146_v2 = vsel %vm2527_vm4, %v1076_v50, %v1145_v59 }
 0x2a9   :  { %1144 = vst [vmem:[%s3197_s5] sm:$0x1] %v1143_v15  ;;  %1147 = vst [vmem:[%s3197_s5 + $0x1] sm:$0x1] %v1146_v2  ;;  %v1149_v35 = vsel %vm2527_vm4, %v1588_v5, %v1148_v4  ;;  %v1152_v61 = vsel %vm2527_vm4, %v1078_v26, %v1151_v29  ;;  %v1155_v10 = vsel %vm2527_vm4, %v1589_v36, %v1154_v16  ;;  %v1217_v15 = vld [vmem:[%s3197_s5 + $0x19] sm:$0x1] }
 0x2aa   :  { %v1158_v53 = vsel %vm2527_vm4, %v1080_v49, %v1157_v46  ;;  %1150 = vst [vmem:[%s3197_s5 + $0x2] sm:$0x1] %v1149_v35  ;;  %1153 = vst [vmem:[%s3197_s5 + $0x3] sm:$0x1] %v1152_v61  ;;  %v1161_v40 = vsel %vm2527_vm4, %v1590_v55, %v1160_v38  ;;  %v1164_v43 = vsel %vm2527_vm4, %v1082_v52, %v1163_v48  ;;  %v1190_v55 = vld [vmem:[%s3197_s5 + $0x10] sm:$0x1] }
 0x2ab   :  { %1156 = vst [vmem:[%s3197_s5 + $0x4] sm:$0x1] %v1155_v10  ;;  %1159 = vst [vmem:[%s3197_s5 + $0x5] sm:$0x1] %v1158_v53  ;;  %v1167_v23 = vsel %vm2527_vm4, %v1591_v13, %v1166_v21  ;;  %v1170_v57 = vsel %vm2527_vm4, %v1084_v28, %v1169_v63  ;;  %v1173_v56 = vsel %vm2527_vm4, %v1592_v42, %v1172_v62  ;;  %v2652_v12 = vpop.trf.xlu1  ;;  %v1193_v46 = vld [vmem:[%s3197_s5 + $0x11] sm:$0x1] }
 0x2ac   :  { %1162 = vst [vmem:[%s3197_s5 + $0x6] sm:$0x1] %v1161_v40  ;;  %1165 = vst [vmem:[%s3197_s5 + $0x7] sm:$0x1] %v1164_v43  ;;  %v1176_v11 = vsel %vm2527_vm4, %v1086_v1, %v1175_v30  ;;  %v1179_v27 = vsel %vm2527_vm4, %v1593_v18, %v1178_v39  ;;  %v1182_v54 = vsel %vm2527_vm4, %v1088_v14, %v1181_v32  ;;  %v1196_v13 = vld [vmem:[%s3197_s5 + $0x12] sm:$0x1] }
 0x2ad   :  { %1168 = vst [vmem:[%s3197_s5 + $0x8] sm:$0x1] %v1167_v23  ;;  %1171 = vst [vmem:[%s3197_s5 + $0x9] sm:$0x1] %v1170_v57  ;;  %v1185_v19 = vsel %vm2527_vm4, %v1594_v58, %v1184_v24  ;;  %v1188_v7 = vsel %vm2527_vm4, %v1090_v3, %v1187_v9  ;;  %v1008_v37 = vrot.slane %v994_v22, %v2500_v44  ;;  %v1199_v28 = vld [vmem:[%s3197_s5 + $0x13] sm:$0x1] }
 0x2ae   :  { %1174 = vst [vmem:[%s3197_s5 + $0xa] sm:$0x1] %v1173_v56  ;;  %1177 = vst [vmem:[%s3197_s5 + $0xb] sm:$0x1] %v1176_v11  ;;  %v1009_v47 = vcombine.high %v2515_v0, %v2515_v0  ;;  %v1017_v31 = vrot.slane %v2515_v0, %v2500_v44  ;;  %v1256_v45 = vcombine.high %v1246_v25, %v1246_v25  ;;  %v1202_v21 = vld [vmem:[%s3197_s5 + $0x14] sm:$0x1] }
 0x2af   :  { %1180 = vst [vmem:[%s3197_s5 + $0xc] sm:$0x1] %v1179_v27  ;;  %1183 = vst [vmem:[%s3197_s5 + $0xd] sm:$0x1] %v1182_v54  ;;  %v2685_v33 = vrot.slane %v1246_v25, %v2500_v44  ;;  %v1305_v60 = vcombine.high %v2652_v12, %v2652_v12  ;;  %v1010_v22 = vcombine.high %v1008_v37, %v1008_v37  ;;  %v1205_v18 = vld [vmem:[%s3197_s5 + $0x15] sm:$0x1] }
 0x2b0   :  { %1186 = vst [vmem:[%s3197_s5 + $0xe] sm:$0x1] %v1185_v19  ;;  %1189 = vst [vmem:[%s3197_s5 + $0xf] sm:$0x1] %v1188_v7  ;;  %v2690_v50 = vrot.slane %v1008_v37, %v2500_v44  ;;  %v1031_v5 = vrot.slane %v1009_v47, %v2500_v44  ;;  %v2695_v6 = vrot.slane %v2652_v12, %v2500_v44  ;;  %v1060_v34 = vunpack.i.h.s16 %v1017_v31  ;;  %v1208_v14 = vld [vmem:[%s3197_s5 + $0x16] sm:$0x1] }
 0x2b1   :  { %v1039_v59 = vcombine.high %v1017_v31, %v1017_v31  ;;  %v1595_v0 = vpack.i.b16 %v1017_v31, %v1017_v31  ;;  %v2698_v51 = vrot.slane %v1256_v45, %v2500_v44  ;;  %v2701_v17 = vrot.slane %v1010_v22, %v2500_v44  ;;  %v1211_v25 = vld [vmem:[%s3197_s5 + $0x17] sm:$0x1]  ;;  %v1214_v3 = vld [vmem:[%s3197_s5 + $0x18] sm:$0x1]  ;;  %v1220_v2 = vld [vmem:[%s3197_s5 + $0x1a] sm:$0x1] }
 0x2b2   :  { %v2705_v41 = vcombine.high %v2690_v50, %v2690_v50  ;;  %v1041_v4 = vcombine.high %v1031_v5, %v1031_v5  ;;  %v1062_v29 = vunpack.i.h.s16 %v1031_v5  ;;  %v1068_v26 = vunpack.i.h.s16 %v2690_v50  ;;  %v1223_v10 = vld [vmem:[%s3197_s5 + $0x1b] sm:$0x1]  ;;  %v1226_v53 = vld [vmem:[%s3197_s5 + $0x1c] sm:$0x1]  ;;  %v1229_v40 = vld [vmem:[%s3197_s5 + $0x1d] sm:$0x1] }
 0x2b3   :  { %v1064_v16 = vunpack.i.h.s16 %v1039_v59  ;;  %v1092_v36 = vpack.i.b16 %v1060_v34, %v1060_v34  ;;  %v1596_v49 = vpack.i.b16 %v1031_v5, %v1031_v5  ;;  %v1042_v38 = vcombine.high %v2701_v17, %v2701_v17  ;;  %v1232_v11 = vld [vmem:[%s3197_s5 + $0x1e] sm:$0x1]  ;;  %v1235_v27 = vld [vmem:[%s3197_s5 + $0x1f] sm:$0x1] }
 0x2b4   :  { %v1066_v48 = vunpack.i.h.s16 %v1041_v4  ;;  %v1070_v20 = vunpack.i.h.s16 %v2701_v17  ;;  %v1072_v52 = vunpack.i.h.s16 %v2705_v41  ;;  %v1094_v63 = vpack.i.b16 %v1062_v29, %v1062_v29 }
 0x2b5   :  { %v1597_v62 = vpack.i.b16 %v1039_v59, %v1039_v59  ;;  %v1096_v42 = vpack.i.b16 %v1064_v16, %v1064_v16  ;;  %v1598_v1 = vpack.i.b16 %v1041_v4, %v1041_v4  ;;  %v1074_v30 = vunpack.i.h.s16 %v1042_v38 }
 0x2b6   :  { %v1098_v39 = vpack.i.b16 %v1066_v48, %v1066_v48  ;;  %v1599_v32 = vpack.i.b16 %v2690_v50, %v2690_v50  ;;  %v1100_v58 = vpack.i.b16 %v1068_v26, %v1068_v26  ;;  %v1600_v24 = vpack.i.b16 %v2701_v17, %v2701_v17 }
 0x2b7   :  { %v1102_v9 = vpack.i.b16 %v1070_v20, %v1070_v20  ;;  %v1601_v35 = vpack.i.b16 %v2705_v41, %v2705_v41  ;;  %v1104_v61 = vpack.i.b16 %v1072_v52, %v1072_v52  ;;  %v1602_v43 = vpack.i.b16 %v1042_v38, %v1042_v38 }
 0x2b8   :  { %v1106_v23 = vpack.i.b16 %v1074_v30, %v1074_v30  ;;  %v1191_v57 = vsel %vm2527_vm4, %v1595_v0, %v1190_v55  ;;  %v1194_v56 = vsel %vm2527_vm4, %v1092_v36, %v1193_v46  ;;  %v1197_v54 = vsel %vm2527_vm4, %v1596_v49, %v1196_v13  ;;  %v1458_v30 = vld [vmem:[%s3197_s5 + $0x2] sm:$0x1] }
 0x2b9   :  { %1192 = vst [vmem:[%s3197_s5 + $0x10] sm:$0x1] %v1191_v57  ;;  %1195 = vst [vmem:[%s3197_s5 + $0x11] sm:$0x1] %v1194_v56  ;;  %v1200_v19 = vsel %vm2527_vm4, %v1094_v63, %v1199_v28  ;;  %v1203_v7 = vsel %vm2527_vm4, %v1597_v62, %v1202_v21  ;;  %v1206_v37 = vsel %vm2527_vm4, %v1096_v42, %v1205_v18  ;;  %v1452_v62 = vld [vmem:[%s3197_s5] sm:$0x1] }
 0x2ba   :  { %1198 = vst [vmem:[%s3197_s5 + $0x12] sm:$0x1] %v1197_v54  ;;  %1201 = vst [vmem:[%s3197_s5 + $0x13] sm:$0x1] %v1200_v19  ;;  %v1209_v47 = vsel %vm2527_vm4, %v1598_v1, %v1208_v14  ;;  %v1212_v31 = vsel %vm2527_vm4, %v1098_v39, %v1211_v25  ;;  %v1215_v45 = vsel %vm2527_vm4, %v1599_v32, %v1214_v3  ;;  %v1455_v25 = vld [vmem:[%s3197_s5 + $0x1] sm:$0x1] }
 0x2bb   :  { %1204 = vst [vmem:[%s3197_s5 + $0x14] sm:$0x1] %v1203_v7  ;;  %1207 = vst [vmem:[%s3197_s5 + $0x15] sm:$0x1] %v1206_v37  ;;  %v1218_v22 = vsel %vm2527_vm4, %v1100_v58, %v1217_v15  ;;  %v1221_v50 = vsel %vm2527_vm4, %v1600_v24, %v1220_v2  ;;  %v1224_v5 = vsel %vm2527_vm4, %v1102_v9, %v1223_v10  ;;  %v1461_v39 = vld [vmem:[%s3197_s5 + $0x3] sm:$0x1] }
 0x2bc   :  { %1210 = vst [vmem:[%s3197_s5 + $0x16] sm:$0x1] %v1209_v47  ;;  %1213 = vst [vmem:[%s3197_s5 + $0x17] sm:$0x1] %v1212_v31  ;;  %v1227_v59 = vsel %vm2527_vm4, %v1601_v35, %v1226_v53  ;;  %v1230_v34 = vsel %vm2527_vm4, %v1104_v61, %v1229_v40  ;;  %v1233_v0 = vsel %vm2527_vm4, %v1602_v43, %v1232_v11  ;;  %v1464_v2 = vld [vmem:[%s3197_s5 + $0x4] sm:$0x1] }
 0x2bd   :  { %1216 = vst [vmem:[%s3197_s5 + $0x18] sm:$0x1] %v1215_v45  ;;  %1219 = vst [vmem:[%s3197_s5 + $0x19] sm:$0x1] %v1218_v22  ;;  %v1236_v17 = vsel %vm2527_vm4, %v1106_v23, %v1235_v27  ;;  %v1271_v41 = vcombine.high %v2685_v33, %v2685_v33  ;;  %v1272_v4 = vcombine.high %v2698_v51, %v2698_v51  ;;  %v1467_v24 = vld [vmem:[%s3197_s5 + $0x5] sm:$0x1] }
 0x2be   :  { %1222 = vst [vmem:[%s3197_s5 + $0x1a] sm:$0x1] %v1221_v50  ;;  %1225 = vst [vmem:[%s3197_s5 + $0x1b] sm:$0x1] %v1224_v5  ;;  %v1279_v29 = vrot.slane %v2685_v33, %v2500_v44  ;;  %v2854_v8 = vrot.slane %v2698_v51, %v2500_v44  ;;  %v2860_v16 = vrot.slane %v1305_v60, %v2500_v44  ;;  %v1470_v9 = vld [vmem:[%s3197_s5 + $0x6] sm:$0x1] }
 0x2bf   :  { %1228 = vst [vmem:[%s3197_s5 + $0x1c] sm:$0x1] %v1227_v59  ;;  %1231 = vst [vmem:[%s3197_s5 + $0x1d] sm:$0x1] %v1230_v34  ;;  %v1293_v26 = vrot.slane %v1271_v41, %v2500_v44  ;;  %v2864_v36 = vrot.slane %v1272_v4, %v2500_v44  ;;  %v1320_v49 = vcombine.high %v2695_v6, %v2695_v6  ;;  %v1473_v40 = vld [vmem:[%s3197_s5 + $0x7] sm:$0x1] }
 0x2c0   :  { %1234 = vst [vmem:[%s3197_s5 + $0x1e] sm:$0x1] %v1233_v0  ;;  %1237 = vst [vmem:[%s3197_s5 + $0x1f] sm:$0x1] %v1236_v17  ;;  %v2870_v33 = vrot.slane %v2695_v6, %v2500_v44  ;;  %v1301_v51 = vcombine.high %v1279_v29, %v1279_v29  ;;  %v2874_v55 = vcombine.high %v2854_v8, %v2854_v8  ;;  %v1355_v12 = vunpack.i.h.s16 %v1279_v29  ;;  %v1476_v43 = vld [vmem:[%s3197_s5 + $0x8] sm:$0x1] }
 0x2c1   :  { %v1363_v60 = vunpack.i.h.s16 %v2854_v8  ;;  %v1303_v46 = vcombine.high %v1293_v26, %v1293_v26  ;;  %v2879_v38 = vcombine.high %v2864_v36, %v2864_v36  ;;  %v1357_v48 = vunpack.i.h.s16 %v1293_v26  ;;  %v1479_v23 = vld [vmem:[%s3197_s5 + $0x9] sm:$0x1]  ;;  %v1482_v54 = vld [vmem:[%s3197_s5 + $0xa] sm:$0x1]  ;;  %v1485_v19 = vld [vmem:[%s3197_s5 + $0xb] sm:$0x1] }
 0x2c2   :  { %v1365_v20 = vunpack.i.h.s16 %v2864_v36  ;;  %v1359_v13 = vunpack.i.h.s16 %v1301_v51  ;;  %v1367_v28 = vunpack.i.h.s16 %v2874_v55  ;;  %v1603_v21 = vpack.i.b16 %v1279_v29, %v1279_v29  ;;  %v1488_v7 = vld [vmem:[%s3197_s5 + $0xc] sm:$0x1]  ;;  %v1491_v22 = vld [vmem:[%s3197_s5 + $0xd] sm:$0x1]  ;;  %v1494_v50 = vld [vmem:[%s3197_s5 + $0xe] sm:$0x1] }
 0x2c3   :  { %v1387_v63 = vpack.i.b16 %v1355_v12, %v1355_v12  ;;  %v1361_v42 = vunpack.i.h.s16 %v1303_v46  ;;  %v1369_v1 = vunpack.i.h.s16 %v2879_v38  ;;  %v1604_v18 = vpack.i.b16 %v1293_v26, %v1293_v26  ;;  %v1497_v5 = vld [vmem:[%s3197_s5 + $0xf] sm:$0x1] }
 0x2c4   :  { %v1389_v14 = vpack.i.b16 %v1357_v48, %v1357_v48  ;;  %v1605_v32 = vpack.i.b16 %v1301_v51, %v1301_v51  ;;  %v1391_v58 = vpack.i.b16 %v1359_v13, %v1359_v13  ;;  %v1606_v3 = vpack.i.b16 %v1303_v46, %v1303_v46 }
 0x2c5   :  { %v1607_v15 = vpack.i.b16 %v2854_v8, %v2854_v8  ;;  %v1393_v35 = vpack.i.b16 %v1361_v42, %v1361_v42  ;;  %v1395_v61 = vpack.i.b16 %v1363_v60, %v1363_v60  ;;  %v1608_v10 = vpack.i.b16 %v2864_v36, %v2864_v36 }
 0x2c6   :  { %v1397_v53 = vpack.i.b16 %v1365_v20, %v1365_v20  ;;  %v1609_v57 = vpack.i.b16 %v2874_v55, %v2874_v55  ;;  %v1399_v56 = vpack.i.b16 %v1367_v28, %v1367_v28  ;;  %v1610_v11 = vpack.i.b16 %v2879_v38, %v2879_v38 }
 0x2c7   :  { %v1401_v27 = vpack.i.b16 %v1369_v1, %v1369_v1  ;;  %v1453_v37 = vsel %vm2884_vm6, %v1603_v21, %v1452_v62  ;;  %v1456_v47 = vsel %vm2884_vm6, %v1387_v63, %v1455_v25  ;;  %v1459_v31 = vsel %vm2884_vm6, %v1604_v18, %v1458_v30  ;;  %v1500_v18 = vld [vmem:[%s3197_s5 + $0x10] sm:$0x1] }
 0x2c8   :  { %v1462_v45 = vsel %vm2884_vm6, %v1389_v14, %v1461_v39  ;;  %1454 = vst [vmem:[%s3197_s5] sm:$0x1] %v1453_v37  ;;  %1457 = vst [vmem:[%s3197_s5 + $0x1] sm:$0x1] %v1456_v47  ;;  %v1465_v59 = vsel %vm2884_vm6, %v1605_v32, %v1464_v2  ;;  %v1468_v34 = vsel %vm2884_vm6, %v1391_v58, %v1467_v24  ;;  %v1371_v48 = vunpack.i.h.s16 %v2870_v33  ;;  %v1503_v14 = vld [vmem:[%s3197_s5 + $0x11] sm:$0x1] }
 0x2c9   :  { %1460 = vst [vmem:[%s3197_s5 + $0x2] sm:$0x1] %v1459_v31  ;;  %1463 = vst [vmem:[%s3197_s5 + $0x3] sm:$0x1] %v1462_v45  ;;  %v1471_v0 = vsel %vm2884_vm6, %v1606_v3, %v1470_v9  ;;  %v1474_v17 = vsel %vm2884_vm6, %v1393_v35, %v1473_v40  ;;  %v1477_v41 = vsel %vm2884_vm6, %v1607_v15, %v1476_v43  ;;  %v1506_v58 = vld [vmem:[%s3197_s5 + $0x12] sm:$0x1] }
 0x2ca   :  { %1466 = vst [vmem:[%s3197_s5 + $0x4] sm:$0x1] %v1465_v59  ;;  %1469 = vst [vmem:[%s3197_s5 + $0x5] sm:$0x1] %v1468_v34  ;;  %v1480_v4 = vsel %vm2884_vm6, %v1395_v61, %v1479_v23  ;;  %v1483_v29 = vsel %vm2884_vm6, %v1608_v10, %v1482_v54  ;;  %v1486_v8 = vsel %vm2884_vm6, %v1397_v53, %v1485_v19  ;;  %v1509_v3 = vld [vmem:[%s3197_s5 + $0x13] sm:$0x1] }
 0x2cb   :  { %1472 = vst [vmem:[%s3197_s5 + $0x6] sm:$0x1] %v1471_v0  ;;  %1475 = vst [vmem:[%s3197_s5 + $0x7] sm:$0x1] %v1474_v17  ;;  %v1489_v26 = vsel %vm2884_vm6, %v1609_v57, %v1488_v7  ;;  %v1492_v36 = vsel %vm2884_vm6, %v1399_v56, %v1491_v22  ;;  %v1495_v51 = vsel %vm2884_vm6, %v1610_v11, %v1494_v50  ;;  %v1512_v15 = vld [vmem:[%s3197_s5 + $0x14] sm:$0x1] }
 0x2cc   :  { %1478 = vst [vmem:[%s3197_s5 + $0x8] sm:$0x1] %v1477_v41  ;;  %1481 = vst [vmem:[%s3197_s5 + $0x9] sm:$0x1] %v1480_v4  ;;  %v1498_v55 = vsel %vm2884_vm6, %v1401_v27, %v1497_v5  ;;  %v1321_v12 = vcombine.high %v2860_v16, %v2860_v16  ;;  %v3030_v60 = vrot.slane %v2860_v16, %v2500_v44  ;;  %v1515_v61 = vld [vmem:[%s3197_s5 + $0x15] sm:$0x1] }
 0x2cd   :  { %1484 = vst [vmem:[%s3197_s5 + $0xa] sm:$0x1] %v1483_v29  ;;  %1487 = vst [vmem:[%s3197_s5 + $0xb] sm:$0x1] %v1486_v8  ;;  %v1342_v46 = vrot.slane %v1320_v49, %v2500_v44  ;;  %v1350_v38 = vcombine.high %v2870_v33, %v2870_v33  ;;  %v1611_v20 = vpack.i.b16 %v2870_v33, %v2870_v33  ;;  %v1518_v10 = vld [vmem:[%s3197_s5 + $0x16] sm:$0x1] }
 0x2ce   :  { %1490 = vst [vmem:[%s3197_s5 + $0xc] sm:$0x1] %v1489_v26  ;;  %1493 = vst [vmem:[%s3197_s5 + $0xd] sm:$0x1] %v1492_v36  ;;  %v3042_v13 = vrot.slane %v1321_v12, %v2500_v44  ;;  %v3046_v16 = vcombine.high %v3030_v60, %v3030_v60  ;;  %v1379_v6 = vunpack.i.h.s16 %v3030_v60  ;;  %v1403_v49 = vpack.i.b16 %v1371_v48, %v1371_v48  ;;  %v1521_v53 = vld [vmem:[%s3197_s5 + $0x17] sm:$0x1] }
 0x2cf   :  { %1496 = vst [vmem:[%s3197_s5 + $0xe] sm:$0x1] %v1495_v51  ;;  %1499 = vst [vmem:[%s3197_s5 + $0xf] sm:$0x1] %v1498_v55  ;;  %v1352_v28 = vcombine.high %v1342_v46, %v1342_v46  ;;  %v1373_v21 = vunpack.i.h.s16 %v1342_v46  ;;  %v1375_v63 = vunpack.i.h.s16 %v1350_v38  ;;  %v1612_v62 = vpack.i.b16 %v1342_v46, %v1342_v46  ;;  %v1524_v56 = vld [vmem:[%s3197_s5 + $0x18] sm:$0x1] }
 0x2d0   :  { %v3051_v42 = vcombine.high %v3042_v13, %v3042_v13  ;;  %v1381_v33 = vunpack.i.h.s16 %v3042_v13  ;;  %v1383_v44 = vunpack.i.h.s16 %v3046_v16  ;;  %v1613_v30 = vpack.i.b16 %v1350_v38, %v1350_v38  ;;  %v1527_v11 = vld [vmem:[%s3197_s5 + $0x19] sm:$0x1]  ;;  %v1530_v27 = vld [vmem:[%s3197_s5 + $0x1a] sm:$0x1]  ;;  %v1533_v47 = vld [vmem:[%s3197_s5 + $0x1b] sm:$0x1] }
 0x2d1   :  { %v1377_v1 = vunpack.i.h.s16 %v1352_v28  ;;  %v1405_v25 = vpack.i.b16 %v1373_v21, %v1373_v21  ;;  %v1407_v39 = vpack.i.b16 %v1375_v63, %v1375_v63  ;;  %v1614_v32 = vpack.i.b16 %v1352_v28, %v1352_v28  ;;  %v1536_v31 = vld [vmem:[%s3197_s5 + $0x1c] sm:$0x1]  ;;  %v1539_v45 = vld [vmem:[%s3197_s5 + $0x1d] sm:$0x1]  ;;  %v1542_v34 = vld [vmem:[%s3197_s5 + $0x1e] sm:$0x1] }
 0x2d2   :  { %v1385_v2 = vunpack.i.h.s16 %v3051_v42  ;;  %v1615_v9 = vpack.i.b16 %v3030_v60, %v3030_v60  ;;  %v1411_v35 = vpack.i.b16 %v1379_v6, %v1379_v6  ;;  %v1616_v40 = vpack.i.b16 %v3042_v13, %v3042_v13  ;;  %v1545_v0 = vld [vmem:[%s3197_s5 + $0x1f] sm:$0x1] }
 0x2d3   :  { %v1409_v24 = vpack.i.b16 %v1377_v1, %v1377_v1  ;;  %v1413_v43 = vpack.i.b16 %v1381_v33, %v1381_v33  ;;  %v1617_v23 = vpack.i.b16 %v3046_v16, %v3046_v16  ;;  %v1415_v57 = vpack.i.b16 %v1383_v44, %v1383_v44 }
 0x2d4   :  { %v1618_v54 = vpack.i.b16 %v3051_v42, %v3051_v42  ;;  %v1417_v19 = vpack.i.b16 %v1385_v2, %v1385_v2  ;;  %v1501_v7 = vsel %vm2884_vm6, %v1611_v20, %v1500_v18  ;;  %v1504_v37 = vsel %vm2884_vm6, %v1403_v49, %v1503_v14 }
 0x2d5   :  { %1502 = vst [vmem:[%s3197_s5 + $0x10] sm:$0x1] %v1501_v7  ;;  %1505 = vst [vmem:[%s3197_s5 + $0x11] sm:$0x1] %v1504_v37  ;;  %v1507_v22 = vsel %vm2884_vm6, %v1612_v62, %v1506_v58  ;;  %v1510_v50 = vsel %vm2884_vm6, %v1405_v25, %v1509_v3  ;;  %v1513_v5 = vsel %vm2884_vm6, %v1613_v30, %v1512_v15 }
 0x2d6   :  { %v1516_v59 = vsel %vm2884_vm6, %v1407_v39, %v1515_v61  ;;  %1508 = vst [vmem:[%s3197_s5 + $0x12] sm:$0x1] %v1507_v22  ;;  %1511 = vst [vmem:[%s3197_s5 + $0x13] sm:$0x1] %v1510_v50  ;;  %v1519_v17 = vsel %vm2884_vm6, %v1614_v32, %v1518_v10  ;;  %v1522_v41 = vsel %vm2884_vm6, %v1409_v24, %v1521_v53 }
 0x2d7   :  { %1514 = vst [vmem:[%s3197_s5 + $0x14] sm:$0x1] %v1513_v5  ;;  %1517 = vst [vmem:[%s3197_s5 + $0x15] sm:$0x1] %v1516_v59  ;;  %v1525_v4 = vsel %vm2884_vm6, %v1615_v9, %v1524_v56  ;;  %v1528_v29 = vsel %vm2884_vm6, %v1411_v35, %v1527_v11  ;;  %v1531_v8 = vsel %vm2884_vm6, %v1616_v40, %v1530_v27 }
 0x2d8   :  { %1520 = vst [vmem:[%s3197_s5 + $0x16] sm:$0x1] %v1519_v17  ;;  %1523 = vst [vmem:[%s3197_s5 + $0x17] sm:$0x1] %v1522_v41  ;;  %v1534_v26 = vsel %vm2884_vm6, %v1413_v43, %v1533_v47  ;;  %v1537_v36 = vsel %vm2884_vm6, %v1617_v23, %v1536_v31  ;;  %v1540_v51 = vsel %vm2884_vm6, %v1415_v57, %v1539_v45 }
 0x2d9   :  { %1526 = vst [vmem:[%s3197_s5 + $0x18] sm:$0x1] %v1525_v4  ;;  %1529 = vst [vmem:[%s3197_s5 + $0x19] sm:$0x1] %v1528_v29  ;;  %v1543_v55 = vsel %vm2884_vm6, %v1618_v54, %v1542_v34  ;;  %v1546_v12 = vsel %vm2884_vm6, %v1417_v19, %v1545_v0 }
 0x2da   :  { %1532 = vst [vmem:[%s3197_s5 + $0x1a] sm:$0x1] %v1531_v8  ;;  %1535 = vst [vmem:[%s3197_s5 + $0x1b] sm:$0x1] %v1534_v26 }
 0x2db   :  { %1538 = vst [vmem:[%s3197_s5 + $0x1c] sm:$0x1] %v1537_v36  ;;  %1541 = vst [vmem:[%s3197_s5 + $0x1d] sm:$0x1] %v1540_v51 }
 0x2dc   :  { %1544 = vst [vmem:[%s3197_s5 + $0x1e] sm:$0x1] %v1543_v55  ;;  %1547 = vst [vmem:[%s3197_s5 + $0x1f] sm:$0x1] %v1546_v12 }

// kernel: forward.5
= control target key start
LH: loop header
LB: loop body
LE: loop exit
PB: predicated region body
PF: predicated region fallthrough
CT: control target
= control target key end

     0   :  { %v26_v3 = vlaneseq  ;;  %vm309_vm0 = vcmask 1041409   ;;  %vm311_vm1 = vcmask 1042434   ;;  %vm313_vm2 = vcmask 1043459   ;;  %s2505_s0 = inlined_call_operand.vmem [shape: bf16[32,2,128], index: 0, kind: input, shape index: {}]   ;;  %s2506_s1 = inlined_call_operand.vmem [shape: f32[64,32], index: 1, kind: input, shape index: {}]   ;;  %s2507_s2 = inlined_call_operand.vmem [shape: f32[64,1], index: 2, kind: input, shape index: {}]   ;;  %s2508_s3 = inlined_call_operand.vmem [shape: f32[32,512], index: 3, kind: input, shape index: {}]   ;;  %s2509_s5 = inlined_call_operand.vmem [shape: f32[512,10], index: 5, kind: input, shape index: {}]   ;;  %s2510_s4 = inlined_call_operand.vmem [shape: f32[1,512], index: 4, kind: input, shape index: {}]   ;;  %s2511_s6 = inlined_call_operand.vmem [shape: f32[1,10], index: 6, kind: input, shape index: {}]   ;;  %s2512_s7 = inlined_call_operand.vmem [shape: f32[2,10], index: 7, kind: output, shape index: {}]  }
   0x1   :  { %v29_v0 = vld [vmem:[%s2505_s0] sm:$0x1]  ;;  %v30_v1 = vld [vmem:[%s2505_s0 + $0x1] sm:$0x1]  ;;  %v31_v2 = vld [vmem:[%s2505_s0 + $0x2] sm:$0x1] }
   0x2   :  { %v32_v4 = vld [vmem:[%s2505_s0 + $0x3] sm:$0x1]  ;;  %v33_v5 = vld [vmem:[%s2505_s0 + $0x4] sm:$0x1]  ;;  %v34_v6 = vld [vmem:[%s2505_s0 + $0x5] sm:$0x1]  ;;  %v61_v10 = vunpack.c.l.bf16 %v29_v0  ;;  %v62_v14 = vunpack.c.l.bf16 %v30_v1  ;;  %v63_v15 = vunpack.c.l.bf16 %v31_v2 }
   0x3   :  { %v35_v7 = vld [vmem:[%s2505_s0 + $0x6] sm:$0x1]  ;;  %v36_v8 = vld [vmem:[%s2505_s0 + $0x7] sm:$0x1]  ;;  %v37_v9 = vld [vmem:[%s2505_s0 + $0x8] sm:$0x1]  ;;  %v64_v16 = vunpack.c.l.bf16 %v32_v4  ;;  %v65_v17 = vunpack.c.l.bf16 %v33_v5  ;;  %v66_v21 = vunpack.c.l.bf16 %v34_v6 }
   0x4   :  { %v38_v11 = vld [vmem:[%s2505_s0 + $0x9] sm:$0x1]  ;;  %v39_v12 = vld [vmem:[%s2505_s0 + $0xa] sm:$0x1]  ;;  %v40_v13 = vld [vmem:[%s2505_s0 + $0xb] sm:$0x1]  ;;  %v67_v22 = vunpack.c.l.bf16 %v35_v7  ;;  %v68_v23 = vunpack.c.l.bf16 %v36_v8  ;;  %v69_v24 = vunpack.c.l.bf16 %v37_v9 }
   0x5   :  { %v41_v18 = vld [vmem:[%s2505_s0 + $0xc] sm:$0x1]  ;;  %v42_v19 = vld [vmem:[%s2505_s0 + $0xd] sm:$0x1]  ;;  %v43_v20 = vld [vmem:[%s2505_s0 + $0xe] sm:$0x1]  ;;  %v70_v26 = vunpack.c.l.bf16 %v38_v11  ;;  %v71_v27 = vunpack.c.l.bf16 %v39_v12  ;;  %v72_v28 = vunpack.c.l.bf16 %v40_v13 }
   0x6   :  { %v44_v25 = vld [vmem:[%s2505_s0 + $0xf] sm:$0x1]  ;;  %v1843_v29 = vshrl.u32 %v26_v3, 7  ;;  %v1848_v30 = vld [vmem:[%s2505_s0] sm:$0x1]  ;;  %v73_v31 = vunpack.c.l.bf16 %v41_v18  ;;  %v74_v32 = vunpack.c.l.bf16 %v42_v19  ;;  %vm315_vm3 = vcmask 1044484  }
   0x7   :  { %vm317_vm4 = vcmask 1045509   ;;  %v1853_v33 = vld [vmem:[%s2505_s0 + $0x1] sm:$0x1]  ;;  %v75_v34 = vunpack.c.l.bf16 %v43_v20  ;;  %v76_v35 = vunpack.c.l.bf16 %v44_v25  ;;  %vm319_vm5 = vcmask 1046534   ;;  %v1861_v37 = vld [vmem:[%s2505_s0 + $0x2] sm:$0x1] }
   0x8   :  { %v1856_v36 = vsub.s32 0, %v1843_v29  ;;  %v1866_v38 = vld [vmem:[%s2505_s0 + $0x3] sm:$0x1]  ;;  %vm321_vm6 = vcmask 1047559   ;;  %v557_v39 = vunpack.c.l.bf16 %v1848_v30  ;;  %v558_v40 = vunpack.c.l.bf16 %v1853_v33  ;;  %v1882_v50 = vld [vmem:[%s2505_s0 + $0x4] sm:$0x1] }
   0x9   :  { %v559_v41 = vunpack.c.l.bf16 %v1861_v37  ;;  %v560_v45 = vunpack.c.l.bf16 %v1866_v38  ;;  %v530_v55 = vld [vmem:[%s2505_s0 + $0x5] sm:$0x1]  ;;  %v531_v56 = vld [vmem:[%s2505_s0 + $0x6] sm:$0x1]  ;;  %v1901_v61 = vld [vmem:[%s2505_s0 + $0x7] sm:$0x1]  ;;  %v561_v5 = vunpack.c.l.bf16 %v1882_v50 }
   0xa   :  { %v184_v42 = vrot.slane %v61_v10, %v1856_v36  ;;  %v188_v43 = vrot.slane %v62_v14, %v1856_v36  ;;  %v192_v44 = vrot.slane %v63_v15, %v1856_v36  ;;  %v196_v46 = vrot.slane %v64_v16, %v1856_v36  ;;  %v533_v62 = vld [vmem:[%s2505_s0 + $0x8] sm:$0x1]  ;;  %v534_v2 = vld [vmem:[%s2505_s0 + $0x9] sm:$0x1]  ;;  %v535_v4 = vld [vmem:[%s2505_s0 + $0xa] sm:$0x1] }
   0xb   :  { %v200_v47 = vrot.slane %v65_v17, %v1856_v36  ;;  %v204_v48 = vrot.slane %v66_v21, %v1856_v36  ;;  %v208_v49 = vrot.slane %v67_v22, %v1856_v36  ;;  %v216_v51 = vrot.slane %v69_v24, %v1856_v36  ;;  %v536_v8 = vld [vmem:[%s2505_s0 + $0xb] sm:$0x1]  ;;  %v537_v9 = vld [vmem:[%s2505_s0 + $0xc] sm:$0x1]  ;;  %v538_v14 = vld [vmem:[%s2505_s0 + $0xd] sm:$0x1] }
   0xc   :  { %v220_v52 = vrot.slane %v70_v26, %v1856_v36  ;;  %v224_v53 = vrot.slane %v71_v27, %v1856_v36  ;;  %v228_v54 = vrot.slane %v72_v28, %v1856_v36  ;;  %v212_v57 = vrot.slane %v68_v23, %v1856_v36  ;;  %v539_v15 = vld [vmem:[%s2505_s0 + $0xe] sm:$0x1]  ;;  %v540_v20 = vld [vmem:[%s2505_s0 + $0xf] sm:$0x1]  ;;  %v1943_v27 = vld [vmem:[%s2505_s0 + $0x10] sm:$0x1] }
   0xd   :  { %v232_v58 = vrot.slane %v73_v31, %v1856_v36  ;;  %v236_v59 = vrot.slane %v74_v32, %v1856_v36  ;;  %v240_v60 = vrot.slane %v75_v34, %v1856_v36  ;;  %v244_v63 = vrot.slane %v76_v35, %v1856_v36  ;;  %v1948_v28 = vld [vmem:[%s2505_s0 + $0x11] sm:$0x1]  ;;  %v1953_v31 = vld [vmem:[%s2505_s0 + $0x12] sm:$0x1]  ;;  %v49_v33 = vld [vmem:[%s2505_s0 + $0x14] sm:$0x1] }
   0xe   :  { %v310_v0 = vsel %vm309_vm0, %v188_v43, %v184_v42  ;;  %v323_v1 = vsel %vm309_vm0, %v220_v52, %v216_v51  ;;  %v562_v10 = vunpack.c.l.bf16 %v530_v55  ;;  %v563_v11 = vunpack.c.l.bf16 %v531_v56  ;;  %v1960_v43 = vld [vmem:[%s2505_s0 + $0x13] sm:$0x1]  ;;  %v50_v38 = vld [vmem:[%s2505_s0 + $0x15] sm:$0x1] }
   0xf   :  { %v312_v6 = vsel %vm311_vm1, %v192_v44, %v310_v0  ;;  %v324_v7 = vsel %vm311_vm1, %v224_v53, %v323_v1  ;;  %v564_v16 = vunpack.c.l.bf16 %v1901_v61  ;;  %v565_v17 = vunpack.c.l.bf16 %v533_v62  ;;  %v52_v0 = vld [vmem:[%s2505_s0 + $0x17] sm:$0x1]  ;;  %v53_v1 = vld [vmem:[%s2505_s0 + $0x18] sm:$0x1] }
  0x10   :  { %v314_v12 = vsel %vm313_vm2, %v196_v46, %v312_v6  ;;  %v325_v13 = vsel %vm313_vm2, %v228_v54, %v324_v7  ;;  %v566_v21 = vunpack.c.l.bf16 %v534_v2  ;;  %v567_v22 = vunpack.c.l.bf16 %v535_v4  ;;  %v54_v6 = vld [vmem:[%s2505_s0 + $0x19] sm:$0x1]  ;;  %v55_v7 = vld [vmem:[%s2505_s0 + $0x1a] sm:$0x1] }
  0x11   :  { %v316_v18 = vsel %vm315_vm3, %v200_v47, %v314_v12  ;;  %v326_v19 = vsel %vm315_vm3, %v232_v58, %v325_v13  ;;  %v568_v25 = vunpack.c.l.bf16 %v536_v8  ;;  %v569_v26 = vunpack.c.l.bf16 %v537_v9  ;;  %v57_v12 = vld [vmem:[%s2505_s0 + $0x1c] sm:$0x1] }
  0x12   :  { %v318_v23 = vsel %vm317_vm4, %v204_v48, %v316_v18  ;;  %v327_v24 = vsel %vm317_vm4, %v236_v59, %v326_v19  ;;  %v570_v35 = vunpack.c.l.bf16 %v538_v14  ;;  %v571_v42 = vunpack.c.l.bf16 %v539_v15  ;;  %v59_v18 = vld [vmem:[%s2505_s0 + $0x1e] sm:$0x1] }
  0x13   :  { %v320_v32 = vsel %vm319_vm5, %v208_v49, %v318_v23  ;;  %v328_v34 = vsel %vm319_vm5, %v240_v60, %v327_v24  ;;  %v572_v47 = vunpack.c.l.bf16 %v540_v20  ;;  %v1965_v48 = vsub.s32 1, %v1843_v29 }
  0x14   :  { %v322_v44 = vsel %vm321_vm6, %v212_v57, %v320_v32  ;;  %v329_v46 = vsel %vm321_vm6, %v244_v63, %v328_v34  ;;  %v77_v49 = vunpack.c.l.bf16 %v1943_v27  ;;  %v78_v51 = vunpack.c.l.bf16 %v1948_v28  ;;  %v60_v27 = vld [vmem:[%s2505_s0 + $0x1f] sm:$0x1] }
  0x15   :  { %v1620_v50 = vpack.c.bf16 %v329_v46, %v322_v44  ;;  %v79_v52 = vunpack.c.l.bf16 %v1953_v31  ;;  %v680_v53 = vrot.slane %v557_v39, %v1965_v48  ;;  %v684_v54 = vrot.slane %v558_v40, %v1965_v48 }
  0x16   :  { %v688_v55 = vrot.slane %v559_v41, %v1965_v48  ;;  %v80_v56 = vunpack.c.l.bf16 %v1960_v43  ;;  %v692_v57 = vrot.slane %v560_v45, %v1965_v48  ;;  %v696_v58 = vrot.slane %v561_v5, %v1965_v48  ;;  %v51_v45 = vld [vmem:[%s2505_s0 + $0x16] sm:$0x1] }
  0x17   :  { %1621 = vmatprep.subr.bf16.mxu0 %v1620_v50  ;;  %v700_v30 = vrot.slane %v562_v10, %v1965_v48  ;;  %v704_v39 = vrot.slane %v563_v11, %v1965_v48  ;;  %v712_v37 = vrot.slane %v565_v17, %v1965_v48  ;;  %v716_v40 = vrot.slane %v566_v21, %v1965_v48  ;;  %v56_v11 = vld [vmem:[%s2505_s0 + $0x1b] sm:$0x1]  ;;  %v58_v17 = vld [vmem:[%s2505_s0 + $0x1d] sm:$0x1] }
  0x18   :  { %v720_v41 = vrot.slane %v567_v22, %v1965_v48  ;;  %v724_v59 = vrot.slane %v568_v25, %v1965_v48  ;;  %1623 = vmatpush3.bf16.msra.mxu0 %v1620_v50  ;;  %v708_v60 = vrot.slane %v564_v16, %v1965_v48  ;;  %v728_v61 = vrot.slane %v569_v26, %v1965_v48 }
  0x19   :  { %v732_v62 = vrot.slane %v570_v35, %v1965_v48  ;;  %v736_v63 = vrot.slane %v571_v42, %v1965_v48  ;;  %v740_v2 = vrot.slane %v572_v47, %v1965_v48  ;;  %v805_v4 = vsel %vm309_vm0, %v684_v54, %v680_v53 }
  0x1a   :  { %v812_v5 = vsel %vm309_vm0, %v716_v40, %v712_v37  ;;  %v81_v8 = vunpack.c.l.bf16 %v49_v33  ;;  %v806_v9 = vsel %vm311_vm1, %v688_v55, %v805_v4  ;;  %v82_v13 = vunpack.c.l.bf16 %v50_v38  ;;  %v542_v37 = vld [vmem:[%s2505_s0 + $0x11] sm:$0x1]  ;;  %v543_v40 = vld [vmem:[%s2505_s0 + $0x12] sm:$0x1] }
  0x1b   :  { %v813_v10 = vsel %vm311_vm1, %v720_v41, %v812_v5  ;;  %v83_v14 = vunpack.c.l.bf16 %v51_v45  ;;  %v807_v15 = vsel %vm313_vm2, %v692_v57, %v806_v9  ;;  %v84_v19 = vunpack.c.l.bf16 %v52_v0 }
  0x1c   :  { %v814_v16 = vsel %vm313_vm2, %v724_v59, %v813_v10  ;;  %v85_v20 = vunpack.c.l.bf16 %v53_v1  ;;  %v808_v21 = vsel %vm315_vm3, %v696_v58, %v807_v15  ;;  %v86_v23 = vunpack.c.l.bf16 %v54_v6  ;;  %v546_v1 = vld [vmem:[%s2505_s0 + $0x15] sm:$0x1] }
  0x1d   :  { %v815_v22 = vsel %vm315_vm3, %v728_v61, %v814_v16  ;;  %v87_v24 = vunpack.c.l.bf16 %v55_v7  ;;  %v809_v25 = vsel %vm317_vm4, %v700_v30, %v808_v21  ;;  %v88_v28 = vunpack.c.l.bf16 %v56_v11  ;;  %v545_v61 = vld [vmem:[%s2505_s0 + $0x14] sm:$0x1]  ;;  %v548_v7 = vld [vmem:[%s2505_s0 + $0x17] sm:$0x1]  ;;  %v554_v21 = vld [vmem:[%s2505_s0 + $0x1d] sm:$0x1] }
  0x1e   :  { %v816_v26 = vsel %vm317_vm4, %v732_v62, %v815_v22  ;;  %v89_v31 = vunpack.c.l.bf16 %v57_v12  ;;  %v810_v32 = vsel %vm319_vm5, %v704_v39, %v809_v25  ;;  %v90_v35 = vunpack.c.l.bf16 %v58_v17 }
  0x1f   :  { %v817_v34 = vsel %vm319_vm5, %v736_v63, %v816_v26  ;;  %v91_v42 = vunpack.c.l.bf16 %v59_v18  ;;  %v811_v43 = vsel %vm321_vm6, %v708_v60, %v810_v32  ;;  %v248_v46 = vrot.slane %v77_v49, %v1856_v36  ;;  %v541_v49 = vld [vmem:[%s2505_s0 + $0x10] sm:$0x1]  ;;  %v544_v60 = vld [vmem:[%s2505_s0 + $0x13] sm:$0x1]  ;;  %v555_v26 = vld [vmem:[%s2505_s0 + $0x1e] sm:$0x1] }
  0x20   :  { %v818_v44 = vsel %vm321_vm6, %v740_v2, %v817_v34  ;;  %v252_v47 = vrot.slane %v78_v51, %v1856_v36  ;;  %v92_v53 = vunpack.c.l.bf16 %v60_v27  ;;  %v256_v54 = vrot.slane %v79_v52, %v1856_v36  ;;  %v547_v2 = vld [vmem:[%s2505_s0 + $0x16] sm:$0x1]  ;;  %v556_v34 = vld [vmem:[%s2505_s0 + $0x1f] sm:$0x1] }
  0x21   :  { %v1628_v50 = vpack.c.bf16 %v818_v44, %v811_v43  ;;  %v260_v55 = vrot.slane %v80_v56, %v1856_v36  ;;  %v264_v57 = vrot.slane %v81_v8, %v1856_v36  ;;  %v268_v58 = vrot.slane %v82_v13, %v1856_v36  ;;  %v549_v8 = vld [vmem:[%s2505_s0 + $0x18] sm:$0x1]  ;;  %v550_v13 = vld [vmem:[%s2505_s0 + $0x19] sm:$0x1] }
  0x22   :  { %v272_v30 = vrot.slane %v83_v14, %v1856_v36  ;;  %v280_v39 = vrot.slane %v85_v20, %v1856_v36  ;;  %v276_v51 = vrot.slane %v84_v19, %v1856_v36  ;;  %v284_v33 = vrot.slane %v86_v23, %v1856_v36  ;;  %v551_v14 = vld [vmem:[%s2505_s0 + $0x1a] sm:$0x1]  ;;  %v552_v19 = vld [vmem:[%s2505_s0 + $0x1b] sm:$0x1]  ;;  %v553_v20 = vld [vmem:[%s2505_s0 + $0x1c] sm:$0x1] }
  0x23   :  { %1629 = vmatprep.subr.bf16.mxu1 %v1628_v50  ;;  %v288_v52 = vrot.slane %v87_v24, %v1856_v36  ;;  %v292_v56 = vrot.slane %v88_v28, %v1856_v36  ;;  %v296_v41 = vrot.slane %v89_v31, %v1856_v36  ;;  %v300_v59 = vrot.slane %v90_v35, %v1856_v36 }
  0x24   :  { %1631 = vmatpush3.bf16.msra.mxu1 %v1628_v50  ;;  %v304_v38 = vrot.slane %v91_v42, %v1856_v36  ;;  %v330_v45 = vsel %vm309_vm0, %v252_v47, %v248_v46  ;;  %v308_v62 = vrot.slane %v92_v53, %v1856_v36  ;;  %v337_v0 = vsel %vm309_vm0, %v284_v33, %v280_v39 }
  0x25   :  { %v331_v63 = vsel %vm311_vm1, %v256_v54, %v330_v45  ;;  %v573_v4 = vunpack.c.l.bf16 %v541_v49  ;;  %v338_v6 = vsel %vm311_vm1, %v288_v52, %v337_v0  ;;  %v574_v9 = vunpack.c.l.bf16 %v542_v37 }
  0x26   :  { %v332_v5 = vsel %vm313_vm2, %v260_v55, %v331_v63  ;;  %v575_v10 = vunpack.c.l.bf16 %v543_v40  ;;  %v339_v12 = vsel %vm313_vm2, %v292_v56, %v338_v6  ;;  %v576_v15 = vunpack.c.l.bf16 %v544_v60 }
  0x27   :  { %v333_v11 = vsel %vm315_vm3, %v264_v57, %v332_v5  ;;  %v577_v16 = vunpack.c.l.bf16 %v545_v61  ;;  %v340_v18 = vsel %vm315_vm3, %v296_v41, %v339_v12  ;;  %v578_v22 = vunpack.c.l.bf16 %v546_v1  ;;  %v95_v1 = vld [vmem:[%s2506_s1 + $0x10] sm:$0xff] }
  0x28   :  { %v334_v17 = vsel %vm317_vm4, %v268_v58, %v333_v11  ;;  %v579_v23 = vunpack.c.l.bf16 %v547_v2  ;;  %v341_v25 = vsel %vm317_vm4, %v300_v59, %v340_v18  ;;  %v580_v27 = vunpack.c.l.bf16 %v548_v7  ;;  %v93_v59 = vld [vmem:[%s2506_s1] sm:$0xff] }
  0x29   :  { %v335_v24 = vsel %vm319_vm5, %v272_v30, %v334_v17  ;;  %v581_v28 = vunpack.c.l.bf16 %v549_v8  ;;  %v342_v32 = vsel %vm319_vm5, %v304_v38, %v341_v25  ;;  %v582_v35 = vunpack.c.l.bf16 %v550_v13  ;;  %v105_v2 = vld [vmem:[%s2507_s2 + $0x20] sm:$0xff]  ;;  %v96_v13 = vld [vmem:[%s2506_s1 + $0x18] sm:$0xff] }
  0x2a   :  { %v336_v31 = vsel %vm321_vm6, %v276_v51, %v335_v24  ;;  %v583_v42 = vunpack.c.l.bf16 %v551_v14  ;;  %v343_v43 = vsel %vm321_vm6, %v308_v62, %v342_v32  ;;  %v584_v44 = vunpack.c.l.bf16 %v552_v19  ;;  %v94_v62 = vld [vmem:[%s2506_s1 + $0x8] sm:$0xff]  ;;  %v108_v24 = vld [vmem:[%s2507_s2 + $0x38] sm:$0xff]  ;;  %v101_v25 = vld [vmem:[%s2507_s2] sm:$0xff] }
  0x2b   :  { %v585_v46 = vunpack.c.l.bf16 %v553_v20  ;;  %v586_v47 = vunpack.c.l.bf16 %v554_v21  ;;  %v1624_v50 = vpack.c.bf16 %v343_v43, %v336_v31  ;;  %v587_v53 = vunpack.c.l.bf16 %v555_v26  ;;  %v98_v20 = vld [vmem:[%s2506_s1 + $0x28] sm:$0xff]  ;;  %v99_v21 = vld [vmem:[%s2506_s1 + $0x30] sm:$0xff] }
  0x2c   :  { %v744_v54 = vrot.slane %v573_v4, %v1965_v48  ;;  %v748_v55 = vrot.slane %v574_v9, %v1965_v48  ;;  %v588_v57 = vunpack.c.l.bf16 %v556_v34  ;;  %v752_v58 = vrot.slane %v575_v10, %v1965_v48  ;;  %v106_v10 = vld [vmem:[%s2507_s2 + $0x28] sm:$0xff] }
  0x2d   :  { %v756_v30 = vrot.slane %v576_v15, %v1965_v48  ;;  %v760_v39 = vrot.slane %v577_v16, %v1965_v48  ;;  %1625 = vmatprep.subr.bf16.mxu0 %v1624_v50  ;;  %v764_v49 = vrot.slane %v578_v22, %v1965_v48  ;;  %v768_v51 = vrot.slane %v579_v23, %v1965_v48  ;;  %v97_v16 = vld [vmem:[%s2506_s1 + $0x20] sm:$0xff]  ;;  %v107_v22 = vld [vmem:[%s2507_s2 + $0x30] sm:$0xff]  ;;  %v100_v23 = vld [vmem:[%s2506_s1 + $0x38] sm:$0xff] }
  0x2e   :  { %v776_v33 = vrot.slane %v581_v28, %v1965_v48  ;;  %v780_v52 = vrot.slane %v582_v35, %v1965_v48  ;;  %v772_v56 = vrot.slane %v580_v27, %v1965_v48  ;;  %v784_v37 = vrot.slane %v583_v42, %v1965_v48  ;;  %1627 = vmatpush3.bf16.msra.mxu0 %v1624_v50  ;;  %v102_v26 = vld [vmem:[%s2507_s2 + $0x8] sm:$0xff]  ;;  %v103_v27 = vld [vmem:[%s2507_s2 + $0x10] sm:$0xff]  ;;  %v104_v28 = vld [vmem:[%s2507_s2 + $0x18] sm:$0xff] }
  0x2f   :  { %v788_v40 = vrot.slane %v584_v44, %v1965_v48  ;;  %v792_v41 = vrot.slane %v585_v46, %v1965_v48  ;;  %v796_v38 = vrot.slane %v586_v47, %v1965_v48  ;;  %v800_v45 = vrot.slane %v587_v53, %v1965_v48 }
  0x30   :  { %v819_v60 = vsel %vm309_vm0, %v748_v55, %v744_v54  ;;  %v826_v61 = vsel %vm309_vm0, %v780_v52, %v776_v33  ;;  %vm348_vm7 = vcmask 261120   ;;  %v804_v4 = vrot.slane %v588_v57, %v1965_v48 }
  0x31   :  { %v820_v63 = vsel %vm311_vm1, %v752_v58, %v819_v60  ;;  %v827_v0 = vsel %vm311_vm1, %v784_v37, %v826_v61  ;;  %1588 = vmatprep.mubr.msk.f32.mxu0 %vm348_vm7, %v93_v59  ;;  %1608 = vmatprep.mubr.msk.f32.mxu1 %vm348_vm7, %v93_v59  ;;  %v1752_v9 = vmov 0   ;;  %vm520_vm9 = vcmask 7168  }
  0x32   :  { %v821_v5 = vsel %vm313_vm2, %v756_v30, %v820_v63  ;;  %v828_v6 = vsel %vm313_vm2, %v788_v40, %v827_v0  ;;  %1589 = vmatmul.mubr.msk.f32.vlgmr.msra.gmra.mrb[0].mxu0 %vm348_vm7, %v94_v62  ;;  %1718 = vset.pattern.permute.xlu0 %v1752_v9  ;;  %vm1006_vm10 = vcmask 15368   ;;  %vm1453_vm15 = vcmask 74752  }
  0x33   :  { %v822_v7 = vsel %vm315_vm3, %v760_v39, %v821_v5  ;;  %v829_v8 = vsel %vm315_vm3, %v792_v41, %v828_v6  ;;  %1591 = vmatprep.mubr.msk.f32.mxu0 %vm348_vm7, %v95_v1  ;;  %131 = vperm.xlu0 %1718, %v105_v2  }
  0x34   :  { %v823_v11 = vsel %vm317_vm4, %v764_v49, %v822_v7  ;;  %v830_v12 = vsel %vm317_vm4, %v796_v38, %v829_v8  ;;  %1719 = vset.pattern.permute.xlu1 %v1752_v9 }
  0x35   :  { %v824_v14 = vsel %vm319_vm5, %v768_v51, %v823_v11  ;;  %v831_v15 = vsel %vm319_vm5, %v800_v45, %v830_v12  ;;  %136 = vperm.xlu1 %1719, %v106_v10  }
  0x36   :  { %v825_v17 = vsel %vm321_vm6, %v772_v56, %v824_v14  ;;  %v832_v18 = vsel %vm321_vm6, %v804_v4, %v831_v15  ;;  %1592 = vmatmul.mubr.msk.f32.gmra.mrb[2].mxu0 %vm348_vm7, %v96_v13 }
  0x37   :  { %v1632_v19 = vpack.c.bf16 %v832_v18, %v825_v17  ;;  %1594 = vmatprep.mubr.msk.f32.mxu0 %vm348_vm7, %v97_v16  ;;  %627 = vperm.xlu0 %1718, %v105_v2  }
  0x39   :  { %1633 = vmatprep.subr.bf16.mxu1 %v1632_v19  ;;  %632 = vperm.xlu1 %1719, %v106_v10  }
  0x3a   :  { %1635 = vmatpush3.bf16.msra.mxu1 %v1632_v19  ;;  %1595 = vmatmul.mubr.msk.f32.gmra.mrb[4].mxu0 %vm348_vm7, %v98_v20 }
  0x3b   :  { %1597 = vmatprep.mubr.msk.f32.mxu0 %vm348_vm7, %v99_v21  ;;  %141 = vperm.xlu0 %1718, %v107_v22  }
  0x3d   :  { %1609 = vmatmul.mubr.msk.f32.vlgmr.msra.gmra.mrb[0].mxu1 %vm348_vm7, %v94_v62  ;;  %637 = vperm.xlu1 %1719, %v107_v22  }
  0x3e   :  { %1611 = vmatprep.mubr.msk.f32.mxu1 %vm348_vm7, %v95_v1  ;;  %1598 = vmatmul.mubr.msk.f32.gmra.mrb[6].mxu0 %vm348_vm7, %v100_v23 }
  0x3f   :  { %146 = vperm.xlu0 %1718, %v108_v24  }
  0x41   :  { %1612 = vmatmul.mubr.msk.f32.gmra.mrb[2].mxu1 %vm348_vm7, %v96_v13  ;;  %642 = vperm.xlu1 %1719, %v108_v24  }
  0x42   :  { %1614 = vmatprep.mubr.msk.f32.mxu1 %vm348_vm7, %v97_v16 }
  0x43   :  { %111 = vperm.xlu0 %1718, %v101_v25  }
  0x45   :  { %1615 = vmatmul.mubr.msk.f32.gmra.mrb[4].mxu1 %vm348_vm7, %v98_v20  ;;  %607 = vperm.xlu1 %1719, %v101_v25  }
  0x46   :  { %1617 = vmatprep.mubr.msk.f32.mxu1 %vm348_vm7, %v99_v21  ;;  %v27_v21 = vand.u32 127, %v26_v3 }
  0x47   :  { %116 = vperm.xlu0 %1718, %v102_v26  }
  0x48   :  { %vm28_vm8 = vcmp.lt.s32.totalorder %v27_v21, 16  ;;  %v1059_v21 = vld [vmem:[%s2508_s3 + $0x60] sm:$0xff] }
  0x49   :  { %1618 = vmatmul.mubr.msk.f32.gmra.mrb[6].mxu1 %vm348_vm7, %v100_v23  ;;  %612 = vperm.xlu1 %1719, %v102_v26  }
  0x4b   :  { %121 = vperm.xlu0 %1718, %v103_v27  }
  0x4d   :  { %617 = vperm.xlu1 %1719, %v103_v27  }
  0x4f   :  { %126 = vperm.xlu0 %1718, %v104_v28  }
  0x51   :  { %622 = vperm.xlu1 %1719, %v104_v28  }
  0xb2   :  { %v132_v31 = vpop.permute.xlu0 %131 }
  0xb4   :  { %v137_v42 = vpop.permute.xlu1 %136 }
  0xb6   :  { %v628_v32 = vpop.permute.xlu0 %627 }
  0xb8   :  { %v633_v54 = vpop.permute.xlu1 %632 }
  0xba   :  { %v142_v46 = vpop.permute.xlu0 %141 }
  0xbc   :  { %v638_v59 = vpop.permute.xlu1 %637 }
  0xbe   :  { %v147_v39 = vpop.permute.xlu0 %146 }
  0xc0   :  { %v643_v1 = vpop.permute.xlu1 %642 }
  0xc2   :  { %v112_v45 = vpop.permute.xlu0 %111 }
  0xc4   :  { %v608_v18 = vpop.permute.xlu1 %607 }
  0xc6   :  { %v117_v9 = vpop.permute.xlu0 %116 }
  0xc8   :  { %v613_v25 = vpop.permute.xlu1 %612 }
  0xca   :  { %v122_v20 = vpop.permute.xlu0 %121 }
 0x105   :  { %v2217_v34 = vpop.f32.mrb[0].mxu0 }
 0x106   :  { %v2219_v35 = vpop.f32.mrb[1].mxu0  ;;  %v445_v26 = vadd.f32 %v2217_v34, %v117_v9 }
 0x109   :  { %v2221_v43 = vpop.f32.mrb[2].mxu0 }
 0x10a   :  { %v2223_v44 = vpop.f32.mrb[3].mxu0 }
 0x10b   :  { %v450_v34 = vadd.f32 %v2223_v44, %v122_v20  ;;  %v1055_v20 = vld [vmem:[%s2508_s3 + $0x40] sm:$0xff] }
 0x10d   :  { %v1596_v47 = vpop.f32.mrb[4].mxu0 }
 0x10e   :  { %v465_v50 = vadd.f32 %v1596_v47, %v137_v42  ;;  %v459_v53 = vpop.f32.mrb[5].mxu0 }
 0x10f   :  { %v460_v57 = vadd.f32 %v459_v53, %v132_v31  ;;  %v440_v31 = vadd.f32 %v2219_v35, %v112_v45 }
 0x110   :  { %v2225_v55 = vpop.f32.mrb[0].mxu1  ;;  %v1468_v30 = vmul.f32 -1.442695, %v465_v50 }
 0x111   :  { %v2227_v58 = vpop.f32.mrb[1].mxu1  ;;  %v1467_v49 = vmul.f32 -1.442695, %v460_v57  ;;  %v1599_v51 = vpop.f32.mrb[6].mxu0 }
 0x112   :  { %1720 = vpow2.f32 %v1468_v30  ;;  %v475_v33 = vadd.f32 %v1599_v51, %v147_v39  ;;  %v469_v52 = vpop.f32.mrb[7].mxu0 }
 0x113   :  { %1722 = vpow2.f32 %v1467_v49  ;;  %v470_v37 = vadd.f32 %v469_v52, %v142_v46  ;;  %v618_v49 = vpop.permute.xlu1 %617  ;;  %v933_v52 = vadd.f32 %v2225_v55, %v613_v25  ;;  %v1062_v25 = vld [vmem:[%s2508_s3 + $0x78] sm:$0xff] }
 0x114   :  { %v2229_v56 = vpop.f32.mrb[2].mxu1  ;;  %v1470_v41 = vmul.f32 -1.442695, %v475_v33 }
 0x115   :  { %v2231_v40 = vpop.f32.mrb[3].mxu1  ;;  %v1469_v38 = vmul.f32 -1.442695, %v470_v37 }
 0x116   :  { %1724 = vpow2.f32 %v1470_v41  ;;  %v928_v41 = vadd.f32 %v2227_v58, %v608_v18 }
 0x117   :  { %1726 = vpow2.f32 %v1469_v38 }
 0x118   :  { %v1616_v60 = vpop.f32.mrb[4].mxu1 }
 0x119   :  { %v953_v61 = vadd.f32 %v1616_v60, %v633_v54  ;;  %v947_v62 = vpop.f32.mrb[5].mxu1 }
 0x11a   :  { %v948_v63 = vadd.f32 %v947_v62, %v628_v32  ;;  %v127_v32 = vpop.permute.xlu0 %126 }
 0x11b   :  { %v1480_v0 = vmul.f32 -1.442695, %v953_v61  ;;  %v455_v3 = vadd.f32 %v2221_v43, %v127_v32 }
 0x11c   :  { %v1479_v2 = vmul.f32 -1.442695, %v948_v63  ;;  %v1619_v4 = vpop.f32.mrb[6].mxu1  ;;  %v1721_v5 = vpop.eup %1720  ;;  %v938_v63 = vadd.f32 %v2231_v40, %v618_v49  ;;  %v1048_v40 = vld [vmem:[%s2508_s3 + $0x8] sm:$0xff]  ;;  %v1290_v49 = vld [vmem:[%s2509_s5 + $0x180] sm:$0xff] }
 0x11d   :  { %1728 = vpow2.f32 %v1480_v0  ;;  %v963_v6 = vadd.f32 %v1619_v4, %v643_v1  ;;  %v957_v7 = vpop.f32.mrb[7].mxu1  ;;  %v1723_v8 = vpop.eup %1722  ;;  %v491_v10 = vadd.f32 1.0, %v1721_v5 }
 0x11e   :  { %1730 = vpow2.f32 %v1479_v2  ;;  %v958_v11 = vadd.f32 %v957_v7, %v638_v59  ;;  %v490_v12 = vadd.f32 1.0, %v1723_v8  ;;  %v623_v59 = vpop.permute.xlu1 %622  ;;  %v1047_v7 = vld [vmem:[%s2508_s3] sm:$0xff]  ;;  %v1753_v8 = vmov 0.0  }
 0x11f   :  { %v1482_v13 = vmul.f32 -1.442695, %v963_v6  ;;  %1732 = vrcp.f32 %v491_v10  ;;  %v943_v44 = vadd.f32 %v2229_v56, %v623_v59  ;;  %v1052_v6 = vld [vmem:[%s2508_s3 + $0x28] sm:$0xff]  ;;  %1152 = vmatprep.mubr.f32.mxu0 %v1753_v8  ;;  %1223 = vmatprep.mubr.f32.mxu1 %v1753_v8  ;;  %v1051_v10 = vld [vmem:[%s2508_s3 + $0x20] sm:$0xff] }
 0x120   :  { %v1481_v14 = vmul.f32 -1.442695, %v958_v11  ;;  %v1725_v15 = vpop.eup %1724  ;;  %1734 = vrcp.f32 %v490_v12  ;;  %v1636_v9 = vpack.c.bf16 %v1052_v6, %v1048_v40  ;;  %v1050_v11 = vld [vmem:[%s2508_s3 + $0x18] sm:$0xff]  ;;  %v1274_v59 = vld [vmem:[%s2509_s5 + $0x100] sm:$0xff]  ;;  %v1263_v40 = vld [vmem:[%s2509_s5 + $0xa8] sm:$0xff] }
 0x121   :  { %v1727_v16 = vpop.eup %1726  ;;  %v493_v17 = vadd.f32 1.0, %v1725_v15  ;;  %1736 = vpow2.f32 %v1482_v13  ;;  %v1054_v12 = vld [vmem:[%s2508_s3 + $0x38] sm:$0xff]  ;;  %v1638_v13 = vpack.c.bf16 %v1051_v10, %v1047_v7  ;;  %v1049_v15 = vld [vmem:[%s2508_s3 + $0x10] sm:$0xff]  ;;  %v1294_v6 = vld [vmem:[%s2509_s5 + $0x1a0] sm:$0xff] }
 0x122   :  { %v492_v19 = vadd.f32 1.0, %v1727_v16  ;;  %1738 = vpow2.f32 %v1481_v14  ;;  %v1644_v14 = vpack.c.bf16 %v1054_v12, %v1050_v11  ;;  %v1053_v16 = vld [vmem:[%s2508_s3 + $0x30] sm:$0xff]  ;;  %1637 = vmatprep.subr.bf16.mxu0 %v1636_v9  ;;  %v1295_v7 = vld [vmem:[%s2509_s5 + $0x1a8] sm:$0xff]  ;;  %v1246_v10 = vld [vmem:[%s2509_s5 + $0x20] sm:$0xff] }
 0x123   :  { %1740 = vrcp.f32 %v493_v17  ;;  %v1056_v17 = vld [vmem:[%s2508_s3 + $0x48] sm:$0xff]  ;;  %v1646_v18 = vpack.c.bf16 %v1053_v16, %v1049_v15  ;;  %1639 = vmatpush1.bf16.msra.mxu0 %v1638_v13  ;;  %v1692_v13 = vpack.c.bf16 %v1295_v7, %v1294_v6  ;;  %v1264_v16 = vld [vmem:[%s2509_s5 + $0xb0] sm:$0xff]  ;;  %v1273_v6 = vld [vmem:[%s2509_s5 + $0xf8] sm:$0xff] }
 0x124   :  { %1742 = vrcp.f32 %v492_v19  ;;  %v1060_v19 = vld [vmem:[%s2508_s3 + $0x68] sm:$0xff]  ;;  %1645 = vmatprep.subr.bf16.mxu1 %v1644_v14  ;;  %v1278_v14 = vld [vmem:[%s2509_s5 + $0x120] sm:$0xff]  ;;  %v1304_v7 = vld [vmem:[%s2509_s5 + $0x1f0] sm:$0xff] }
 0x125   :  { %1647 = vmatpush1.bf16.msra.mxu1 %v1646_v18  ;;  %v1247_v11 = vld [vmem:[%s2509_s5 + $0x28] sm:$0xff]  ;;  %v1296_v18 = vld [vmem:[%s2509_s5 + $0x1b0] sm:$0xff] }
 0x126   :  { %v1279_v15 = vld [vmem:[%s2509_s5 + $0x128] sm:$0xff] }
 0x127   :  { %v1729_v22 = vpop.eup %1728 }
 0x128   :  { %v1731_v23 = vpop.eup %1730  ;;  %v979_v24 = vadd.f32 1.0, %v1729_v22  ;;  %v1640_v22 = vpack.c.bf16 %v1060_v19, %v1056_v17  ;;  %v1265_v17 = vld [vmem:[%s2509_s5 + $0xb8] sm:$0xff] }
 0x129   :  { %v978_v27 = vadd.f32 1.0, %v1731_v23  ;;  %v1733_v28 = vpop.eup %1732  ;;  %v1642_v23 = vpack.c.bf16 %v1059_v21, %v1055_v20  ;;  %v1297_v19 = vld [vmem:[%s2509_s5 + $0x1b8] sm:$0xff]  ;;  %v1662_v20 = vpack.c.bf16 %v1247_v11, %v1246_v10  ;;  %v1694_v21 = vpack.c.bf16 %v1279_v15, %v1278_v14  ;;  %v1256_v11 = vld [vmem:[%s2509_s5 + $0x70] sm:$0xff] }
 0x12a   :  { %1744 = vrcp.f32 %v979_v24  ;;  %v1735_v42 = vpop.eup %1734  ;;  %v503_v46 = vmul.f32 %v1733_v28, %v445_v26  ;;  %v1058_v24 = vld [vmem:[%s2508_s3 + $0x58] sm:$0xff]  ;;  %v1057_v26 = vld [vmem:[%s2508_s3 + $0x50] sm:$0xff]  ;;  %1641 = vmatprep.subr.bf16.mxu0 %v1640_v22 }
 0x12b   :  { %1746 = vrcp.f32 %v978_v27  ;;  %v1737_v47 = vpop.eup %1736  ;;  %v502_v50 = vmul.f32 %v1735_v42, %v440_v31  ;;  %v1648_v27 = vpack.c.bf16 %v1062_v25, %v1058_v24  ;;  %v1061_v28 = vld [vmem:[%s2508_s3 + $0x70] sm:$0xff]  ;;  %1643 = vmatpush1.bf16.msra.mxu0 %v1642_v23  ;;  %v1249_v23 = vld [vmem:[%s2509_s5 + $0x38] sm:$0xff]  ;;  %v1664_v24 = vpack.c.bf16 %v1265_v17, %v1264_v16 }
 0x12c   :  { %v1739_v53 = vpop.eup %1738  ;;  %v981_v54 = vadd.f32 1.0, %v1737_v47  ;;  %v509_v57 = vsel %vm28_vm8, %v503_v46, -inf  ;;  %v1650_v31 = vpack.c.bf16 %v1061_v28, %v1057_v26  ;;  %v1248_v22 = vld [vmem:[%s2509_s5 + $0x30] sm:$0xff]  ;;  %v1696_v25 = vpack.c.bf16 %v1297_v19, %v1296_v18  ;;  %v1266_v28 = vld [vmem:[%s2509_s5 + $0xc0] sm:$0xff]  ;;  %v1289_v15 = vld [vmem:[%s2509_s5 + $0x178] sm:$0xff] }
 0x12d   :  { %v1741_v30 = vpop.eup %1740  ;;  %v980_v39 = vadd.f32 1.0, %v1739_v53  ;;  %514 = vmax.xlane.f32.xlu0 %v509_v57  ;;  %v508_v58 = vsel %vm28_vm8, %v502_v50, -inf  ;;  %1649 = vmatprep.subr.bf16.mxu1 %v1648_v27  ;;  %v1280_v26 = vld [vmem:[%s2509_s5 + $0x130] sm:$0xff]  ;;  %v1281_v27 = vld [vmem:[%s2509_s5 + $0x138] sm:$0xff]  ;;  %v1075_v17 = vsub.s32 2, %v1843_v29  ;;  %v1079_v19 = vsub.s32 3, %v1843_v29 }
 0x12e   :  { %v1743_v35 = vpop.eup %1742  ;;  %1748 = vrcp.f32 %v981_v54  ;;  %v505_v51 = vmul.f32 %v1741_v30, %v455_v3  ;;  %1651 = vmatpush1.bf16.msra.mxu1 %v1650_v31  ;;  %v1258_v30 = vld [vmem:[%s2509_s5 + $0x80] sm:$0xff]  ;;  %v1267_v31 = vld [vmem:[%s2509_s5 + $0xc8] sm:$0xff] }
 0x12f   :  { %1750 = vrcp.f32 %v980_v39  ;;  %v504_v33 = vmul.f32 %v1743_v35, %v450_v34  ;;  %v1259_v34 = vld [vmem:[%s2509_s5 + $0x88] sm:$0xff]  ;;  %v1063_v18 = vld [vmem:[%s2510_s4] sm:$0xf] }
 0x130   :  { %v511_v56 = vsel %vm28_vm8, %v505_v51, -inf  ;;  %v1652_v35 = vpack.c.bf16 %v1259_v34, %v1258_v30  ;;  %v1291_v51 = vld [vmem:[%s2509_s5 + $0x188] sm:$0xff]  ;;  %v1268_v34 = vld [vmem:[%s2509_s5 + $0xd0] sm:$0xff] }
 0x131   :  { %v510_v55 = vsel %vm28_vm8, %v504_v33, -inf  ;;  %v1684_v33 = vpack.c.bf16 %v1291_v51, %v1290_v49  ;;  %v1283_v30 = vld [vmem:[%s2509_s5 + $0x148] sm:$0xff]  ;;  %v1301_v49 = vld [vmem:[%s2509_s5 + $0x1d8] sm:$0xff] }
 0x132   :  { %1653 = vmatprep.subr.bf16.mxu0 %v1652_v35  ;;  %v1300_v35 = vld [vmem:[%s2509_s5 + $0x1d0] sm:$0xff] }
 0x133   :  { %1685 = vmatprep.subr.bf16.mxu1 %v1684_v33 }
 0x134   :  { %v1745_v37 = vpop.eup %1744 }
 0x135   :  { %v1747_v43 = vpop.eup %1746  ;;  %v991_v38 = vmul.f32 %v1745_v37, %v933_v52 }
 0x136   :  { %v990_v45 = vmul.f32 %v1747_v43, %v928_v41  ;;  %v1242_v41 = vld [vmem:[%s2509_s5] sm:$0xff]  ;;  %v1243_v43 = vld [vmem:[%s2509_s5 + $0x8] sm:$0xff] }
 0x137   :  { %v995_v60 = vsel %vm28_vm8, %v991_v38, -inf  ;;  %v1275_v38 = vld [vmem:[%s2509_s5 + $0x108] sm:$0xff] }
 0x138   :  { %v994_v61 = vsel %vm28_vm8, %v990_v45, -inf  ;;  %1000 = vmax.xlane.f32.xlu0 %v995_v60  ;;  %v1749_v62 = vpop.eup %1748  ;;  %v1260_v45 = vld [vmem:[%s2509_s5 + $0x90] sm:$0xff]  ;;  %v1261_v60 = vld [vmem:[%s2509_s5 + $0x98] sm:$0xff] }
 0x139   :  { %998 = vmax.xlane.f32.xlu1 %v994_v61  ;;  %v1751_v0 = vpop.eup %1750  ;;  %v993_v1 = vmul.f32 %v1749_v62, %v943_v44  ;;  %v1292_v44 = vld [vmem:[%s2509_s5 + $0x190] sm:$0xff]  ;;  %v1293_v61 = vld [vmem:[%s2509_s5 + $0x198] sm:$0xff]  ;;  %v1654_v62 = vpack.c.bf16 %v1243_v43, %v1242_v41  ;;  %v1704_v41 = vpack.c.bf16 %v1301_v49, %v1300_v35 }
 0x13a   :  { %v992_v2 = vmul.f32 %v1751_v0, %v938_v63  ;;  %v1686_v63 = vpack.c.bf16 %v1275_v38, %v1274_v59  ;;  %v1244_v0 = vld [vmem:[%s2509_s5 + $0x10] sm:$0xff]  ;;  %v1253_v43 = vld [vmem:[%s2509_s5 + $0x58] sm:$0xff] }
 0x13b   :  { %v997_v5 = vsel %vm28_vm8, %v993_v1, -inf  ;;  %v1656_v1 = vpack.c.bf16 %v1261_v60, %v1260_v45  ;;  %v1284_v59 = vld [vmem:[%s2509_s5 + $0x150] sm:$0xff]  ;;  %v1285_v38 = vld [vmem:[%s2509_s5 + $0x158] sm:$0xff] }
 0x13c   :  { %512 = vmax.xlane.f32.xlu0 %v508_v58  ;;  %v996_v4 = vsel %vm28_vm8, %v992_v2, -inf  ;;  %v1688_v58 = vpack.c.bf16 %v1293_v61, %v1292_v44  ;;  %v1276_v2 = vld [vmem:[%s2509_s5 + $0x110] sm:$0xff]  ;;  %v1706_v60 = vpack.c.bf16 %v1285_v38, %v1284_v59  ;;  %v1270_v44 = vld [vmem:[%s2509_s5 + $0xe0] sm:$0xff]  ;;  %v1271_v61 = vld [vmem:[%s2509_s5 + $0xe8] sm:$0xff] }
 0x13d   :  { %516 = vmax.xlane.f32.xlu1 %v510_v55  ;;  %v1245_v55 = vld [vmem:[%s2509_s5 + $0x18] sm:$0xff] }
 0x13e   :  { %v1658_v8 = vpack.c.bf16 %v1245_v55, %v1244_v0  ;;  %v1303_v0 = vld [vmem:[%s2509_s5 + $0x1e8] sm:$0xff]  ;;  %v1254_v55 = vld [vmem:[%s2509_s5 + $0x60] sm:$0xff] }
 0x140   :  { %1002 = vmax.xlane.f32.xlu0 %v996_v4  ;;  %v1277_v4 = vld [vmem:[%s2509_s5 + $0x118] sm:$0xff] }
 0x141   :  { %518 = vmax.xlane.f32.xlu1 %v511_v56  ;;  %v1262_v56 = vld [vmem:[%s2509_s5 + $0xa0] sm:$0xff]  ;;  %v1690_v9 = vpack.c.bf16 %v1277_v4, %v1276_v2 }
 0x142   :  { %v1660_v12 = vpack.c.bf16 %v1263_v40, %v1262_v56  ;;  %v1286_v4 = vld [vmem:[%s2509_s5 + $0x160] sm:$0xff]  ;;  %v1287_v56 = vld [vmem:[%s2509_s5 + $0x168] sm:$0xff] }
 0x143   :  { %v1710_v40 = vpack.c.bf16 %v1287_v56, %v1286_v4 }
 0x144   :  { %1004 = vmax.xlane.f32.xlu0 %v997_v5 }
 0x1ba   :  { %v515_v32 = vpop.xlane.xlu0 %514 }
 0x1bb   :  { %522 = vst.msk [vmem:[#allocation2 + $0x8] sm:$0xff] %vm520_vm9, %v515_v32  ;;  %v1298_v32 = vld [vmem:[%s2509_s5 + $0x1c0] sm:$0xff] }
 0x1c5   :  { %v1001_v42 = vpop.xlane.xlu0 %1000 }
 0x1c6   :  { %v999_v46 = vpop.xlane.xlu1 %998  ;;  %1008 = vst.msk [vmem:[#allocation2 + $0x8] sm:$0xff] %vm1006_vm10, %v1001_v42  ;;  %v1299_v42 = vld [vmem:[%s2509_s5 + $0x1c8] sm:$0xff] }
 0x1c9   :  { %v513_v47 = vpop.xlane.xlu0 %512 }
 0x1ca   :  { %v517_v50 = vpop.xlane.xlu1 %516  ;;  %521 = vst.msk [vmem:[#allocation2] sm:$0xff] %vm520_vm9, %v513_v47  ;;  %v1698_v47 = vpack.c.bf16 %v1281_v27, %v1280_v26 }
 0x1cb   :  { %523 = vst.msk [vmem:[#allocation2 + $0x10] sm:$0xff] %vm520_vm9, %v517_v50  ;;  %v1250_v50 = vld [vmem:[%s2509_s5 + $0x40] sm:$0xff] }
 0x1cc   :  { %1007 = vst.msk [vmem:[#allocation2] sm:$0xff] %vm1006_vm10, %v999_v46  ;;  %v1666_v46 = vpack.c.bf16 %v1249_v23, %v1248_v22  ;;  %v1072_v22 = vrot.slane %v1063_v18, %v1965_v48  ;;  %v1080_v23 = vrot.slane %v1063_v18, %v1079_v19 }
 0x1cd   :  { %v1003_v53 = vpop.xlane.xlu0 %1002  ;;  %v1012_v39 = vld [vmem:[#allocation2 + $0x8] sm:$0xff] }
 0x1ce   :  { %v519_v3 = vpop.xlane.xlu1 %518  ;;  %1009 = vst.msk [vmem:[#allocation2 + $0x10] sm:$0xff] %vm1006_vm10, %v1003_v53  ;;  %v1251_v53 = vld [vmem:[%s2509_s5 + $0x48] sm:$0xff] }
 0x1cf   :  { %524 = vst.msk [vmem:[#allocation2 + $0x18] sm:$0xff] %vm520_vm9, %v519_v3  ;;  %v1668_v3 = vpack.c.bf16 %v1267_v31, %v1266_v28  ;;  %v1670_v51 = vpack.c.bf16 %v1251_v53, %v1250_v50 }
 0x1d1   :  { %v1005_v54 = vpop.xlane.xlu0 %1004 }
 0x1d2   :  { %1010 = vst.msk [vmem:[#allocation2 + $0x18] sm:$0xff] %vm1006_vm10, %v1005_v54  ;;  %v1700_v54 = vpack.c.bf16 %v1299_v42, %v1298_v32 }
 0x1d3   :  { %v1011_v57 = vld [vmem:[#allocation2] sm:$0xff] }
 0x1d4   :  { %1015 = vxpose.xlu1.b32.start [1/4] (short) (narrow) %v1011_v57, 8  ;;  %v1282_v57 = vld [vmem:[%s2509_s5 + $0x140] sm:$0xff] }
 0x1d5   :  { %v1013_v52 = vld [vmem:[#allocation2 + $0x10] sm:$0xff]  ;;  %v1702_v33 = vpack.c.bf16 %v1283_v30, %v1282_v57  ;;  %v1485_v30 = vld [vmem:[%s2511_s6] ss:$0 sm:$0xff] }
 0x1d8   :  { %1016 = vxpose.xlu1.b32.cont [2/4] (short) (narrow) %v1012_v39, 8  ;;  %v1269_v39 = vld [vmem:[%s2509_s5 + $0xd8] sm:$0xff] }
 0x1d9   :  { %v1014_v37 = vld [vmem:[#allocation2 + $0x18] sm:$0xff] }
 0x1dc   :  { %1017 = vxpose.xlu1.b32.cont [3/4] (short) (narrow) %v1013_v52, 8  ;;  %v1252_v52 = vld [vmem:[%s2509_s5 + $0x50] sm:$0xff] }
 0x1dd   :  { %v1674_v45 = vpack.c.bf16 %v1253_v43, %v1252_v52 }
 0x1e0   :  { %1018 = vxpose.xlu1.b32.end [4/4] (short) (narrow) %v1014_v37, 8  ;;  %v1672_v37 = vpack.c.bf16 %v1269_v39, %v1268_v34 }
 0x254   :  { %v1031_v5 = vpop.trf.xlu1 }
 0x255   :  { %1483 = vmatmul.mubr.msk.f32.vlgmr.msra.gmra.mrb[8].mxu0 %vm348_vm7, %v1031_v5  ;;  %1484 = vmatmul.mubr.msk.f32.vlgmr.msra.gmra.mrb[8].mxu1 %vm348_vm7, %v1031_v5  ;;  %v1272_v5 = vld [vmem:[%s2509_s5 + $0xf0] sm:$0xff] }
 0x256   :  { %1655 = vmatpush3.bf16.msra.mxu0 %v1654_v62  ;;  %1687 = vmatpush3.bf16.msra.mxu1 %v1686_v63  ;;  %v1302_v62 = vld [vmem:[%s2509_s5 + $0x1e0] sm:$0xff]  ;;  %v1676_v63 = vpack.c.bf16 %v1271_v61, %v1270_v44 }
 0x257   :  { %1657 = vmatprep.subr.bf16.mxu0 %v1656_v1  ;;  %1689 = vmatprep.subr.bf16.mxu1 %v1688_v58  ;;  %v1255_v1 = vld [vmem:[%s2509_s5 + $0x68] sm:$0xff]  ;;  %v1708_v58 = vpack.c.bf16 %v1303_v0, %v1302_v62 }
 0x258   :  { %v1678_v2 = vpack.c.bf16 %v1255_v1, %v1254_v55 }
 0x25a   :  { %1659 = vmatpush3.bf16.msra.mxu0 %v1658_v8  ;;  %1691 = vmatpush3.bf16.msra.mxu1 %v1690_v9  ;;  %v1305_v8 = vld [vmem:[%s2509_s5 + $0x1f8] sm:$0xff]  ;;  %v1680_v9 = vpack.c.bf16 %v1273_v6, %v1272_v5 }
 0x25b   :  { %1661 = vmatprep.subr.bf16.mxu0 %v1660_v12  ;;  %1693 = vmatprep.subr.bf16.mxu1 %v1692_v13  ;;  %v1712_v10 = vpack.c.bf16 %v1305_v8, %v1304_v7  ;;  %v1257_v12 = vld [vmem:[%s2509_s5 + $0x78] sm:$0xff]  ;;  %v1288_v13 = vld [vmem:[%s2509_s5 + $0x170] sm:$0xff] }
 0x25c   :  { %v1682_v14 = vpack.c.bf16 %v1257_v12, %v1256_v11  ;;  %v1714_v16 = vpack.c.bf16 %v1289_v15, %v1288_v13 }
 0x25e   :  { %1663 = vmatpush3.bf16.msra.mxu0 %v1662_v20  ;;  %1695 = vmatpush3.bf16.msra.mxu1 %v1694_v21  ;;  %v1068_v20 = vrot.slane %v1063_v18, %v1856_v36  ;;  %v1076_v21 = vrot.slane %v1063_v18, %v1075_v17 }
 0x25f   :  { %1665 = vmatprep.subr.bf16.mxu0 %v1664_v24  ;;  %1697 = vmatprep.subr.bf16.mxu1 %v1696_v25 }
 0x262   :  { %1667 = vmatpush3.bf16.msra.mxu0 %v1666_v46  ;;  %1699 = vmatpush3.bf16.msra.mxu1 %v1698_v47 }
 0x263   :  { %1669 = vmatprep.subr.bf16.mxu0 %v1668_v3  ;;  %1701 = vmatprep.subr.bf16.mxu1 %v1700_v54 }
 0x266   :  { %1671 = vmatpush3.bf16.msra.mxu0 %v1670_v51  ;;  %1703 = vmatpush3.bf16.msra.mxu1 %v1702_v33 }
 0x267   :  { %1673 = vmatprep.subr.bf16.mxu0 %v1672_v37  ;;  %1705 = vmatprep.subr.bf16.mxu1 %v1704_v41 }
 0x26a   :  { %1675 = vmatpush3.bf16.msra.mxu0 %v1674_v45  ;;  %1707 = vmatpush3.bf16.msra.mxu1 %v1706_v60 }
 0x26b   :  { %1677 = vmatprep.subr.bf16.mxu0 %v1676_v63  ;;  %1709 = vmatprep.subr.bf16.mxu1 %v1708_v58 }
 0x26e   :  { %1679 = vmatpush3.bf16.msra.mxu0 %v1678_v2  ;;  %1711 = vmatpush3.bf16.msra.mxu1 %v1710_v40 }
 0x26f   :  { %1681 = vmatprep.subr.bf16.mxu0 %v1680_v9  ;;  %1713 = vmatprep.subr.bf16.mxu1 %v1712_v10 }
 0x272   :  { %1683 = vmatpush3.bf16.msra.mxu0 %v1682_v14  ;;  %1715 = vmatpush3.bf16.msra.mxu1 %v1714_v16 }
 0x328   :  { %v1154_v24 = vpop.f32.mrb[8].mxu0  ;;  %v1225_v25 = vpop.f32.mrb[8].mxu1 }
 0x329   :  { %v1155_v26 = vadd.f32 %v1154_v24, %v1068_v20  ;;  %v1226_v27 = vadd.f32 %v1225_v25, %v1076_v21  ;;  %v1156_v28 = vpop.f32.mrb[9].mxu0  ;;  %v1227_v31 = vpop.f32.mrb[9].mxu1 }
 0x32a   :  { %v1157_v32 = vadd.f32 %v1156_v28, %v1072_v22  ;;  %v1228_v42 = vadd.f32 %v1227_v31, %v1080_v23 }
 0x32b   :  { %vm1230_vm11 = vcmp.ge.f32.partialorder %v1155_v26, 0.0  ;;  %v1234_v46 = vmul.f32 0.01, %v1155_v26  ;;  %vm1232_vm12 = vcmp.ge.f32.partialorder %v1226_v27, 0.0  ;;  %v1236_v47 = vmul.f32 0.01, %v1226_v27 }
 0x32c   :  { %v1235_v50 = vmul.f32 0.01, %v1157_v32  ;;  %v1237_v29 = vmul.f32 0.01, %v1228_v42  ;;  %vm1231_vm13 = vcmp.ge.f32.partialorder %v1157_v32, 0.0  ;;  %vm1233_vm14 = vcmp.ge.f32.partialorder %v1228_v42, 0.0 }
 0x32d   :  { %v1238_v48 = vsel %vm1230_vm11, %v1155_v26, %v1234_v46  ;;  %v1240_v3 = vsel %vm1232_vm12, %v1226_v27, %v1236_v47 }
 0x32e   :  { %v1239_v36 = vsel %vm1231_vm13, %v1157_v32, %v1235_v50  ;;  %v1241_v53 = vsel %vm1233_vm14, %v1228_v42, %v1237_v29 }
 0x32f   :  { %1377 = vmatprep.mubr.f32.mxu0 %v1239_v36  ;;  %1447 = vmatprep.mubr.f32.mxu1 %v1241_v53 }
 0x330   :  { %1378 = vmatmul.mubr.f32.vlgmr.msra.gmra.mrb[10].mxu0 %v1238_v48  ;;  %1448 = vmatmul.mubr.f32.vlgmr.msra.gmra.mrb[10].mxu1 %v1240_v3 }
 0x403   :  { %v1542_v54 = vpop.f32.mrb[10].mxu0  ;;  %v1577_v57 = vpop.f32.mrb[10].mxu1 }
 0x404   :  { %v1543_v34 = vpop.f32.mrb[11].mxu0  ;;  %v1578_v39 = vpop.f32.mrb[11].mxu1 }
 0x405   :  { %v1544_v35 = vadd.f32 %v1543_v34, %v1542_v54  ;;  %v1579_v49 = vadd.f32 %v1578_v39, %v1577_v57 }
 0x407   :  { %v1380_v51 = vadd.f32 %v1544_v35, %v1485_v30 }
 0x409   :  { %v1450_v33 = vadd.f32 %v1579_v49, %v1380_v51 }
 0x40b   :  { %1454 = vst.msk [vmem:[%s2512_s7] sm:$0x3] %vm1453_vm15, %v1450_v33 }

</bundles_post_ra>
